<compile_context>
chip_gen: v6e
topology: v6e:2x2x1
jax: 0.10.0
libtpu: 0.0.40
codegen_flags: <defaults>
</compile_context>

<pallas_src>
import functools
import math

import jax
import jax.numpy as jnp
from jax.experimental import pallas as pl
from jax.experimental.pallas import tpu as pltpu


def _vmem_limit_bytes():
    try:
        info = pltpu.get_tpu_info()
        cap = getattr(info, "vmem_capacity_bytes", None)
        if cap:
            # ~5/8 of per-core VMEM: 40 MiB on v7x (64 MiB/TC), 80 MiB on v5e/v6e (128 MiB).
            return min(int(cap) * 5 // 8, 96 * 1024 * 1024)
    except Exception:
        pass
    return 48 * 1024 * 1024


_VMEM_LIMIT_BYTES = _vmem_limit_bytes()


# --------------------------------------------------------------------------- projection
def _multiproj_kernel(*refs, do_ln, seg_has_res, eps=1e-5):
    """Fused (optional LayerNorm) -> per-segment matmul(bf16, f32 acc) -> +bias (+res)."""
    it = iter(refs)
    x_ref = next(it)
    if do_ln:
        g_ref = next(it)
        b_ref = next(it)
    seg_in = []
    for has_res in seg_has_res:
        w = next(it)
        b = next(it)
        r = next(it) if has_res else None
        seg_in.append((w, b, r))
    out_refs = list(it)

    if do_ln:
        x = x_ref[...].astype(jnp.float32)
        mu = jnp.mean(x, axis=-1, keepdims=True)
        var = jnp.mean(jnp.square(x - mu), axis=-1, keepdims=True)
        x = (x - mu) * jax.lax.rsqrt(var + eps)
        x = x * g_ref[...].astype(jnp.float32) + b_ref[...].astype(jnp.float32)
        x = x.astype(jnp.bfloat16)
    else:
        x = x_ref[...]
        if x.dtype != jnp.bfloat16:
            x = x.astype(jnp.bfloat16)

    for (w_ref, bias_ref, res_ref), o_ref in zip(seg_in, out_refs):
        acc = jnp.dot(x, w_ref[...], preferred_element_type=jnp.float32)
        acc = acc + bias_ref[...].astype(jnp.float32)
        if res_ref is not None:
            acc = acc + res_ref[...].astype(jnp.float32)
        o_ref[...] = acc.astype(o_ref.dtype)


def fused_ln_multiproj(x, segments, *, gamma=None, beta=None):
    """out_i = (LN(x) if gamma else x) @ W_i + b_i (+ res_i), for each segment.

    x: (M, E). segments: list of dicts {"w": (E, F_i), "b": (F_i,), "res": (M, F_i)|None,
    "out_dtype": dtype (default bf16)}. Grid is 1-D over rows so each W_i is DMA'd once.
    """
    M, E = x.shape
    do_ln = gamma is not None

    f_total = sum(int(s["w"].shape[1]) for s in segments)
    res_total = sum(int(s["w"].shape[1]) for s in segments if s.get("res") is not None)
    row_bytes = E * 4 + f_total * 4 + res_total * 4          # conservative f32 estimate
    weight_bytes = 2 * E * f_total                           # bf16, resident

    tm = min(M, 512)
    while tm > 64 and (2 * tm * row_bytes + 2 * weight_bytes) > _VMEM_LIMIT_BYTES // 2:
        tm //= 2
    if tm < M:
        tm = max(8, (tm // 8) * 8)
    grid = (pl.cdiv(M, tm),)

    inputs = [x]
    in_specs = [pl.BlockSpec((tm, E), lambda i: (i, 0))]
    if do_ln:
        inputs += [gamma.reshape(1, E), beta.reshape(1, E)]
        in_specs += [pl.BlockSpec((1, E), lambda i: (0, 0)),
                     pl.BlockSpec((1, E), lambda i: (0, 0))]

    seg_has_res = []
    out_specs = []
    out_shapes = []
    for seg in segments:
        w = seg["w"]
        b = seg["b"]
        res = seg.get("res")
        F_i = int(w.shape[1])
        inputs += [w.astype(jnp.bfloat16), b.reshape(1, F_i)]
        in_specs += [pl.BlockSpec((E, F_i), lambda i: (0, 0)),
                     pl.BlockSpec((1, F_i), lambda i: (0, 0))]
        if res is not None:
            inputs.append(res)
            in_specs.append(pl.BlockSpec((tm, F_i), lambda i: (i, 0)))
        seg_has_res.append(res is not None)
        out_specs.append(pl.BlockSpec((tm, F_i), lambda i: (i, 0)))
        out_shapes.append(jax.ShapeDtypeStruct((M, F_i), seg.get("out_dtype", jnp.bfloat16)))

    kernel = functools.partial(_multiproj_kernel, do_ln=do_ln,
                               seg_has_res=tuple(seg_has_res))
    outs = pl.pallas_call(
        kernel,
        grid=grid,
        in_specs=in_specs,
        out_specs=out_specs,
        out_shape=out_shapes,
        compiler_params=pltpu.CompilerParams(
            dimension_semantics=("parallel",),
            vmem_limit_bytes=_VMEM_LIMIT_BYTES),
    )(*inputs)
    return list(outs)


# --------------------------------------------------------------------------- attention
def _mha_tile(q_ref, k_ref, v_ref, nhead, need_weights):
    """q_ref: (tq,1,1,E); k_ref/v_ref: (L,1,1,E). Scale & pos already folded into q/k."""
    tq = q_ref.shape[0]
    E = q_ref.shape[3]
    L = k_ref.shape[0]
    Dh = E // nhead
    q = q_ref[...].reshape(tq, E)
    k = k_ref[...].reshape(L, E)
    v = v_ref[...].reshape(L, E)

    dn = (((1,), (1,)), ((), ()))          # contract Dh directly, no K transpose
    o_parts = []
    w_sum = None
    for h in range(nhead):                  # static unrolled head loop: one (tq, L) tile live
        sl = slice(h * Dh, (h + 1) * Dh)
        s = jax.lax.dot_general(q[:, sl], k[:, sl], dimension_numbers=dn,
                                preferred_element_type=jnp.float32)      # (tq, L)
        s = s - jnp.max(s, axis=-1, keepdims=True)
        p = jnp.exp(s)
        d = jnp.sum(p, axis=-1, keepdims=True)
        if need_weights:
            inv = 1.0 / d                    # exact denom on the path that returns weights
        else:
            inv = pl.reciprocal(d, approx=True)
        o_h = jnp.dot(p.astype(jnp.bfloat16), v[:, sl],
                      preferred_element_type=jnp.float32) * inv          # (tq, Dh)
        o_parts.append(o_h)
        if need_weights:
            pn = p * inv
            w_sum = pn if w_sum is None else (w_sum + pn)
    o = jnp.concatenate(o_parts, axis=-1)    # (tq, E), lane-dense
    return o, w_sum


def _attn_kernel(q_ref, k_ref, v_ref, o_ref, *, nhead):
    o, _ = _mha_tile(q_ref, k_ref, v_ref, nhead, need_weights=False)
    tq, E = o.shape
    o_ref[...] = o.reshape(tq, 1, 1, E).astype(o_ref.dtype)


def _attn_weights_kernel(q_ref, k_ref, v_ref, o_ref, w_ref, *, nhead):
    o, w_sum = _mha_tile(q_ref, k_ref, v_ref, nhead, need_weights=True)
    tq, E = o.shape
    o_ref[...] = o.reshape(tq, 1, 1, E).astype(o_ref.dtype)
    w_ref[...] = (w_sum * (1.0 / nhead))[None].astype(w_ref.dtype)   # head-mean in-kernel


def cross_attention(q, k, v, *, nhead, seq_len, batch, need_weights):
    """q/k/v: (M=L*N, E) bf16, sequence-major rows (row = l*N + n); scale/pos pre-folded.

    Returns ctx (M, E) bf16 [, head-mean attn weights (N, L, L) f32].
    """
    L, N = seq_len, batch
    M, E = q.shape

    q4 = q.reshape(L, N, 1, E)
    k4 = k.reshape(L, N, 1, E)
    v4 = v.reshape(L, N, 1, E)

    tq = L if L <= 128 else 128
    grid = (N, pl.cdiv(L, tq))

    q_spec = pl.BlockSpec((tq, 1, 1, E), lambda n, i: (i, n, 0, 0))
    kv_spec = pl.BlockSpec((L, 1, 1, E), lambda n, i: (0, n, 0, 0))
    o_spec = pl.BlockSpec((tq, 1, 1, E), lambda n, i: (i, n, 0, 0))

    if need_weights:
        kernel = functools.partial(_attn_weights_kernel, nhead=nhead)
        out_specs = [o_spec, pl.BlockSpec((1, tq, L), lambda n, i: (n, i, 0))]
        out_shape = [jax.ShapeDtypeStruct((L, N, 1, E), jnp.bfloat16),
                     jax.ShapeDtypeStruct((N, L, L), jnp.float32)]
    else:
        kernel = functools.partial(_attn_kernel, nhead=nhead)
        out_specs = o_spec
        out_shape = jax.ShapeDtypeStruct((L, N, 1, E), jnp.bfloat16)

    res = pl.pallas_call(
        kernel,
        grid=grid,
        in_specs=[q_spec, kv_spec, kv_spec],
        out_specs=out_specs,
        out_shape=out_shape,
        compiler_params=pltpu.CompilerParams(
            dimension_semantics=("parallel", "parallel"),
            vmem_limit_bytes=_VMEM_LIMIT_BYTES),
    )(q4, k4, v4)

    if need_weights:
        ctx4, w = res
        return ctx4.reshape(M, E), w
    return res.reshape(M, E)


# --------------------------------------------------------------------------- layer
def transformer_cross_attn_layer(params, feat_t1, feat_t2, pos=None):
    L, N, E = feat_t1.shape
    a = params["attn"]
    H = a["nhead"]
    Dh = E // H
    M = L * N
    scale = 1.0 / math.sqrt(Dh)

    # Free reshapes only (sequence-major rows, row = l*N + n). No XLA transposes.
    t1 = feat_t1.reshape(M, E)
    t2 = feat_t2.reshape(M, E)

    # Fold 1/sqrt(Dh) into Wq/bq on the host (no per-step scale multiply in attention).
    wq = a["wq"] * scale
    bq = a["bq"] * scale
    wk, wv, wo = a["wk"], a["wv"], a["wo"]
    bk, bv, bo = a["bk"], a["bv"], a["bo"]
    zeros_e = jnp.zeros((E,), jnp.float32)

    # (x + pos) @ W == x @ W + pos @ W  ->  project pos once, bake into the projections
    # through the per-segment residual path (attention kernel never sees pos).
    if pos is None:
        pos_q = pos_k = None
    else:
        p = pos.reshape(M, E)
        pos_q, pos_k = fused_ln_multiproj(
            p, [dict(w=wq, b=zeros_e), dict(w=wk, b=zeros_e)])

    # norm1(feat_t1) -> q for attention 2 (reused!), k/v for attention 1.
    q2, k1, v1 = fused_ln_multiproj(
        t1,
        [dict(w=wq, b=bq, res=pos_q),
         dict(w=wk, b=bk, res=pos_k),
         dict(w=wv, b=bv)],
        gamma=params["ln1_g"], beta=params["ln1_b"])

    # norm1(feat_t2) -> q for attention 1.
    (q1,) = fused_ln_multiproj(
        t2, [dict(w=wq, b=bq, res=pos_q)],
        gamma=params["ln1_g"], beta=params["ln1_b"])

    # ---- cross-attention 1: q=norm1(t2), k=v=norm1(t1); weights not needed.
    ctx1 = cross_attention(q1, k1, v1, nhead=H, seq_len=L, batch=N, need_weights=False)
    # Output projection fused with residual add (f32 residual stream).
    (t2_new,) = fused_ln_multiproj(
        ctx1, [dict(w=wo, b=bo, res=t2, out_dtype=jnp.float32)])

    # norm2(updated feat_t2) -> k/v for attention 2.
    k2, v2 = fused_ln_multiproj(
        t2_new,
        [dict(w=wk, b=bk, res=pos_k), dict(w=wv, b=bv)],
        gamma=params["ln2_g"], beta=params["ln2_b"])

    # ---- cross-attention 2: q=norm1(t1) (old norm1!), k=v=norm2(t2'); weights returned.
    ctx2, raw_attn = cross_attention(q2, k2, v2, nhead=H, seq_len=L, batch=N,
                                     need_weights=True)
    (t1_new,) = fused_ln_multiproj(
        ctx2, [dict(w=wo, b=bo, res=t1, out_dtype=jnp.float32)])

    out_t1 = t1_new.reshape(L, N, E)
    out_t2 = t2_new.reshape(L, N, E)
    return out_t1, out_t2, raw_attn  # raw_attn: (N, Lq, Lk), head-averaged softmax probs


# --------------------------------------------------------------------------- params
def init_params(key, embed_dim, nhead):
    ks = jax.random.split(key, 4)
    s = 0.02

    def w(k, shape):
        return jax.random.normal(k, shape, jnp.float32) * s

    return {
        "ln1_g": jnp.ones((embed_dim,), jnp.float32),
        "ln1_b": jnp.zeros((embed_dim,), jnp.float32),
        "ln2_g": jnp.ones((embed_dim,), jnp.float32),
        "ln2_b": jnp.zeros((embed_dim,), jnp.float32),
        "attn": {
            "nhead": nhead,
            "wq": w(ks[0], (embed_dim, embed_dim)), "bq": jnp.zeros((embed_dim,), jnp.float32),
            "wk": w(ks[1], (embed_dim, embed_dim)), "bk": jnp.zeros((embed_dim,), jnp.float32),
            "wv": w(ks[2], (embed_dim, embed_dim)), "bv": jnp.zeros((embed_dim,), jnp.float32),
            "wo": w(ks[3], (embed_dim, embed_dim)), "bo": jnp.zeros((embed_dim,), jnp.float32),
        },
    }


# --------------------------------------------------------------------------- main
if __name__ == "__main__":
    L, N, E, H = 8, 2, 32, 4  # seq, batch, embed_dim, nhead

    root = jax.random.PRNGKey(0)
    k_params, k_t1, k_t2, k_pos = jax.random.split(root, 4)

    params = init_params(k_params, E, H)
    feat_t1 = jax.random.normal(k_t1, (L, N, E), jnp.float32)
    feat_t2 = jax.random.normal(k_t2, (L, N, E), jnp.float32)
    pos = jax.random.normal(k_pos, (L, N, E), jnp.float32)

    fn = jax.jit(functools.partial(transformer_cross_attn_layer, params))
    out_t1, out_t2, raw_attn = fn(feat_t1, feat_t2, pos)
    jax.block_until_ready((out_t1, out_t2, raw_attn))

    assert out_t1.shape == (L, N, E)
    assert out_t2.shape == (L, N, E)
    assert raw_attn.shape == (N, L, L)
    assert bool(jnp.all(jnp.isfinite(out_t1)))
    assert bool(jnp.all(jnp.isfinite(out_t2)))
    assert bool(jnp.all(jnp.isfinite(raw_attn)))
    # attention weights from the exact-softmax path should sum to ~1 over keys
    assert bool(jnp.all(jnp.abs(jnp.sum(raw_attn, axis=-1) - 1.0) < 1e-3))
    print("KERNEL_OK")
</pallas_src>

<mosaic_0001>
module attributes {stable_mosaic.version = 11 : i64} {
  func.func @_multiproj_kernel(%arg0: i32, %arg1: memref<16x32xf32, #tpu.memory_space<vmem>>, %arg2: memref<1x32xf32, #tpu.memory_space<vmem>>, %arg3: memref<1x32xf32, #tpu.memory_space<vmem>>, %arg4: memref<32x32xbf16, #tpu.memory_space<vmem>>, %arg5: memref<1x32xf32, #tpu.memory_space<vmem>>, %arg6: memref<16x32xbf16, #tpu.memory_space<vmem>>, %arg7: memref<16x32xbf16, #tpu.memory_space<vmem>>) attributes {dimension_semantics = [#tpu.dimension_semantics<parallel>], iteration_bounds = array<i64: 1>, scalar_prefetch = 0 : i64, scratch_operands = 0 : i64, tpu.core_type = #tpu.core_type<tc>, window_params = [{transform_indices = @transform_0, window_bounds = array<i64: 16, 32>}, {pipeline_mode = #tpu.pipeline_mode<synchronous>, transform_indices = @transform_1, window_bounds = array<i64: 1, 32>}, {pipeline_mode = #tpu.pipeline_mode<synchronous>, transform_indices = @transform_2, window_bounds = array<i64: 1, 32>}, {pipeline_mode = #tpu.pipeline_mode<synchronous>, transform_indices = @transform_3, window_bounds = array<i64: 32, 32>}, {pipeline_mode = #tpu.pipeline_mode<synchronous>, transform_indices = @transform_4, window_bounds = array<i64: 1, 32>}, {transform_indices = @transform_5, window_bounds = array<i64: 16, 32>}, {transform_indices = @transform_6, window_bounds = array<i64: 16, 32>}]} {
    %c0 = arith.constant 0 : index
    %c0_0 = arith.constant 0 : index
    %0 = vector.load %arg1[%c0, %c0_0] : memref<16x32xf32, #tpu.memory_space<vmem>>, vector<16x32xf32>
    %cst = arith.constant dense<0.000000e+00> : vector<16xf32>
    %1 = vector.multi_reduction <add>, %0, %cst [1] : vector<16x32xf32> to vector<16xf32>
    %2 = vector.shape_cast %1 : vector<16xf32> to vector<16x1xf32>
    %cst_1 = arith.constant 3.200000e+01 : f32
    %3 = vector.broadcast %cst_1 : f32 to vector<16x1xf32>
    %4 = arith.divf %2, %3 : vector<16x1xf32>
    %5 = vector.broadcast %4 : vector<16x1xf32> to vector<16x32xf32>
    %6 = arith.subf %0, %5 : vector<16x32xf32>
    %7 = arith.mulf %6, %6 : vector<16x32xf32>
    %cst_2 = arith.constant dense<0.000000e+00> : vector<16xf32>
    %8 = vector.multi_reduction <add>, %7, %cst_2 [1] : vector<16x32xf32> to vector<16xf32>
    %9 = vector.shape_cast %8 : vector<16xf32> to vector<16x1xf32>
    %cst_3 = arith.constant 3.200000e+01 : f32
    %10 = vector.broadcast %cst_3 : f32 to vector<16x1xf32>
    %11 = arith.divf %9, %10 : vector<16x1xf32>
    %12 = vector.broadcast %4 : vector<16x1xf32> to vector<16x32xf32>
    %13 = arith.subf %0, %12 : vector<16x32xf32>
    %cst_4 = arith.constant 9.99999974E-6 : f32
    %14 = vector.broadcast %cst_4 : f32 to vector<16x1xf32>
    %15 = arith.addf %11, %14 : vector<16x1xf32>
    %16 = math.rsqrt %15 : vector<16x1xf32>
    %17 = vector.broadcast %16 : vector<16x1xf32> to vector<16x32xf32>
    %18 = arith.mulf %13, %17 : vector<16x32xf32>
    %c0_5 = arith.constant 0 : index
    %c0_6 = arith.constant 0 : index
    %19 = vector.load %arg2[%c0_5, %c0_6] : memref<1x32xf32, #tpu.memory_space<vmem>>, vector<1x32xf32>
    %20 = vector.broadcast %19 : vector<1x32xf32> to vector<16x32xf32>
    %21 = arith.mulf %18, %20 : vector<16x32xf32>
    %c0_7 = arith.constant 0 : index
    %c0_8 = arith.constant 0 : index
    %22 = vector.load %arg3[%c0_7, %c0_8] : memref<1x32xf32, #tpu.memory_space<vmem>>, vector<1x32xf32>
    %23 = vector.broadcast %22 : vector<1x32xf32> to vector<16x32xf32>
    %24 = arith.addf %21, %23 : vector<16x32xf32>
    %25 = arith.truncf %24 : vector<16x32xf32> to vector<16x32xbf16>
    %c0_9 = arith.constant 0 : index
    %c0_10 = arith.constant 0 : index
    %26 = vector.load %arg4[%c0_9, %c0_10] : memref<32x32xbf16, #tpu.memory_space<vmem>>, vector<32x32xbf16>
    %cst_11 = arith.constant dense<0.000000e+00> : vector<16x32xf32>
    %27 = tpu.matmul %25, %26, %cst_11 {dimension_numbers = #tpu.dot_dimension_numbers<[1], [0], [0], [1], [0, 0, 1, 1], [], []>} : vector<16x32xbf16>, vector<32x32xbf16>, vector<16x32xf32> -> vector<16x32xf32>
    %c0_12 = arith.constant 0 : index
    %c0_13 = arith.constant 0 : index
    %28 = vector.load %arg5[%c0_12, %c0_13] : memref<1x32xf32, #tpu.memory_space<vmem>>, vector<1x32xf32>
    %29 = vector.broadcast %28 : vector<1x32xf32> to vector<16x32xf32>
    %30 = arith.addf %27, %29 : vector<16x32xf32>
    %c0_14 = arith.constant 0 : index
    %c0_15 = arith.constant 0 : index
    %31 = vector.load %arg6[%c0_14, %c0_15] : memref<16x32xbf16, #tpu.memory_space<vmem>>, vector<16x32xbf16>
    %32 = arith.extf %31 : vector<16x32xbf16> to vector<16x32xf32>
    %33 = arith.addf %30, %32 : vector<16x32xf32>
    %34 = arith.truncf %33 : vector<16x32xf32> to vector<16x32xbf16>
    %c0_16 = arith.constant 0 : index
    %c0_17 = arith.constant 0 : index
    %35 = vector.load %arg7[%c0_16, %c0_17] : memref<16x32xbf16, #tpu.memory_space<vmem>>, vector<16x32xbf16>
    tpu.vector_store %arg7[%c0_16, %c0_17], %34 {strides = array<i32>} : memref<16x32xbf16, #tpu.memory_space<vmem>>, vector<16x32xbf16>,
    return
  }
  func.func @transform_0(%arg0: i32) -> (i32, i32) {
    %c0_i32 = arith.constant 0 : i32
    %c0_i32_0 = arith.constant 0 : i32
    return %arg0, %c0_i32 : i32, i32
  }
  func.func @transform_1(%arg0: i32) -> (i32, i32) {
    %c0_i32 = arith.constant 0 : i32
    %c0_i32_0 = arith.constant 0 : i32
    %c0_i32_1 = arith.constant 0 : i32
    return %c0_i32, %c0_i32_0 : i32, i32
  }
  func.func @transform_2(%arg0: i32) -> (i32, i32) {
    %c0_i32 = arith.constant 0 : i32
    %c0_i32_0 = arith.constant 0 : i32
    %c0_i32_1 = arith.constant 0 : i32
    return %c0_i32, %c0_i32_0 : i32, i32
  }
  func.func @transform_3(%arg0: i32) -> (i32, i32) {
    %c0_i32 = arith.constant 0 : i32
    %c0_i32_0 = arith.constant 0 : i32
    %c0_i32_1 = arith.constant 0 : i32
    return %c0_i32, %c0_i32_0 : i32, i32
  }
  func.func @transform_4(%arg0: i32) -> (i32, i32) {
    %c0_i32 = arith.constant 0 : i32
    %c0_i32_0 = arith.constant 0 : i32
    %c0_i32_1 = arith.constant 0 : i32
    return %c0_i32, %c0_i32_0 : i32, i32
  }
  func.func @transform_5(%arg0: i32) -> (i32, i32) {
    %c0_i32 = arith.constant 0 : i32
    %c0_i32_0 = arith.constant 0 : i32
    return %arg0, %c0_i32 : i32, i32
  }
  func.func @transform_6(%arg0: i32) -> (i32, i32) {
    %c0_i32 = arith.constant 0 : i32
    %c0_i32_0 = arith.constant 0 : i32
    return %arg0, %c0_i32 : i32, i32
  }
}

module attributes {stable_mosaic.version = 11 : i64} {
  func.func @_multiproj_kernel(%arg0: i32, %arg1: memref<16x32xf32, #tpu.memory_space<vmem>>, %arg2: memref<32x32xbf16, #tpu.memory_space<vmem>>, %arg3: memref<1x32xf32, #tpu.memory_space<vmem>>, %arg4: memref<32x32xbf16, #tpu.memory_space<vmem>>, %arg5: memref<1x32xf32, #tpu.memory_space<vmem>>, %arg6: memref<16x32xbf16, #tpu.memory_space<vmem>>, %arg7: memref<16x32xbf16, #tpu.memory_space<vmem>>) attributes {dimension_semantics = [#tpu.dimension_semantics<parallel>], iteration_bounds = array<i64: 1>, scalar_prefetch = 0 : i64, scratch_operands = 0 : i64, tpu.core_type = #tpu.core_type<tc>, window_params = [{transform_indices = @transform_0, window_bounds = array<i64: 16, 32>}, {pipeline_mode = #tpu.pipeline_mode<synchronous>, transform_indices = @transform_1, window_bounds = array<i64: 32, 32>}, {pipeline_mode = #tpu.pipeline_mode<synchronous>, transform_indices = @transform_2, window_bounds = array<i64: 1, 32>}, {pipeline_mode = #tpu.pipeline_mode<synchronous>, transform_indices = @transform_3, window_bounds = array<i64: 32, 32>}, {pipeline_mode = #tpu.pipeline_mode<synchronous>, transform_indices = @transform_4, window_bounds = array<i64: 1, 32>}, {transform_indices = @transform_5, window_bounds = array<i64: 16, 32>}, {transform_indices = @transform_6, window_bounds = array<i64: 16, 32>}]} {
    %c0 = arith.constant 0 : index
    %c0_0 = arith.constant 0 : index
    %0 = vector.load %arg1[%c0, %c0_0] : memref<16x32xf32, #tpu.memory_space<vmem>>, vector<16x32xf32>
    %1 = arith.truncf %0 : vector<16x32xf32> to vector<16x32xbf16>
    %c0_1 = arith.constant 0 : index
    %c0_2 = arith.constant 0 : index
    %2 = vector.load %arg2[%c0_1, %c0_2] : memref<32x32xbf16, #tpu.memory_space<vmem>>, vector<32x32xbf16>
    %cst = arith.constant dense<0.000000e+00> : vector<16x32xf32>
    %3 = tpu.matmul %1, %2, %cst {dimension_numbers = #tpu.dot_dimension_numbers<[1], [0], [0], [1], [0, 0, 1, 1], [], []>} : vector<16x32xbf16>, vector<32x32xbf16>, vector<16x32xf32> -> vector<16x32xf32>
    %c0_3 = arith.constant 0 : index
    %c0_4 = arith.constant 0 : index
    %4 = vector.load %arg3[%c0_3, %c0_4] : memref<1x32xf32, #tpu.memory_space<vmem>>, vector<1x32xf32>
    %5 = vector.broadcast %4 : vector<1x32xf32> to vector<16x32xf32>
    %6 = arith.addf %3, %5 : vector<16x32xf32>
    %7 = arith.truncf %6 : vector<16x32xf32> to vector<16x32xbf16>
    %c0_5 = arith.constant 0 : index
    %c0_6 = arith.constant 0 : index
    %8 = vector.load %arg6[%c0_5, %c0_6] : memref<16x32xbf16, #tpu.memory_space<vmem>>, vector<16x32xbf16>
    tpu.vector_store %arg6[%c0_5, %c0_6], %7 {strides = array<i32>} : memref<16x32xbf16, #tpu.memory_space<vmem>>, vector<16x32xbf16>,
    %c0_7 = arith.constant 0 : index
    %c0_8 = arith.constant 0 : index
    %9 = vector.load %arg4[%c0_7, %c0_8] : memref<32x32xbf16, #tpu.memory_space<vmem>>, vector<32x32xbf16>
    %cst_9 = arith.constant dense<0.000000e+00> : vector<16x32xf32>
    %10 = tpu.matmul %1, %9, %cst_9 {dimension_numbers = #tpu.dot_dimension_numbers<[1], [0], [0], [1], [0, 0, 1, 1], [], []>} : vector<16x32xbf16>, vector<32x32xbf16>, vector<16x32xf32> -> vector<16x32xf32>
    %c0_10 = arith.constant 0 : index
    %c0_11 = arith.constant 0 : index
    %11 = vector.load %arg5[%c0_10, %c0_11] : memref<1x32xf32, #tpu.memory_space<vmem>>, vector<1x32xf32>
    %12 = vector.broadcast %11 : vector<1x32xf32> to vector<16x32xf32>
    %13 = arith.addf %10, %12 : vector<16x32xf32>
    %14 = arith.truncf %13 : vector<16x32xf32> to vector<16x32xbf16>
    %c0_12 = arith.constant 0 : index
    %c0_13 = arith.constant 0 : index
    %15 = vector.load %arg7[%c0_12, %c0_13] : memref<16x32xbf16, #tpu.memory_space<vmem>>, vector<16x32xbf16>
    tpu.vector_store %arg7[%c0_12, %c0_13], %14 {strides = array<i32>} : memref<16x32xbf16, #tpu.memory_space<vmem>>, vector<16x32xbf16>,
    return
  }
  func.func @transform_0(%arg0: i32) -> (i32, i32) {
    %c0_i32 = arith.constant 0 : i32
    %c0_i32_0 = arith.constant 0 : i32
    return %arg0, %c0_i32 : i32, i32
  }
  func.func @transform_1(%arg0: i32) -> (i32, i32) {
    %c0_i32 = arith.constant 0 : i32
    %c0_i32_0 = arith.constant 0 : i32
    %c0_i32_1 = arith.constant 0 : i32
    return %c0_i32, %c0_i32_0 : i32, i32
  }
  func.func @transform_2(%arg0: i32) -> (i32, i32) {
    %c0_i32 = arith.constant 0 : i32
    %c0_i32_0 = arith.constant 0 : i32
    %c0_i32_1 = arith.constant 0 : i32
    return %c0_i32, %c0_i32_0 : i32, i32
  }
  func.func @transform_3(%arg0: i32) -> (i32, i32) {
    %c0_i32 = arith.constant 0 : i32
    %c0_i32_0 = arith.constant 0 : i32
    %c0_i32_1 = arith.constant 0 : i32
    return %c0_i32, %c0_i32_0 : i32, i32
  }
  func.func @transform_4(%arg0: i32) -> (i32, i32) {
    %c0_i32 = arith.constant 0 : i32
    %c0_i32_0 = arith.constant 0 : i32
    %c0_i32_1 = arith.constant 0 : i32
    return %c0_i32, %c0_i32_0 : i32, i32
  }
  func.func @transform_5(%arg0: i32) -> (i32, i32) {
    %c0_i32 = arith.constant 0 : i32
    %c0_i32_0 = arith.constant 0 : i32
    return %arg0, %c0_i32 : i32, i32
  }
  func.func @transform_6(%arg0: i32) -> (i32, i32) {
    %c0_i32 = arith.constant 0 : i32
    %c0_i32_0 = arith.constant 0 : i32
    return %arg0, %c0_i32 : i32, i32
  }
}

module attributes {stable_mosaic.version = 11 : i64} {
  func.func @_attn_kernel(%arg0: i32, %arg1: i32, %arg2: memref<8x1x1x32xbf16, #tpu.memory_space<vmem>>, %arg3: memref<8x1x1x32xbf16, #tpu.memory_space<vmem>>, %arg4: memref<8x1x1x32xbf16, #tpu.memory_space<vmem>>, %arg5: memref<8x1x1x32xbf16, #tpu.memory_space<vmem>>) attributes {dimension_semantics = [#tpu.dimension_semantics<parallel>, #tpu.dimension_semantics<parallel>], iteration_bounds = array<i64: 2, 1>, scalar_prefetch = 0 : i64, scratch_operands = 0 : i64, tpu.core_type = #tpu.core_type<tc>, window_params = [{transform_indices = @transform_0, window_bounds = array<i64: 8, 1, 1, 32>}, {transform_indices = @transform_1, window_bounds = array<i64: 8, 1, 1, 32>}, {transform_indices = @transform_2, window_bounds = array<i64: 8, 1, 1, 32>}, {transform_indices = @transform_3, window_bounds = array<i64: 8, 1, 1, 32>}]} {
    %c0 = arith.constant 0 : index
    %c0_0 = arith.constant 0 : index
    %c0_1 = arith.constant 0 : index
    %c0_2 = arith.constant 0 : index
    %0 = vector.load %arg2[%c0, %c0_0, %c0_1, %c0_2] : memref<8x1x1x32xbf16, #tpu.memory_space<vmem>>, vector<8x1x1x32xbf16>
    %1 = vector.shape_cast %0 : vector<8x1x1x32xbf16> to vector<8x32xbf16>
    %c0_3 = arith.constant 0 : index
    %c0_4 = arith.constant 0 : index
    %c0_5 = arith.constant 0 : index
    %c0_6 = arith.constant 0 : index
    %2 = vector.load %arg3[%c0_3, %c0_4, %c0_5, %c0_6] : memref<8x1x1x32xbf16, #tpu.memory_space<vmem>>, vector<8x1x1x32xbf16>
    %3 = vector.shape_cast %2 : vector<8x1x1x32xbf16> to vector<8x32xbf16>
    %c0_7 = arith.constant 0 : index
    %c0_8 = arith.constant 0 : index
    %c0_9 = arith.constant 0 : index
    %c0_10 = arith.constant 0 : index
    %4 = vector.load %arg4[%c0_7, %c0_8, %c0_9, %c0_10] : memref<8x1x1x32xbf16, #tpu.memory_space<vmem>>, vector<8x1x1x32xbf16>
    %5 = vector.shape_cast %4 : vector<8x1x1x32xbf16> to vector<8x32xbf16>
    %6 = vector.extract_strided_slice %1 {offsets = [0, 0], sizes = [8, 8], strides = [1, 1]} : vector<8x32xbf16> to vector<8x8xbf16>
    %7 = vector.extract_strided_slice %3 {offsets = [0, 0], sizes = [8, 8], strides = [1, 1]} : vector<8x32xbf16> to vector<8x8xbf16>
    %cst = arith.constant dense<0.000000e+00> : vector<8x8xf32>
    %8 = tpu.matmul %6, %7, %cst {dimension_numbers = #tpu.dot_dimension_numbers<[1], [1], [0], [0], [0, 0, 1, 0], [], []>} : vector<8x8xbf16>, vector<8x8xbf16>, vector<8x8xf32> -> vector<8x8xf32>
    %cst_11 = arith.constant dense<0xFF800000> : vector<8xf32>
    %9 = vector.multi_reduction <maximumf>, %8, %cst_11 [1] : vector<8x8xf32> to vector<8xf32>
    %10 = vector.shape_cast %9 : vector<8xf32> to vector<8x1xf32>
    %11 = vector.broadcast %10 : vector<8x1xf32> to vector<8x8xf32>
    %12 = arith.subf %8, %11 : vector<8x8xf32>
    %13 = math.exp %12 : vector<8x8xf32>
    %cst_12 = arith.constant dense<0.000000e+00> : vector<8xf32>
    %14 = vector.multi_reduction <add>, %13, %cst_12 [1] : vector<8x8xf32> to vector<8xf32>
    %15 = vector.shape_cast %14 : vector<8xf32> to vector<8x1xf32>
    %16 = tpu.reciprocal %15 {approx = true} : vector<8x1xf32> -> vector<8x1xf32>
    %17 = arith.truncf %13 : vector<8x8xf32> to vector<8x8xbf16>
    %18 = vector.extract_strided_slice %5 {offsets = [0, 0], sizes = [8, 8], strides = [1, 1]} : vector<8x32xbf16> to vector<8x8xbf16>
    %cst_13 = arith.constant dense<0.000000e+00> : vector<8x8xf32>
    %19 = tpu.matmul %17, %18, %cst_13 {dimension_numbers = #tpu.dot_dimension_numbers<[1], [0], [0], [1], [0, 0, 1, 1], [], []>} : vector<8x8xbf16>, vector<8x8xbf16>, vector<8x8xf32> -> vector<8x8xf32>
    %20 = vector.broadcast %16 : vector<8x1xf32> to vector<8x8xf32>
    %21 = arith.mulf %19, %20 : vector<8x8xf32>
    %22 = vector.extract_strided_slice %1 {offsets = [0, 8], sizes = [8, 8], strides = [1, 1]} : vector<8x32xbf16> to vector<8x8xbf16>
    %23 = vector.extract_strided_slice %3 {offsets = [0, 8], sizes = [8, 8], strides = [1, 1]} : vector<8x32xbf16> to vector<8x8xbf16>
    %cst_14 = arith.constant dense<0.000000e+00> : vector<8x8xf32>
    %24 = tpu.matmul %22, %23, %cst_14 {dimension_numbers = #tpu.dot_dimension_numbers<[1], [1], [0], [0], [0, 0, 1, 0], [], []>} : vector<8x8xbf16>, vector<8x8xbf16>, vector<8x8xf32> -> vector<8x8xf32>
    %cst_15 = arith.constant dense<0xFF800000> : vector<8xf32>
    %25 = vector.multi_reduction <maximumf>, %24, %cst_15 [1] : vector<8x8xf32> to vector<8xf32>
    %26 = vector.shape_cast %25 : vector<8xf32> to vector<8x1xf32>
    %27 = vector.broadcast %26 : vector<8x1xf32> to vector<8x8xf32>
    %28 = arith.subf %24, %27 : vector<8x8xf32>
    %29 = math.exp %28 : vector<8x8xf32>
    %cst_16 = arith.constant dense<0.000000e+00> : vector<8xf32>
    %30 = vector.multi_reduction <add>, %29, %cst_16 [1] : vector<8x8xf32> to vector<8xf32>
    %31 = vector.shape_cast %30 : vector<8xf32> to vector<8x1xf32>
    %32 = tpu.reciprocal %31 {approx = true} : vector<8x1xf32> -> vector<8x1xf32>
    %33 = arith.truncf %29 : vector<8x8xf32> to vector<8x8xbf16>
    %34 = vector.extract_strided_slice %5 {offsets = [0, 8], sizes = [8, 8], strides = [1, 1]} : vector<8x32xbf16> to vector<8x8xbf16>
    %cst_17 = arith.constant dense<0.000000e+00> : vector<8x8xf32>
    %35 = tpu.matmul %33, %34, %cst_17 {dimension_numbers = #tpu.dot_dimension_numbers<[1], [0], [0], [1], [0, 0, 1, 1], [], []>} : vector<8x8xbf16>, vector<8x8xbf16>, vector<8x8xf32> -> vector<8x8xf32>
    %36 = vector.broadcast %32 : vector<8x1xf32> to vector<8x8xf32>
    %37 = arith.mulf %35, %36 : vector<8x8xf32>
    %38 = vector.extract_strided_slice %1 {offsets = [0, 16], sizes = [8, 8], strides = [1, 1]} : vector<8x32xbf16> to vector<8x8xbf16>
    %39 = vector.extract_strided_slice %3 {offsets = [0, 16], sizes = [8, 8], strides = [1, 1]} : vector<8x32xbf16> to vector<8x8xbf16>
    %cst_18 = arith.constant dense<0.000000e+00> : vector<8x8xf32>
    %40 = tpu.matmul %38, %39, %cst_18 {dimension_numbers = #tpu.dot_dimension_numbers<[1], [1], [0], [0], [0, 0, 1, 0], [], []>} : vector<8x8xbf16>, vector<8x8xbf16>, vector<8x8xf32> -> vector<8x8xf32>
    %cst_19 = arith.constant dense<0xFF800000> : vector<8xf32>
    %41 = vector.multi_reduction <maximumf>, %40, %cst_19 [1] : vector<8x8xf32> to vector<8xf32>
    %42 = vector.shape_cast %41 : vector<8xf32> to vector<8x1xf32>
    %43 = vector.broadcast %42 : vector<8x1xf32> to vector<8x8xf32>
    %44 = arith.subf %40, %43 : vector<8x8xf32>
    %45 = math.exp %44 : vector<8x8xf32>
    %cst_20 = arith.constant dense<0.000000e+00> : vector<8xf32>
    %46 = vector.multi_reduction <add>, %45, %cst_20 [1] : vector<8x8xf32> to vector<8xf32>
    %47 = vector.shape_cast %46 : vector<8xf32> to vector<8x1xf32>
    %48 = tpu.reciprocal %47 {approx = true} : vector<8x1xf32> -> vector<8x1xf32>
    %49 = arith.truncf %45 : vector<8x8xf32> to vector<8x8xbf16>
    %50 = vector.extract_strided_slice %5 {offsets = [0, 16], sizes = [8, 8], strides = [1, 1]} : vector<8x32xbf16> to vector<8x8xbf16>
    %cst_21 = arith.constant dense<0.000000e+00> : vector<8x8xf32>
    %51 = tpu.matmul %49, %50, %cst_21 {dimension_numbers = #tpu.dot_dimension_numbers<[1], [0], [0], [1], [0, 0, 1, 1], [], []>} : vector<8x8xbf16>, vector<8x8xbf16>, vector<8x8xf32> -> vector<8x8xf32>
    %52 = vector.broadcast %48 : vector<8x1xf32> to vector<8x8xf32>
    %53 = arith.mulf %51, %52 : vector<8x8xf32>
    %54 = vector.extract_strided_slice %1 {offsets = [0, 24], sizes = [8, 8], strides = [1, 1]} : vector<8x32xbf16> to vector<8x8xbf16>
    %55 = vector.extract_strided_slice %3 {offsets = [0, 24], sizes = [8, 8], strides = [1, 1]} : vector<8x32xbf16> to vector<8x8xbf16>
    %cst_22 = arith.constant dense<0.000000e+00> : vector<8x8xf32>
    %56 = tpu.matmul %54, %55, %cst_22 {dimension_numbers = #tpu.dot_dimension_numbers<[1], [1], [0], [0], [0, 0, 1, 0], [], []>} : vector<8x8xbf16>, vector<8x8xbf16>, vector<8x8xf32> -> vector<8x8xf32>
    %cst_23 = arith.constant dense<0xFF800000> : vector<8xf32>
    %57 = vector.multi_reduction <maximumf>, %56, %cst_23 [1] : vector<8x8xf32> to vector<8xf32>
    %58 = vector.shape_cast %57 : vector<8xf32> to vector<8x1xf32>
    %59 = vector.broadcast %58 : vector<8x1xf32> to vector<8x8xf32>
    %60 = arith.subf %56, %59 : vector<8x8xf32>
    %61 = math.exp %60 : vector<8x8xf32>
    %cst_24 = arith.constant dense<0.000000e+00> : vector<8xf32>
    %62 = vector.multi_reduction <add>, %61, %cst_24 [1] : vector<8x8xf32> to vector<8xf32>
    %63 = vector.shape_cast %62 : vector<8xf32> to vector<8x1xf32>
    %64 = tpu.reciprocal %63 {approx = true} : vector<8x1xf32> -> vector<8x1xf32>
    %65 = arith.truncf %61 : vector<8x8xf32> to vector<8x8xbf16>
    %66 = vector.extract_strided_slice %5 {offsets = [0, 24], sizes = [8, 8], strides = [1, 1]} : vector<8x32xbf16> to vector<8x8xbf16>
    %cst_25 = arith.constant dense<0.000000e+00> : vector<8x8xf32>
    %67 = tpu.matmul %65, %66, %cst_25 {dimension_numbers = #tpu.dot_dimension_numbers<[1], [0], [0], [1], [0, 0, 1, 1], [], []>} : vector<8x8xbf16>, vector<8x8xbf16>, vector<8x8xf32> -> vector<8x8xf32>
    %68 = vector.broadcast %64 : vector<8x1xf32> to vector<8x8xf32>
    %69 = arith.mulf %67, %68 : vector<8x8xf32>
    %70 = tpu.concatenate %21, %37, %53, %69 in 1 : vector<8x8xf32>, vector<8x8xf32>, vector<8x8xf32>, vector<8x8xf32> -> vector<8x32xf32>
    %71 = vector.shape_cast %70 : vector<8x32xf32> to vector<8x1x1x32xf32>
    %72 = arith.truncf %71 : vector<8x1x1x32xf32> to vector<8x1x1x32xbf16>
    %c0_26 = arith.constant 0 : index
    %c0_27 = arith.constant 0 : index
    %c0_28 = arith.constant 0 : index
    %c0_29 = arith.constant 0 : index
    %73 = vector.load %arg5[%c0_26, %c0_27, %c0_28, %c0_29] : memref<8x1x1x32xbf16, #tpu.memory_space<vmem>>, vector<8x1x1x32xbf16>
    tpu.vector_store %arg5[%c0_26, %c0_27, %c0_28, %c0_29], %72 {strides = array<i32>} : memref<8x1x1x32xbf16, #tpu.memory_space<vmem>>, vector<8x1x1x32xbf16>,
    return
  }
  func.func @transform_0(%arg0: i32, %arg1: i32) -> (i32, i32, i32, i32) {
    %c0_i32 = arith.constant 0 : i32
    %c0_i32_0 = arith.constant 0 : i32
    %c0_i32_1 = arith.constant 0 : i32
    return %arg1, %arg0, %c0_i32, %c0_i32_0 : i32, i32, i32, i32
  }
  func.func @transform_1(%arg0: i32, %arg1: i32) -> (i32, i32, i32, i32) {
    %c0_i32 = arith.constant 0 : i32
    %c0_i32_0 = arith.constant 0 : i32
    %c0_i32_1 = arith.constant 0 : i32
    %c0_i32_2 = arith.constant 0 : i32
    return %c0_i32, %arg0, %c0_i32_0, %c0_i32_1 : i32, i32, i32, i32
  }
  func.func @transform_2(%arg0: i32, %arg1: i32) -> (i32, i32, i32, i32) {
    %c0_i32 = arith.constant 0 : i32
    %c0_i32_0 = arith.constant 0 : i32
    %c0_i32_1 = arith.constant 0 : i32
    %c0_i32_2 = arith.constant 0 : i32
    return %c0_i32, %arg0, %c0_i32_0, %c0_i32_1 : i32, i32, i32, i32
  }
  func.func @transform_3(%arg0: i32, %arg1: i32) -> (i32, i32, i32, i32) {
    %c0_i32 = arith.constant 0 : i32
    %c0_i32_0 = arith.constant 0 : i32
    %c0_i32_1 = arith.constant 0 : i32
    return %arg1, %arg0, %c0_i32, %c0_i32_0 : i32, i32, i32, i32
  }
}

module attributes {stable_mosaic.version = 11 : i64} {
  func.func @_multiproj_kernel(%arg0: i32, %arg1: memref<16x32xf32, #tpu.memory_space<vmem>>, %arg2: memref<1x32xf32, #tpu.memory_space<vmem>>, %arg3: memref<1x32xf32, #tpu.memory_space<vmem>>, %arg4: memref<32x32xbf16, #tpu.memory_space<vmem>>, %arg5: memref<1x32xf32, #tpu.memory_space<vmem>>, %arg6: memref<16x32xbf16, #tpu.memory_space<vmem>>, %arg7: memref<32x32xbf16, #tpu.memory_space<vmem>>, %arg8: memref<1x32xf32, #tpu.memory_space<vmem>>, %arg9: memref<16x32xbf16, #tpu.memory_space<vmem>>, %arg10: memref<32x32xbf16, #tpu.memory_space<vmem>>, %arg11: memref<1x32xf32, #tpu.memory_space<vmem>>, %arg12: memref<16x32xbf16, #tpu.memory_space<vmem>>, %arg13: memref<16x32xbf16, #tpu.memory_space<vmem>>, %arg14: memref<16x32xbf16, #tpu.memory_space<vmem>>) attributes {dimension_semantics = [#tpu.dimension_semantics<parallel>], iteration_bounds = array<i64: 1>, scalar_prefetch = 0 : i64, scratch_operands = 0 : i64, tpu.core_type = #tpu.core_type<tc>, window_params = [{transform_indices = @transform_0, window_bounds = array<i64: 16, 32>}, {pipeline_mode = #tpu.pipeline_mode<synchronous>, transform_indices = @transform_1, window_bounds = array<i64: 1, 32>}, {pipeline_mode = #tpu.pipeline_mode<synchronous>, transform_indices = @transform_2, window_bounds = array<i64: 1, 32>}, {pipeline_mode = #tpu.pipeline_mode<synchronous>, transform_indices = @transform_3, window_bounds = array<i64: 32, 32>}, {pipeline_mode = #tpu.pipeline_mode<synchronous>, transform_indices = @transform_4, window_bounds = array<i64: 1, 32>}, {transform_indices = @transform_5, window_bounds = array<i64: 16, 32>}, {pipeline_mode = #tpu.pipeline_mode<synchronous>, transform_indices = @transform_6, window_bounds = array<i64: 32, 32>}, {pipeline_mode = #tpu.pipeline_mode<synchronous>, transform_indices = @transform_7, window_bounds = array<i64: 1, 32>}, {transform_indices = @transform_8, window_bounds = array<i64: 16, 32>}, {pipeline_mode = #tpu.pipeline_mode<synchronous>, transform_indices = @transform_9, window_bounds = array<i64: 32, 32>}, {pipeline_mode = #tpu.pipeline_mode<synchronous>, transform_indices = @transform_10, window_bounds = array<i64: 1, 32>}, {transform_indices = @transform_11, window_bounds = array<i64: 16, 32>}, {transform_indices = @transform_12, window_bounds = array<i64: 16, 32>}, {transform_indices = @transform_13, window_bounds = array<i64: 16, 32>}]} {
    %c0 = arith.constant 0 : index
    %c0_0 = arith.constant 0 : index
    %0 = vector.load %arg1[%c0, %c0_0] : memref<16x32xf32, #tpu.memory_space<vmem>>, vector<16x32xf32>
    %cst = arith.constant dense<0.000000e+00> : vector<16xf32>
    %1 = vector.multi_reduction <add>, %0, %cst [1] : vector<16x32xf32> to vector<16xf32>
    %2 = vector.shape_cast %1 : vector<16xf32> to vector<16x1xf32>
    %cst_1 = arith.constant 3.200000e+01 : f32
    %3 = vector.broadcast %cst_1 : f32 to vector<16x1xf32>
    %4 = arith.divf %2, %3 : vector<16x1xf32>
    %5 = vector.broadcast %4 : vector<16x1xf32> to vector<16x32xf32>
    %6 = arith.subf %0, %5 : vector<16x32xf32>
    %7 = arith.mulf %6, %6 : vector<16x32xf32>
    %cst_2 = arith.constant dense<0.000000e+00> : vector<16xf32>
    %8 = vector.multi_reduction <add>, %7, %cst_2 [1] : vector<16x32xf32> to vector<16xf32>
    %9 = vector.shape_cast %8 : vector<16xf32> to vector<16x1xf32>
    %cst_3 = arith.constant 3.200000e+01 : f32
    %10 = vector.broadcast %cst_3 : f32 to vector<16x1xf32>
    %11 = arith.divf %9, %10 : vector<16x1xf32>
    %12 = vector.broadcast %4 : vector<16x1xf32> to vector<16x32xf32>
    %13 = arith.subf %0, %12 : vector<16x32xf32>
    %cst_4 = arith.constant 9.99999974E-6 : f32
    %14 = vector.broadcast %cst_4 : f32 to vector<16x1xf32>
    %15 = arith.addf %11, %14 : vector<16x1xf32>
    %16 = math.rsqrt %15 : vector<16x1xf32>
    %17 = vector.broadcast %16 : vector<16x1xf32> to vector<16x32xf32>
    %18 = arith.mulf %13, %17 : vector<16x32xf32>
    %c0_5 = arith.constant 0 : index
    %c0_6 = arith.constant 0 : index
    %19 = vector.load %arg2[%c0_5, %c0_6] : memref<1x32xf32, #tpu.memory_space<vmem>>, vector<1x32xf32>
    %20 = vector.broadcast %19 : vector<1x32xf32> to vector<16x32xf32>
    %21 = arith.mulf %18, %20 : vector<16x32xf32>
    %c0_7 = arith.constant 0 : index
    %c0_8 = arith.constant 0 : index
    %22 = vector.load %arg3[%c0_7, %c0_8] : memref<1x32xf32, #tpu.memory_space<vmem>>, vector<1x32xf32>
    %23 = vector.broadcast %22 : vector<1x32xf32> to vector<16x32xf32>
    %24 = arith.addf %21, %23 : vector<16x32xf32>
    %25 = arith.truncf %24 : vector<16x32xf32> to vector<16x32xbf16>
    %c0_9 = arith.constant 0 : index
    %c0_10 = arith.constant 0 : index
    %26 = vector.load %arg4[%c0_9, %c0_10] : memref<32x32xbf16, #tpu.memory_space<vmem>>, vector<32x32xbf16>
    %cst_11 = arith.constant dense<0.000000e+00> : vector<16x32xf32>
    %27 = tpu.matmul %25, %26, %cst_11 {dimension_numbers = #tpu.dot_dimension_numbers<[1], [0], [0], [1], [0, 0, 1, 1], [], []>} : vector<16x32xbf16>, vector<32x32xbf16>, vector<16x32xf32> -> vector<16x32xf32>
    %c0_12 = arith.constant 0 : index
    %c0_13 = arith.constant 0 : index
    %28 = vector.load %arg5[%c0_12, %c0_13] : memref<1x32xf32, #tpu.memory_space<vmem>>, vector<1x32xf32>
    %29 = vector.broadcast %28 : vector<1x32xf32> to vector<16x32xf32>
    %30 = arith.addf %27, %29 : vector<16x32xf32>
    %c0_14 = arith.constant 0 : index
    %c0_15 = arith.constant 0 : index
    %31 = vector.load %arg6[%c0_14, %c0_15] : memref<16x32xbf16, #tpu.memory_space<vmem>>, vector<16x32xbf16>
    %32 = arith.extf %31 : vector<16x32xbf16> to vector<16x32xf32>
    %33 = arith.addf %30, %32 : vector<16x32xf32>
    %34 = arith.truncf %33 : vector<16x32xf32> to vector<16x32xbf16>
    %c0_16 = arith.constant 0 : index
    %c0_17 = arith.constant 0 : index
    %35 = vector.load %arg12[%c0_16, %c0_17] : memref<16x32xbf16, #tpu.memory_space<vmem>>, vector<16x32xbf16>
    tpu.vector_store %arg12[%c0_16, %c0_17], %34 {strides = array<i32>} : memref<16x32xbf16, #tpu.memory_space<vmem>>, vector<16x32xbf16>,
    %c0_18 = arith.constant 0 : index
    %c0_19 = arith.constant 0 : index
    %36 = vector.load %arg7[%c0_18, %c0_19] : memref<32x32xbf16, #tpu.memory_space<vmem>>, vector<32x32xbf16>
    %cst_20 = arith.constant dense<0.000000e+00> : vector<16x32xf32>
    %37 = tpu.matmul %25, %36, %cst_20 {dimension_numbers = #tpu.dot_dimension_numbers<[1], [0], [0], [1], [0, 0, 1, 1], [], []>} : vector<16x32xbf16>, vector<32x32xbf16>, vector<16x32xf32> -> vector<16x32xf32>
    %c0_21 = arith.constant 0 : index
    %c0_22 = arith.constant 0 : index
    %38 = vector.load %arg8[%c0_21, %c0_22] : memref<1x32xf32, #tpu.memory_space<vmem>>, vector<1x32xf32>
    %39 = vector.broadcast %38 : vector<1x32xf32> to vector<16x32xf32>
    %40 = arith.addf %37, %39 : vector<16x32xf32>
    %c0_23 = arith.constant 0 : index
    %c0_24 = arith.constant 0 : index
    %41 = vector.load %arg9[%c0_23, %c0_24] : memref<16x32xbf16, #tpu.memory_space<vmem>>, vector<16x32xbf16>
    %42 = arith.extf %41 : vector<16x32xbf16> to vector<16x32xf32>
    %43 = arith.addf %40, %42 : vector<16x32xf32>
    %44 = arith.truncf %43 : vector<16x32xf32> to vector<16x32xbf16>
    %c0_25 = arith.constant 0 : index
    %c0_26 = arith.constant 0 : index
    %45 = vector.load %arg13[%c0_25, %c0_26] : memref<16x32xbf16, #tpu.memory_space<vmem>>, vector<16x32xbf16>
    tpu.vector_store %arg13[%c0_25, %c0_26], %44 {strides = array<i32>} : memref<16x32xbf16, #tpu.memory_space<vmem>>, vector<16x32xbf16>,
    %c0_27 = arith.constant 0 : index
    %c0_28 = arith.constant 0 : index
    %46 = vector.load %arg10[%c0_27, %c0_28] : memref<32x32xbf16, #tpu.memory_space<vmem>>, vector<32x32xbf16>
    %cst_29 = arith.constant dense<0.000000e+00> : vector<16x32xf32>
    %47 = tpu.matmul %25, %46, %cst_29 {dimension_numbers = #tpu.dot_dimension_numbers<[1], [0], [0], [1], [0, 0, 1, 1], [], []>} : vector<16x32xbf16>, vector<32x32xbf16>, vector<16x32xf32> -> vector<16x32xf32>
    %c0_30 = arith.constant 0 : index
    %c0_31 = arith.constant 0 : index
    %48 = vector.load %arg11[%c0_30, %c0_31] : memref<1x32xf32, #tpu.memory_space<vmem>>, vector<1x32xf32>
    %49 = vector.broadcast %48 : vector<1x32xf32> to vector<16x32xf32>
    %50 = arith.addf %47, %49 : vector<16x32xf32>
    %51 = arith.truncf %50 : vector<16x32xf32> to vector<16x32xbf16>
    %c0_32 = arith.constant 0 : index
    %c0_33 = arith.constant 0 : index
    %52 = vector.load %arg14[%c0_32, %c0_33] : memref<16x32xbf16, #tpu.memory_space<vmem>>, vector<16x32xbf16>
    tpu.vector_store %arg14[%c0_32, %c0_33], %51 {strides = array<i32>} : memref<16x32xbf16, #tpu.memory_space<vmem>>, vector<16x32xbf16>,
    return
  }
  func.func @transform_0(%arg0: i32) -> (i32, i32) {
    %c0_i32 = arith.constant 0 : i32
    %c0_i32_0 = arith.constant 0 : i32
    return %arg0, %c0_i32 : i32, i32
  }
  func.func @transform_1(%arg0: i32) -> (i32, i32) {
    %c0_i32 = arith.constant 0 : i32
    %c0_i32_0 = arith.constant 0 : i32
    %c0_i32_1 = arith.constant 0 : i32
    return %c0_i32, %c0_i32_0 : i32, i32
  }
  func.func @transform_2(%arg0: i32) -> (i32, i32) {
    %c0_i32 = arith.constant 0 : i32
    %c0_i32_0 = arith.constant 0 : i32
    %c0_i32_1 = arith.constant 0 : i32
    return %c0_i32, %c0_i32_0 : i32, i32
  }
  func.func @transform_3(%arg0: i32) -> (i32, i32) {
    %c0_i32 = arith.constant 0 : i32
    %c0_i32_0 = arith.constant 0 : i32
    %c0_i32_1 = arith.constant 0 : i32
    return %c0_i32, %c0_i32_0 : i32, i32
  }
  func.func @transform_4(%arg0: i32) -> (i32, i32) {
    %c0_i32 = arith.constant 0 : i32
    %c0_i32_0 = arith.constant 0 : i32
    %c0_i32_1 = arith.constant 0 : i32
    return %c0_i32, %c0_i32_0 : i32, i32
  }
  func.func @transform_5(%arg0: i32) -> (i32, i32) {
    %c0_i32 = arith.constant 0 : i32
    %c0_i32_0 = arith.constant 0 : i32
    return %arg0, %c0_i32 : i32, i32
  }
  func.func @transform_6(%arg0: i32) -> (i32, i32) {
    %c0_i32 = arith.constant 0 : i32
    %c0_i32_0 = arith.constant 0 : i32
    %c0_i32_1 = arith.constant 0 : i32
    return %c0_i32, %c0_i32_0 : i32, i32
  }
  func.func @transform_7(%arg0: i32) -> (i32, i32) {
    %c0_i32 = arith.constant 0 : i32
    %c0_i32_0 = arith.constant 0 : i32
    %c0_i32_1 = arith.constant 0 : i32
    return %c0_i32, %c0_i32_0 : i32, i32
  }
  func.func @transform_8(%arg0: i32) -> (i32, i32) {
    %c0_i32 = arith.constant 0 : i32
    %c0_i32_0 = arith.constant 0 : i32
    return %arg0, %c0_i32 : i32, i32
  }
  func.func @transform_9(%arg0: i32) -> (i32, i32) {
    %c0_i32 = arith.constant 0 : i32
    %c0_i32_0 = arith.constant 0 : i32
    %c0_i32_1 = arith.constant 0 : i32
    return %c0_i32, %c0_i32_0 : i32, i32
  }
  func.func @transform_10(%arg0: i32) -> (i32, i32) {
    %c0_i32 = arith.constant 0 : i32
    %c0_i32_0 = arith.constant 0 : i32
    %c0_i32_1 = arith.constant 0 : i32
    return %c0_i32, %c0_i32_0 : i32, i32
  }
  func.func @transform_11(%arg0: i32) -> (i32, i32) {
    %c0_i32 = arith.constant 0 : i32
    %c0_i32_0 = arith.constant 0 : i32
    return %arg0, %c0_i32 : i32, i32
  }
  func.func @transform_12(%arg0: i32) -> (i32, i32) {
    %c0_i32 = arith.constant 0 : i32
    %c0_i32_0 = arith.constant 0 : i32
    return %arg0, %c0_i32 : i32, i32
  }
  func.func @transform_13(%arg0: i32) -> (i32, i32) {
    %c0_i32 = arith.constant 0 : i32
    %c0_i32_0 = arith.constant 0 : i32
    return %arg0, %c0_i32 : i32, i32
  }
}

module attributes {stable_mosaic.version = 11 : i64} {
  func.func @_multiproj_kernel(%arg0: i32, %arg1: memref<16x32xbf16, #tpu.memory_space<vmem>>, %arg2: memref<32x32xbf16, #tpu.memory_space<vmem>>, %arg3: memref<1x32xf32, #tpu.memory_space<vmem>>, %arg4: memref<16x32xf32, #tpu.memory_space<vmem>>, %arg5: memref<16x32xf32, #tpu.memory_space<vmem>>) attributes {dimension_semantics = [#tpu.dimension_semantics<parallel>], iteration_bounds = array<i64: 1>, scalar_prefetch = 0 : i64, scratch_operands = 0 : i64, tpu.core_type = #tpu.core_type<tc>, window_params = [{transform_indices = @transform_0, window_bounds = array<i64: 16, 32>}, {pipeline_mode = #tpu.pipeline_mode<synchronous>, transform_indices = @transform_1, window_bounds = array<i64: 32, 32>}, {pipeline_mode = #tpu.pipeline_mode<synchronous>, transform_indices = @transform_2, window_bounds = array<i64: 1, 32>}, {transform_indices = @transform_3, window_bounds = array<i64: 16, 32>}, {transform_indices = @transform_4, window_bounds = array<i64: 16, 32>}]} {
    %c0 = arith.constant 0 : index
    %c0_0 = arith.constant 0 : index
    %0 = vector.load %arg1[%c0, %c0_0] : memref<16x32xbf16, #tpu.memory_space<vmem>>, vector<16x32xbf16>
    %c0_1 = arith.constant 0 : index
    %c0_2 = arith.constant 0 : index
    %1 = vector.load %arg2[%c0_1, %c0_2] : memref<32x32xbf16, #tpu.memory_space<vmem>>, vector<32x32xbf16>
    %cst = arith.constant dense<0.000000e+00> : vector<16x32xf32>
    %2 = tpu.matmul %0, %1, %cst {dimension_numbers = #tpu.dot_dimension_numbers<[1], [0], [0], [1], [0, 0, 1, 1], [], []>} : vector<16x32xbf16>, vector<32x32xbf16>, vector<16x32xf32> -> vector<16x32xf32>
    %c0_3 = arith.constant 0 : index
    %c0_4 = arith.constant 0 : index
    %3 = vector.load %arg3[%c0_3, %c0_4] : memref<1x32xf32, #tpu.memory_space<vmem>>, vector<1x32xf32>
    %4 = vector.broadcast %3 : vector<1x32xf32> to vector<16x32xf32>
    %5 = arith.addf %2, %4 : vector<16x32xf32>
    %c0_5 = arith.constant 0 : index
    %c0_6 = arith.constant 0 : index
    %6 = vector.load %arg4[%c0_5, %c0_6] : memref<16x32xf32, #tpu.memory_space<vmem>>, vector<16x32xf32>
    %7 = arith.addf %5, %6 : vector<16x32xf32>
    %c0_7 = arith.constant 0 : index
    %c0_8 = arith.constant 0 : index
    %8 = vector.load %arg5[%c0_7, %c0_8] : memref<16x32xf32, #tpu.memory_space<vmem>>, vector<16x32xf32>
    tpu.vector_store %arg5[%c0_7, %c0_8], %7 {strides = array<i32>} : memref<16x32xf32, #tpu.memory_space<vmem>>, vector<16x32xf32>,
    return
  }
  func.func @transform_0(%arg0: i32) -> (i32, i32) {
    %c0_i32 = arith.constant 0 : i32
    %c0_i32_0 = arith.constant 0 : i32
    return %arg0, %c0_i32 : i32, i32
  }
  func.func @transform_1(%arg0: i32) -> (i32, i32) {
    %c0_i32 = arith.constant 0 : i32
    %c0_i32_0 = arith.constant 0 : i32
    %c0_i32_1 = arith.constant 0 : i32
    return %c0_i32, %c0_i32_0 : i32, i32
  }
  func.func @transform_2(%arg0: i32) -> (i32, i32) {
    %c0_i32 = arith.constant 0 : i32
    %c0_i32_0 = arith.constant 0 : i32
    %c0_i32_1 = arith.constant 0 : i32
    return %c0_i32, %c0_i32_0 : i32, i32
  }
  func.func @transform_3(%arg0: i32) -> (i32, i32) {
    %c0_i32 = arith.constant 0 : i32
    %c0_i32_0 = arith.constant 0 : i32
    return %arg0, %c0_i32 : i32, i32
  }
  func.func @transform_4(%arg0: i32) -> (i32, i32) {
    %c0_i32 = arith.constant 0 : i32
    %c0_i32_0 = arith.constant 0 : i32
    return %arg0, %c0_i32 : i32, i32
  }
}

module attributes {stable_mosaic.version = 11 : i64} {
  func.func @_attn_weights_kernel(%arg0: i32, %arg1: i32, %arg2: memref<8x1x1x32xbf16, #tpu.memory_space<vmem>>, %arg3: memref<8x1x1x32xbf16, #tpu.memory_space<vmem>>, %arg4: memref<8x1x1x32xbf16, #tpu.memory_space<vmem>>, %arg5: memref<8x1x1x32xbf16, #tpu.memory_space<vmem>>, %arg6: memref<1x8x8xf32, #tpu.memory_space<vmem>>) attributes {dimension_semantics = [#tpu.dimension_semantics<parallel>, #tpu.dimension_semantics<parallel>], iteration_bounds = array<i64: 2, 1>, scalar_prefetch = 0 : i64, scratch_operands = 0 : i64, tpu.core_type = #tpu.core_type<tc>, window_params = [{transform_indices = @transform_0, window_bounds = array<i64: 8, 1, 1, 32>}, {transform_indices = @transform_1, window_bounds = array<i64: 8, 1, 1, 32>}, {transform_indices = @transform_2, window_bounds = array<i64: 8, 1, 1, 32>}, {transform_indices = @transform_3, window_bounds = array<i64: 8, 1, 1, 32>}, {transform_indices = @transform_4, window_bounds = array<i64: 1, 8, 8>}]} {
    %c0 = arith.constant 0 : index
    %c0_0 = arith.constant 0 : index
    %c0_1 = arith.constant 0 : index
    %c0_2 = arith.constant 0 : index
    %0 = vector.load %arg2[%c0, %c0_0, %c0_1, %c0_2] : memref<8x1x1x32xbf16, #tpu.memory_space<vmem>>, vector<8x1x1x32xbf16>
    %1 = vector.shape_cast %0 : vector<8x1x1x32xbf16> to vector<8x32xbf16>
    %c0_3 = arith.constant 0 : index
    %c0_4 = arith.constant 0 : index
    %c0_5 = arith.constant 0 : index
    %c0_6 = arith.constant 0 : index
    %2 = vector.load %arg3[%c0_3, %c0_4, %c0_5, %c0_6] : memref<8x1x1x32xbf16, #tpu.memory_space<vmem>>, vector<8x1x1x32xbf16>
    %3 = vector.shape_cast %2 : vector<8x1x1x32xbf16> to vector<8x32xbf16>
    %c0_7 = arith.constant 0 : index
    %c0_8 = arith.constant 0 : index
    %c0_9 = arith.constant 0 : index
    %c0_10 = arith.constant 0 : index
    %4 = vector.load %arg4[%c0_7, %c0_8, %c0_9, %c0_10] : memref<8x1x1x32xbf16, #tpu.memory_space<vmem>>, vector<8x1x1x32xbf16>
    %5 = vector.shape_cast %4 : vector<8x1x1x32xbf16> to vector<8x32xbf16>
    %6 = vector.extract_strided_slice %1 {offsets = [0, 0], sizes = [8, 8], strides = [1, 1]} : vector<8x32xbf16> to vector<8x8xbf16>
    %7 = vector.extract_strided_slice %3 {offsets = [0, 0], sizes = [8, 8], strides = [1, 1]} : vector<8x32xbf16> to vector<8x8xbf16>
    %cst = arith.constant dense<0.000000e+00> : vector<8x8xf32>
    %8 = tpu.matmul %6, %7, %cst {dimension_numbers = #tpu.dot_dimension_numbers<[1], [1], [0], [0], [0, 0, 1, 0], [], []>} : vector<8x8xbf16>, vector<8x8xbf16>, vector<8x8xf32> -> vector<8x8xf32>
    %cst_11 = arith.constant dense<0xFF800000> : vector<8xf32>
    %9 = vector.multi_reduction <maximumf>, %8, %cst_11 [1] : vector<8x8xf32> to vector<8xf32>
    %10 = vector.shape_cast %9 : vector<8xf32> to vector<8x1xf32>
    %11 = vector.broadcast %10 : vector<8x1xf32> to vector<8x8xf32>
    %12 = arith.subf %8, %11 : vector<8x8xf32>
    %13 = math.exp %12 : vector<8x8xf32>
    %cst_12 = arith.constant dense<0.000000e+00> : vector<8xf32>
    %14 = vector.multi_reduction <add>, %13, %cst_12 [1] : vector<8x8xf32> to vector<8xf32>
    %15 = vector.shape_cast %14 : vector<8xf32> to vector<8x1xf32>
    %cst_13 = arith.constant 1.000000e+00 : f32
    %16 = vector.broadcast %cst_13 : f32 to vector<8x1xf32>
    %17 = arith.divf %16, %15 : vector<8x1xf32>
    %18 = arith.truncf %13 : vector<8x8xf32> to vector<8x8xbf16>
    %19 = vector.extract_strided_slice %5 {offsets = [0, 0], sizes = [8, 8], strides = [1, 1]} : vector<8x32xbf16> to vector<8x8xbf16>
    %cst_14 = arith.constant dense<0.000000e+00> : vector<8x8xf32>
    %20 = tpu.matmul %18, %19, %cst_14 {dimension_numbers = #tpu.dot_dimension_numbers<[1], [0], [0], [1], [0, 0, 1, 1], [], []>} : vector<8x8xbf16>, vector<8x8xbf16>, vector<8x8xf32> -> vector<8x8xf32>
    %21 = vector.broadcast %17 : vector<8x1xf32> to vector<8x8xf32>
    %22 = arith.mulf %20, %21 : vector<8x8xf32>
    %23 = vector.broadcast %17 : vector<8x1xf32> to vector<8x8xf32>
    %24 = arith.mulf %13, %23 : vector<8x8xf32>
    %25 = vector.extract_strided_slice %1 {offsets = [0, 8], sizes = [8, 8], strides = [1, 1]} : vector<8x32xbf16> to vector<8x8xbf16>
    %26 = vector.extract_strided_slice %3 {offsets = [0, 8], sizes = [8, 8], strides = [1, 1]} : vector<8x32xbf16> to vector<8x8xbf16>
    %cst_15 = arith.constant dense<0.000000e+00> : vector<8x8xf32>
    %27 = tpu.matmul %25, %26, %cst_15 {dimension_numbers = #tpu.dot_dimension_numbers<[1], [1], [0], [0], [0, 0, 1, 0], [], []>} : vector<8x8xbf16>, vector<8x8xbf16>, vector<8x8xf32> -> vector<8x8xf32>
    %cst_16 = arith.constant dense<0xFF800000> : vector<8xf32>
    %28 = vector.multi_reduction <maximumf>, %27, %cst_16 [1] : vector<8x8xf32> to vector<8xf32>
    %29 = vector.shape_cast %28 : vector<8xf32> to vector<8x1xf32>
    %30 = vector.broadcast %29 : vector<8x1xf32> to vector<8x8xf32>
    %31 = arith.subf %27, %30 : vector<8x8xf32>
    %32 = math.exp %31 : vector<8x8xf32>
    %cst_17 = arith.constant dense<0.000000e+00> : vector<8xf32>
    %33 = vector.multi_reduction <add>, %32, %cst_17 [1] : vector<8x8xf32> to vector<8xf32>
    %34 = vector.shape_cast %33 : vector<8xf32> to vector<8x1xf32>
    %cst_18 = arith.constant 1.000000e+00 : f32
    %35 = vector.broadcast %cst_18 : f32 to vector<8x1xf32>
    %36 = arith.divf %35, %34 : vector<8x1xf32>
    %37 = arith.truncf %32 : vector<8x8xf32> to vector<8x8xbf16>
    %38 = vector.extract_strided_slice %5 {offsets = [0, 8], sizes = [8, 8], strides = [1, 1]} : vector<8x32xbf16> to vector<8x8xbf16>
    %cst_19 = arith.constant dense<0.000000e+00> : vector<8x8xf32>
    %39 = tpu.matmul %37, %38, %cst_19 {dimension_numbers = #tpu.dot_dimension_numbers<[1], [0], [0], [1], [0, 0, 1, 1], [], []>} : vector<8x8xbf16>, vector<8x8xbf16>, vector<8x8xf32> -> vector<8x8xf32>
    %40 = vector.broadcast %36 : vector<8x1xf32> to vector<8x8xf32>
    %41 = arith.mulf %39, %40 : vector<8x8xf32>
    %42 = vector.broadcast %36 : vector<8x1xf32> to vector<8x8xf32>
    %43 = arith.mulf %32, %42 : vector<8x8xf32>
    %44 = arith.addf %24, %43 : vector<8x8xf32>
    %45 = vector.extract_strided_slice %1 {offsets = [0, 16], sizes = [8, 8], strides = [1, 1]} : vector<8x32xbf16> to vector<8x8xbf16>
    %46 = vector.extract_strided_slice %3 {offsets = [0, 16], sizes = [8, 8], strides = [1, 1]} : vector<8x32xbf16> to vector<8x8xbf16>
    %cst_20 = arith.constant dense<0.000000e+00> : vector<8x8xf32>
    %47 = tpu.matmul %45, %46, %cst_20 {dimension_numbers = #tpu.dot_dimension_numbers<[1], [1], [0], [0], [0, 0, 1, 0], [], []>} : vector<8x8xbf16>, vector<8x8xbf16>, vector<8x8xf32> -> vector<8x8xf32>
    %cst_21 = arith.constant dense<0xFF800000> : vector<8xf32>
    %48 = vector.multi_reduction <maximumf>, %47, %cst_21 [1] : vector<8x8xf32> to vector<8xf32>
    %49 = vector.shape_cast %48 : vector<8xf32> to vector<8x1xf32>
    %50 = vector.broadcast %49 : vector<8x1xf32> to vector<8x8xf32>
    %51 = arith.subf %47, %50 : vector<8x8xf32>
    %52 = math.exp %51 : vector<8x8xf32>
    %cst_22 = arith.constant dense<0.000000e+00> : vector<8xf32>
    %53 = vector.multi_reduction <add>, %52, %cst_22 [1] : vector<8x8xf32> to vector<8xf32>
    %54 = vector.shape_cast %53 : vector<8xf32> to vector<8x1xf32>
    %cst_23 = arith.constant 1.000000e+00 : f32
    %55 = vector.broadcast %cst_23 : f32 to vector<8x1xf32>
    %56 = arith.divf %55, %54 : vector<8x1xf32>
    %57 = arith.truncf %52 : vector<8x8xf32> to vector<8x8xbf16>
    %58 = vector.extract_strided_slice %5 {offsets = [0, 16], sizes = [8, 8], strides = [1, 1]} : vector<8x32xbf16> to vector<8x8xbf16>
    %cst_24 = arith.constant dense<0.000000e+00> : vector<8x8xf32>
    %59 = tpu.matmul %57, %58, %cst_24 {dimension_numbers = #tpu.dot_dimension_numbers<[1], [0], [0], [1], [0, 0, 1, 1], [], []>} : vector<8x8xbf16>, vector<8x8xbf16>, vector<8x8xf32> -> vector<8x8xf32>
    %60 = vector.broadcast %56 : vector<8x1xf32> to vector<8x8xf32>
    %61 = arith.mulf %59, %60 : vector<8x8xf32>
    %62 = vector.broadcast %56 : vector<8x1xf32> to vector<8x8xf32>
    %63 = arith.mulf %52, %62 : vector<8x8xf32>
    %64 = arith.addf %44, %63 : vector<8x8xf32>
    %65 = vector.extract_strided_slice %1 {offsets = [0, 24], sizes = [8, 8], strides = [1, 1]} : vector<8x32xbf16> to vector<8x8xbf16>
    %66 = vector.extract_strided_slice %3 {offsets = [0, 24], sizes = [8, 8], strides = [1, 1]} : vector<8x32xbf16> to vector<8x8xbf16>
    %cst_25 = arith.constant dense<0.000000e+00> : vector<8x8xf32>
    %67 = tpu.matmul %65, %66, %cst_25 {dimension_numbers = #tpu.dot_dimension_numbers<[1], [1], [0], [0], [0, 0, 1, 0], [], []>} : vector<8x8xbf16>, vector<8x8xbf16>, vector<8x8xf32> -> vector<8x8xf32>
    %cst_26 = arith.constant dense<0xFF800000> : vector<8xf32>
    %68 = vector.multi_reduction <maximumf>, %67, %cst_26 [1] : vector<8x8xf32> to vector<8xf32>
    %69 = vector.shape_cast %68 : vector<8xf32> to vector<8x1xf32>
    %70 = vector.broadcast %69 : vector<8x1xf32> to vector<8x8xf32>
    %71 = arith.subf %67, %70 : vector<8x8xf32>
    %72 = math.exp %71 : vector<8x8xf32>
    %cst_27 = arith.constant dense<0.000000e+00> : vector<8xf32>
    %73 = vector.multi_reduction <add>, %72, %cst_27 [1] : vector<8x8xf32> to vector<8xf32>
    %74 = vector.shape_cast %73 : vector<8xf32> to vector<8x1xf32>
    %cst_28 = arith.constant 1.000000e+00 : f32
    %75 = vector.broadcast %cst_28 : f32 to vector<8x1xf32>
    %76 = arith.divf %75, %74 : vector<8x1xf32>
    %77 = arith.truncf %72 : vector<8x8xf32> to vector<8x8xbf16>
    %78 = vector.extract_strided_slice %5 {offsets = [0, 24], sizes = [8, 8], strides = [1, 1]} : vector<8x32xbf16> to vector<8x8xbf16>
    %cst_29 = arith.constant dense<0.000000e+00> : vector<8x8xf32>
    %79 = tpu.matmul %77, %78, %cst_29 {dimension_numbers = #tpu.dot_dimension_numbers<[1], [0], [0], [1], [0, 0, 1, 1], [], []>} : vector<8x8xbf16>, vector<8x8xbf16>, vector<8x8xf32> -> vector<8x8xf32>
    %80 = vector.broadcast %76 : vector<8x1xf32> to vector<8x8xf32>
    %81 = arith.mulf %79, %80 : vector<8x8xf32>
    %82 = vector.broadcast %76 : vector<8x1xf32> to vector<8x8xf32>
    %83 = arith.mulf %72, %82 : vector<8x8xf32>
    %84 = arith.addf %64, %83 : vector<8x8xf32>
    %85 = tpu.concatenate %22, %41, %61, %81 in 1 : vector<8x8xf32>, vector<8x8xf32>, vector<8x8xf32>, vector<8x8xf32> -> vector<8x32xf32>
    %86 = vector.shape_cast %85 : vector<8x32xf32> to vector<8x1x1x32xf32>
    %87 = arith.truncf %86 : vector<8x1x1x32xf32> to vector<8x1x1x32xbf16>
    %c0_30 = arith.constant 0 : index
    %c0_31 = arith.constant 0 : index
    %c0_32 = arith.constant 0 : index
    %c0_33 = arith.constant 0 : index
    %88 = vector.load %arg5[%c0_30, %c0_31, %c0_32, %c0_33] : memref<8x1x1x32xbf16, #tpu.memory_space<vmem>>, vector<8x1x1x32xbf16>
    tpu.vector_store %arg5[%c0_30, %c0_31, %c0_32, %c0_33], %87 {strides = array<i32>} : memref<8x1x1x32xbf16, #tpu.memory_space<vmem>>, vector<8x1x1x32xbf16>,
    %cst_34 = arith.constant 2.500000e-01 : f32
    %89 = vector.broadcast %cst_34 : f32 to vector<8x8xf32>
    %90 = arith.mulf %84, %89 : vector<8x8xf32>
    %91 = vector.shape_cast %90 : vector<8x8xf32> to vector<1x8x8xf32>
    %c0_35 = arith.constant 0 : index
    %c0_36 = arith.constant 0 : index
    %c0_37 = arith.constant 0 : index
    %92 = vector.load %arg6[%c0_35, %c0_36, %c0_37] : memref<1x8x8xf32, #tpu.memory_space<vmem>>, vector<1x8x8xf32>
    tpu.vector_store %arg6[%c0_35, %c0_36, %c0_37], %91 {strides = array<i32>} : memref<1x8x8xf32, #tpu.memory_space<vmem>>, vector<1x8x8xf32>,
    return
  }
  func.func @transform_0(%arg0: i32, %arg1: i32) -> (i32, i32, i32, i32) {
    %c0_i32 = arith.constant 0 : i32
    %c0_i32_0 = arith.constant 0 : i32
    %c0_i32_1 = arith.constant 0 : i32
    return %arg1, %arg0, %c0_i32, %c0_i32_0 : i32, i32, i32, i32
  }
  func.func @transform_1(%arg0: i32, %arg1: i32) -> (i32, i32, i32, i32) {
    %c0_i32 = arith.constant 0 : i32
    %c0_i32_0 = arith.constant 0 : i32
    %c0_i32_1 = arith.constant 0 : i32
    %c0_i32_2 = arith.constant 0 : i32
    return %c0_i32, %arg0, %c0_i32_0, %c0_i32_1 : i32, i32, i32, i32
  }
  func.func @transform_2(%arg0: i32, %arg1: i32) -> (i32, i32, i32, i32) {
    %c0_i32 = arith.constant 0 : i32
    %c0_i32_0 = arith.constant 0 : i32
    %c0_i32_1 = arith.constant 0 : i32
    %c0_i32_2 = arith.constant 0 : i32
    return %c0_i32, %arg0, %c0_i32_0, %c0_i32_1 : i32, i32, i32, i32
  }
  func.func @transform_3(%arg0: i32, %arg1: i32) -> (i32, i32, i32, i32) {
    %c0_i32 = arith.constant 0 : i32
    %c0_i32_0 = arith.constant 0 : i32
    %c0_i32_1 = arith.constant 0 : i32
    return %arg1, %arg0, %c0_i32, %c0_i32_0 : i32, i32, i32, i32
  }
  func.func @transform_4(%arg0: i32, %arg1: i32) -> (i32, i32, i32) {
    %c0_i32 = arith.constant 0 : i32
    %c0_i32_0 = arith.constant 0 : i32
    return %arg0, %arg1, %c0_i32 : i32, i32, i32
  }
}

module attributes {stable_mosaic.version = 11 : i64} {
  func.func @_multiproj_kernel(%arg0: i32, %arg1: memref<16x32xf32, #tpu.memory_space<vmem>>, %arg2: memref<1x32xf32, #tpu.memory_space<vmem>>, %arg3: memref<1x32xf32, #tpu.memory_space<vmem>>, %arg4: memref<32x32xbf16, #tpu.memory_space<vmem>>, %arg5: memref<1x32xf32, #tpu.memory_space<vmem>>, %arg6: memref<16x32xbf16, #tpu.memory_space<vmem>>, %arg7: memref<32x32xbf16, #tpu.memory_space<vmem>>, %arg8: memref<1x32xf32, #tpu.memory_space<vmem>>, %arg9: memref<16x32xbf16, #tpu.memory_space<vmem>>, %arg10: memref<16x32xbf16, #tpu.memory_space<vmem>>) attributes {dimension_semantics = [#tpu.dimension_semantics<parallel>], iteration_bounds = array<i64: 1>, scalar_prefetch = 0 : i64, scratch_operands = 0 : i64, tpu.core_type = #tpu.core_type<tc>, window_params = [{transform_indices = @transform_0, window_bounds = array<i64: 16, 32>}, {pipeline_mode = #tpu.pipeline_mode<synchronous>, transform_indices = @transform_1, window_bounds = array<i64: 1, 32>}, {pipeline_mode = #tpu.pipeline_mode<synchronous>, transform_indices = @transform_2, window_bounds = array<i64: 1, 32>}, {pipeline_mode = #tpu.pipeline_mode<synchronous>, transform_indices = @transform_3, window_bounds = array<i64: 32, 32>}, {pipeline_mode = #tpu.pipeline_mode<synchronous>, transform_indices = @transform_4, window_bounds = array<i64: 1, 32>}, {transform_indices = @transform_5, window_bounds = array<i64: 16, 32>}, {pipeline_mode = #tpu.pipeline_mode<synchronous>, transform_indices = @transform_6, window_bounds = array<i64: 32, 32>}, {pipeline_mode = #tpu.pipeline_mode<synchronous>, transform_indices = @transform_7, window_bounds = array<i64: 1, 32>}, {transform_indices = @transform_8, window_bounds = array<i64: 16, 32>}, {transform_indices = @transform_9, window_bounds = array<i64: 16, 32>}]} {
    %c0 = arith.constant 0 : index
    %c0_0 = arith.constant 0 : index
    %0 = vector.load %arg1[%c0, %c0_0] : memref<16x32xf32, #tpu.memory_space<vmem>>, vector<16x32xf32>
    %cst = arith.constant dense<0.000000e+00> : vector<16xf32>
    %1 = vector.multi_reduction <add>, %0, %cst [1] : vector<16x32xf32> to vector<16xf32>
    %2 = vector.shape_cast %1 : vector<16xf32> to vector<16x1xf32>
    %cst_1 = arith.constant 3.200000e+01 : f32
    %3 = vector.broadcast %cst_1 : f32 to vector<16x1xf32>
    %4 = arith.divf %2, %3 : vector<16x1xf32>
    %5 = vector.broadcast %4 : vector<16x1xf32> to vector<16x32xf32>
    %6 = arith.subf %0, %5 : vector<16x32xf32>
    %7 = arith.mulf %6, %6 : vector<16x32xf32>
    %cst_2 = arith.constant dense<0.000000e+00> : vector<16xf32>
    %8 = vector.multi_reduction <add>, %7, %cst_2 [1] : vector<16x32xf32> to vector<16xf32>
    %9 = vector.shape_cast %8 : vector<16xf32> to vector<16x1xf32>
    %cst_3 = arith.constant 3.200000e+01 : f32
    %10 = vector.broadcast %cst_3 : f32 to vector<16x1xf32>
    %11 = arith.divf %9, %10 : vector<16x1xf32>
    %12 = vector.broadcast %4 : vector<16x1xf32> to vector<16x32xf32>
    %13 = arith.subf %0, %12 : vector<16x32xf32>
    %cst_4 = arith.constant 9.99999974E-6 : f32
    %14 = vector.broadcast %cst_4 : f32 to vector<16x1xf32>
    %15 = arith.addf %11, %14 : vector<16x1xf32>
    %16 = math.rsqrt %15 : vector<16x1xf32>
    %17 = vector.broadcast %16 : vector<16x1xf32> to vector<16x32xf32>
    %18 = arith.mulf %13, %17 : vector<16x32xf32>
    %c0_5 = arith.constant 0 : index
    %c0_6 = arith.constant 0 : index
    %19 = vector.load %arg2[%c0_5, %c0_6] : memref<1x32xf32, #tpu.memory_space<vmem>>, vector<1x32xf32>
    %20 = vector.broadcast %19 : vector<1x32xf32> to vector<16x32xf32>
    %21 = arith.mulf %18, %20 : vector<16x32xf32>
    %c0_7 = arith.constant 0 : index
    %c0_8 = arith.constant 0 : index
    %22 = vector.load %arg3[%c0_7, %c0_8] : memref<1x32xf32, #tpu.memory_space<vmem>>, vector<1x32xf32>
    %23 = vector.broadcast %22 : vector<1x32xf32> to vector<16x32xf32>
    %24 = arith.addf %21, %23 : vector<16x32xf32>
    %25 = arith.truncf %24 : vector<16x32xf32> to vector<16x32xbf16>
    %c0_9 = arith.constant 0 : index
    %c0_10 = arith.constant 0 : index
    %26 = vector.load %arg4[%c0_9, %c0_10] : memref<32x32xbf16, #tpu.memory_space<vmem>>, vector<32x32xbf16>
    %cst_11 = arith.constant dense<0.000000e+00> : vector<16x32xf32>
    %27 = tpu.matmul %25, %26, %cst_11 {dimension_numbers = #tpu.dot_dimension_numbers<[1], [0], [0], [1], [0, 0, 1, 1], [], []>} : vector<16x32xbf16>, vector<32x32xbf16>, vector<16x32xf32> -> vector<16x32xf32>
    %c0_12 = arith.constant 0 : index
    %c0_13 = arith.constant 0 : index
    %28 = vector.load %arg5[%c0_12, %c0_13] : memref<1x32xf32, #tpu.memory_space<vmem>>, vector<1x32xf32>
    %29 = vector.broadcast %28 : vector<1x32xf32> to vector<16x32xf32>
    %30 = arith.addf %27, %29 : vector<16x32xf32>
    %c0_14 = arith.constant 0 : index
    %c0_15 = arith.constant 0 : index
    %31 = vector.load %arg6[%c0_14, %c0_15] : memref<16x32xbf16, #tpu.memory_space<vmem>>, vector<16x32xbf16>
    %32 = arith.extf %31 : vector<16x32xbf16> to vector<16x32xf32>
    %33 = arith.addf %30, %32 : vector<16x32xf32>
    %34 = arith.truncf %33 : vector<16x32xf32> to vector<16x32xbf16>
    %c0_16 = arith.constant 0 : index
    %c0_17 = arith.constant 0 : index
    %35 = vector.load %arg9[%c0_16, %c0_17] : memref<16x32xbf16, #tpu.memory_space<vmem>>, vector<16x32xbf16>
    tpu.vector_store %arg9[%c0_16, %c0_17], %34 {strides = array<i32>} : memref<16x32xbf16, #tpu.memory_space<vmem>>, vector<16x32xbf16>,
    %c0_18 = arith.constant 0 : index
    %c0_19 = arith.constant 0 : index
    %36 = vector.load %arg7[%c0_18, %c0_19] : memref<32x32xbf16, #tpu.memory_space<vmem>>, vector<32x32xbf16>
    %cst_20 = arith.constant dense<0.000000e+00> : vector<16x32xf32>
    %37 = tpu.matmul %25, %36, %cst_20 {dimension_numbers = #tpu.dot_dimension_numbers<[1], [0], [0], [1], [0, 0, 1, 1], [], []>} : vector<16x32xbf16>, vector<32x32xbf16>, vector<16x32xf32> -> vector<16x32xf32>
    %c0_21 = arith.constant 0 : index
    %c0_22 = arith.constant 0 : index
    %38 = vector.load %arg8[%c0_21, %c0_22] : memref<1x32xf32, #tpu.memory_space<vmem>>, vector<1x32xf32>
    %39 = vector.broadcast %38 : vector<1x32xf32> to vector<16x32xf32>
    %40 = arith.addf %37, %39 : vector<16x32xf32>
    %41 = arith.truncf %40 : vector<16x32xf32> to vector<16x32xbf16>
    %c0_23 = arith.constant 0 : index
    %c0_24 = arith.constant 0 : index
    %42 = vector.load %arg10[%c0_23, %c0_24] : memref<16x32xbf16, #tpu.memory_space<vmem>>, vector<16x32xbf16>
    tpu.vector_store %arg10[%c0_23, %c0_24], %41 {strides = array<i32>} : memref<16x32xbf16, #tpu.memory_space<vmem>>, vector<16x32xbf16>,
    return
  }
  func.func @transform_0(%arg0: i32) -> (i32, i32) {
    %c0_i32 = arith.constant 0 : i32
    %c0_i32_0 = arith.constant 0 : i32
    return %arg0, %c0_i32 : i32, i32
  }
  func.func @transform_1(%arg0: i32) -> (i32, i32) {
    %c0_i32 = arith.constant 0 : i32
    %c0_i32_0 = arith.constant 0 : i32
    %c0_i32_1 = arith.constant 0 : i32
    return %c0_i32, %c0_i32_0 : i32, i32
  }
  func.func @transform_2(%arg0: i32) -> (i32, i32) {
    %c0_i32 = arith.constant 0 : i32
    %c0_i32_0 = arith.constant 0 : i32
    %c0_i32_1 = arith.constant 0 : i32
    return %c0_i32, %c0_i32_0 : i32, i32
  }
  func.func @transform_3(%arg0: i32) -> (i32, i32) {
    %c0_i32 = arith.constant 0 : i32
    %c0_i32_0 = arith.constant 0 : i32
    %c0_i32_1 = arith.constant 0 : i32
    return %c0_i32, %c0_i32_0 : i32, i32
  }
  func.func @transform_4(%arg0: i32) -> (i32, i32) {
    %c0_i32 = arith.constant 0 : i32
    %c0_i32_0 = arith.constant 0 : i32
    %c0_i32_1 = arith.constant 0 : i32
    return %c0_i32, %c0_i32_0 : i32, i32
  }
  func.func @transform_5(%arg0: i32) -> (i32, i32) {
    %c0_i32 = arith.constant 0 : i32
    %c0_i32_0 = arith.constant 0 : i32
    return %arg0, %c0_i32 : i32, i32
  }
  func.func @transform_6(%arg0: i32) -> (i32, i32) {
    %c0_i32 = arith.constant 0 : i32
    %c0_i32_0 = arith.constant 0 : i32
    %c0_i32_1 = arith.constant 0 : i32
    return %c0_i32, %c0_i32_0 : i32, i32
  }
  func.func @transform_7(%arg0: i32) -> (i32, i32) {
    %c0_i32 = arith.constant 0 : i32
    %c0_i32_0 = arith.constant 0 : i32
    %c0_i32_1 = arith.constant 0 : i32
    return %c0_i32, %c0_i32_0 : i32, i32
  }
  func.func @transform_8(%arg0: i32) -> (i32, i32) {
    %c0_i32 = arith.constant 0 : i32
    %c0_i32_0 = arith.constant 0 : i32
    return %arg0, %c0_i32 : i32, i32
  }
  func.func @transform_9(%arg0: i32) -> (i32, i32) {
    %c0_i32 = arith.constant 0 : i32
    %c0_i32_0 = arith.constant 0 : i32
    return %arg0, %c0_i32 : i32, i32
  }
}

module attributes {stable_mosaic.version = 11 : i64} {
  func.func @_multiproj_kernel(%arg0: i32, %arg1: memref<16x32xbf16, #tpu.memory_space<vmem>>, %arg2: memref<32x32xbf16, #tpu.memory_space<vmem>>, %arg3: memref<1x32xf32, #tpu.memory_space<vmem>>, %arg4: memref<16x32xf32, #tpu.memory_space<vmem>>, %arg5: memref<16x32xf32, #tpu.memory_space<vmem>>) attributes {dimension_semantics = [#tpu.dimension_semantics<parallel>], iteration_bounds = array<i64: 1>, scalar_prefetch = 0 : i64, scratch_operands = 0 : i64, tpu.core_type = #tpu.core_type<tc>, window_params = [{transform_indices = @transform_0, window_bounds = array<i64: 16, 32>}, {pipeline_mode = #tpu.pipeline_mode<synchronous>, transform_indices = @transform_1, window_bounds = array<i64: 32, 32>}, {pipeline_mode = #tpu.pipeline_mode<synchronous>, transform_indices = @transform_2, window_bounds = array<i64: 1, 32>}, {transform_indices = @transform_3, window_bounds = array<i64: 16, 32>}, {transform_indices = @transform_4, window_bounds = array<i64: 16, 32>}]} {
    %c0 = arith.constant 0 : index
    %c0_0 = arith.constant 0 : index
    %0 = vector.load %arg1[%c0, %c0_0] : memref<16x32xbf16, #tpu.memory_space<vmem>>, vector<16x32xbf16>
    %c0_1 = arith.constant 0 : index
    %c0_2 = arith.constant 0 : index
    %1 = vector.load %arg2[%c0_1, %c0_2] : memref<32x32xbf16, #tpu.memory_space<vmem>>, vector<32x32xbf16>
    %cst = arith.constant dense<0.000000e+00> : vector<16x32xf32>
    %2 = tpu.matmul %0, %1, %cst {dimension_numbers = #tpu.dot_dimension_numbers<[1], [0], [0], [1], [0, 0, 1, 1], [], []>} : vector<16x32xbf16>, vector<32x32xbf16>, vector<16x32xf32> -> vector<16x32xf32>
    %c0_3 = arith.constant 0 : index
    %c0_4 = arith.constant 0 : index
    %3 = vector.load %arg3[%c0_3, %c0_4] : memref<1x32xf32, #tpu.memory_space<vmem>>, vector<1x32xf32>
    %4 = vector.broadcast %3 : vector<1x32xf32> to vector<16x32xf32>
    %5 = arith.addf %2, %4 : vector<16x32xf32>
    %c0_5 = arith.constant 0 : index
    %c0_6 = arith.constant 0 : index
    %6 = vector.load %arg4[%c0_5, %c0_6] : memref<16x32xf32, #tpu.memory_space<vmem>>, vector<16x32xf32>
    %7 = arith.addf %5, %6 : vector<16x32xf32>
    %c0_7 = arith.constant 0 : index
    %c0_8 = arith.constant 0 : index
    %8 = vector.load %arg5[%c0_7, %c0_8] : memref<16x32xf32, #tpu.memory_space<vmem>>, vector<16x32xf32>
    tpu.vector_store %arg5[%c0_7, %c0_8], %7 {strides = array<i32>} : memref<16x32xf32, #tpu.memory_space<vmem>>, vector<16x32xf32>,
    return
  }
  func.func @transform_0(%arg0: i32) -> (i32, i32) {
    %c0_i32 = arith.constant 0 : i32
    %c0_i32_0 = arith.constant 0 : i32
    return %arg0, %c0_i32 : i32, i32
  }
  func.func @transform_1(%arg0: i32) -> (i32, i32) {
    %c0_i32 = arith.constant 0 : i32
    %c0_i32_0 = arith.constant 0 : i32
    %c0_i32_1 = arith.constant 0 : i32
    return %c0_i32, %c0_i32_0 : i32, i32
  }
  func.func @transform_2(%arg0: i32) -> (i32, i32) {
    %c0_i32 = arith.constant 0 : i32
    %c0_i32_0 = arith.constant 0 : i32
    %c0_i32_1 = arith.constant 0 : i32
    return %c0_i32, %c0_i32_0 : i32, i32
  }
  func.func @transform_3(%arg0: i32) -> (i32, i32) {
    %c0_i32 = arith.constant 0 : i32
    %c0_i32_0 = arith.constant 0 : i32
    return %arg0, %c0_i32 : i32, i32
  }
  func.func @transform_4(%arg0: i32) -> (i32, i32) {
    %c0_i32 = arith.constant 0 : i32
    %c0_i32_0 = arith.constant 0 : i32
    return %arg0, %c0_i32 : i32, i32
  }
}

</mosaic_0001>

<bundles_post_ra>
// kernel: transformer_cross_attn_layer.10
= control target key start
LH: loop header
LB: loop body
LE: loop exit
PB: predicated region body
PF: predicated region fallthrough
CT: control target
= control target key end

     0   :  { %vm26_vm0 = vcmask 261120   ;;  %v194_v14 = vmov 0.0   ;;  %vm195_vm1 = vmmov 0   ;;  %vm154_vm2 = vcmask 257024   ;;  %s266_s0 = inlined_call_operand.vmem [shape: f32[16,32], index: 0, kind: input, shape index: {}]   ;;  %s267_s3 = inlined_call_operand.vmem [shape: bf16[32,32], index: 3, kind: input, shape index: {}]   ;;  %s268_s1 = inlined_call_operand.vmem [shape: f32[1,32], index: 1, kind: input, shape index: {}]   ;;  %s269_s2 = inlined_call_operand.vmem [shape: f32[1,32], index: 2, kind: input, shape index: {}, may-alias: {2,4}]   ;;  %s270_s5 = inlined_call_operand.vmem [shape: bf16[16,32], index: 5, kind: input, shape index: {}]   ;;  %s271_s4 = inlined_call_operand.vmem [shape: f32[1,32], index: 4, kind: input, shape index: {}, may-alias: {2,4}]   ;;  %s272_s6 = inlined_call_operand.vmem [shape: bf16[16,32], index: 6, kind: output, shape index: {}]  }
   0x1   :  { %v24_v0 = vld [vmem:[%s266_s0] sm:$0xff]  ;;  %v25_v1 = vld [vmem:[%s266_s0 + $0x8] sm:$0xff]  ;;  %178 = vmatprep.subr.bf16.mxu0 %v194_v14  ;;  %182 = vmatprep.mubr.msk.bf16.mxu0 %vm195_vm1, %v194_v14 }
   0x2   :  { %v27_v2 = vsel %vm26_vm0, %v24_v0, 0.0  ;;  %v30_v3 = vsel %vm26_vm0, %v25_v1, 0.0  ;;  %v188_v15 = vld [vmem:[%s267_s3 + $0x8] sm:$0xff]   ;;  %v189_v16 = vld [vmem:[%s267_s3] sm:$0xff]  }
   0x3   :  { %28 = vadd.xlane.f32.xlu0 %v27_v2  ;;  %179 = vmatpush3.bf16.msra.mxu0 %v188_v15  ;;  %v161_v25 = vld [vmem:[%s268_s1] ss:$0 sm:$0xff] }
   0x4   :  { %180 = vmatprep.subr.bf16.mxu0 %v194_v14  ;;  %v162_v29 = vld [vmem:[%s269_s2] ss:$0 sm:$0xff] }
   0x5   :  { %v172_v34 = vld [vmem:[%s270_s5] sm:$0xff]  }
   0x6   :  { %v163_v35 = vld [vmem:[%s271_s4] ss:$0 sm:$0xff]  ;;  %v173_v36 = vunpack.c.l.bf16 %v172_v34  ;;  %v174_v41 = vunpack.c.h.bf16 %v172_v34 }
   0x7   :  { %31 = vadd.xlane.f32.xlu0 %v30_v3  ;;  %181 = vmatpush3.bf16.msra.mxu0 %v189_v16 }
  0x8c   :  { %v29_v4 = vpop.xlane.xlu0 %28 }
  0x8d   :  { %v34_v5 = vmul.f32 0.03125, %v29_v4 }
  0x8f   :  { %v36_v6 = vsub.f32 %v24_v0, %v34_v5 }
  0x90   :  { %v32_v7 = vpop.xlane.xlu0 %31 }
  0x91   :  { %v35_v8 = vmul.f32 0.03125, %v32_v7  ;;  %v38_v9 = vmul.f32 %v36_v6, %v36_v6 }
  0x93   :  { %v37_v10 = vsub.f32 %v25_v1, %v35_v8  ;;  %v40_v11 = vsel %vm26_vm0, %v38_v9, 0.0 }
  0x94   :  { %41 = vadd.xlane.f32.xlu1 %v40_v11 }
  0x95   :  { %v39_v12 = vmul.f32 %v37_v10, %v37_v10 }
  0x97   :  { %v43_v13 = vsel %vm26_vm0, %v39_v12, 0.0 }
  0x98   :  { %44 = vadd.xlane.f32.xlu1 %v43_v13 }
 0x11d   :  { %v42_v17 = vpop.xlane.xlu1 %41 }
 0x11e   :  { %v46_v18 = vmul.f32 0.03125, %v42_v17 }
 0x120   :  { %v48_v19 = vadd.f32 1e-05, %v46_v18 }
 0x121   :  { %v45_v20 = vpop.xlane.xlu1 %44 }
 0x122   :  { %190 = vrsqrt.f32 %v48_v19  ;;  %v47_v21 = vmul.f32 0.03125, %v45_v20 }
 0x124   :  { %v49_v22 = vadd.f32 1e-05, %v47_v21 }
 0x126   :  { %192 = vrsqrt.f32 %v49_v22 }
 0x12f   :  { %v191_v23 = vpop.eup %190 }
 0x130   :  { %v52_v24 = vmul.f32 %v191_v23, %v36_v6 }
 0x132   :  { %v61_v28 = vmul.f32 %v161_v25, %v52_v24 }
 0x133   :  { %v193_v26 = vpop.eup %192 }
 0x134   :  { %v53_v27 = vmul.f32 %v193_v26, %v37_v10  ;;  %v70_v31 = vadd.f32 %v162_v29, %v61_v28 }
 0x136   :  { %v62_v30 = vmul.f32 %v161_v25, %v53_v27 }
 0x138   :  { %v71_v32 = vadd.f32 %v162_v29, %v62_v30 }
 0x13a   :  { %v72_v33 = vpack.c.bf16 %v71_v32, %v70_v31 }
 0x13c   :  { %183 = vmatmul.mubr.msk.bf16.vlgmr.msra.gmra.mxu0 %vm26_vm0, %v72_v33 }
 0x1fc   :  { %v133_v37 = vpop.f32.mrf.mxu0 }
 0x1fd   :  { %v134_v38 = vadd.f32 %v163_v35, %v133_v37 }
 0x1fe   :  { %v184_v39 = vpop.f32.mrf.mxu0 }
 0x1ff   :  { %v144_v40 = vadd.f32 %v173_v36, %v134_v38 }
 0x200   :  { %v136_v42 = vpop.f32.mrf.mxu0 }
 0x201   :  { %v169_v43 = vpack.c.bf16 %v144_v40, %v144_v40  ;;  %v137_v44 = vadd.f32 %v163_v35, %v136_v42 }
 0x202   :  { %v185_v45 = vpop.f32.mrf.mxu0 }
 0x203   :  { %155 = vst.msk [vmem:[%s272_s6] sm:$0xf] %vm154_vm2, %v169_v43  ;;  %v145_v46 = vadd.f32 %v174_v41, %v137_v44 }
 0x205   :  { %v170_v47 = vpack.c.bf16 %v145_v46, %v145_v46 }
 0x207   :  { %156 = vst.msk [vmem:[%s272_s6 + $0x4] sm:$0xf] %vm154_vm2, %v170_v47 }

// kernel: transformer_cross_attn_layer.8
= control target key start
LH: loop header
LB: loop body
LE: loop exit
PB: predicated region body
PF: predicated region fallthrough
CT: control target
= control target key end

     0   :  { %12 = vsyncpa [#allocation3], 0  ;;  %s388_s0 = inlined_call_operand.hbm [shape: f32[16,32], index: 0, kind: input, shape index: {}]   ;;  %s389_s1 = inlined_call_operand.vmem [shape: bf16[32,32], index: 1, kind: input, shape index: {}]   ;;  %s390_s2 = inlined_call_operand.vmem [shape: f32[1,32], index: 2, kind: input, shape index: {}, may-alias: {2,4}]   ;;  %s391_s3 = inlined_call_operand.hbm [shape: bf16[32,32], index: 3, kind: input, shape index: {}]   ;;  %s392_s4 = inlined_call_operand.vmem [shape: f32[1,32], index: 4, kind: input, shape index: {}, may-alias: {2,4}]   ;;  %s393_s5 = inlined_call_operand.vmem [shape: bf16[16,32], index: 5, kind: output, shape index: {0}]   ;;  %s394_s6 = inlined_call_operand.vmem [shape: bf16[16,32], index: 6, kind: output, shape index: {1}]  }
   0x1   :  { %13 = vsyncpa [#allocation5], 0  ;;  %s311_s21 = smov [#allocation2]  }
   0x2   :  { %s19_s22 = sshll.u32 %s311_s21, 4  ;;  %s20_s22 = int_to_ptr.vmem [resolvable:$true] %s19_s22 }
   0x3   :  { %s275_s23 = scalar_lea.vmem %s20_s22, 256  ;;  %p280_p1 = scmp.lt.s32.totalorder %s20_s22, %s20_s22 }
   0x4   :  { %p276_p0 = scmp.ne.s32.totalorder %s20_s22, %s275_s23  ;;  %p281_p2 = scmp.lt.s32.totalorder %s275_s23, %s275_s23 }
   0x6   :  { %p282_p3 = por %p281_p2, %p280_p1 }
   0x8   :  { %p283_p4 = pnand %p282_p3, %p276_p0 }
   0xa   :  { %286 = shalt.err (!%p283_p4)
}
   0xb   :  { %s312_s24 = smov 128   ;;  %s313_s25 = smov 8  }
   0xc   :  { %25 = dma.hbm_to_vmem [thread:$0]  %s388_s0, 256, %s20_s22, [#allocation3], %s312_s24, %s312_s24, %s313_s25  }
   0xd   :  { %s314_s28 = smov [#allocation4]  }
   0xe   :  { %s35_s29 = sshll.u32 %s314_s28, 4  ;;  %s36_s29 = int_to_ptr.vmem [resolvable:$true] %s35_s29 }
   0xf   :  { %s295_s30 = scalar_lea.vmem %s36_s29, 256  ;;  %p300_p6 = scmp.lt.s32.totalorder %s36_s29, %s36_s29 }
  0x10   :  { %p296_p5 = scmp.ne.s32.totalorder %s36_s29, %s295_s30  ;;  %p301_p7 = scmp.lt.s32.totalorder %s295_s30, %s295_s30 }
  0x12   :  { %p302_p8 = por %p301_p7, %p300_p6 }
  0x14   :  { %p303_p9 = pnand %p302_p8, %p296_p5 }
  0x16   :  { %306 = shalt.err (!%p303_p9)
}
  0x17   :  { %s315_s7 = smov 64   ;;  %s316_s8 = smov 4  }
  0x18   :  { %41 = dma.hbm_to_vmem [thread:$0]  %s391_s3, 256, %s36_s29, [#allocation5], %s315_s7, %s315_s7, %s316_s8  }
  0x19   :  { %307 = dma.done.wait [#allocation3], 256  }
  0x1a   :  { %308 = vsyncadd [#allocation3], 4294967040 }
  0x1b   :  { %309 = dma.done.wait [#allocation5], 256  }
  0x1c   :  { %310 = vsyncadd [#allocation5], 4294967040  ;;  %v317_v0 = vmov 0.0   ;;  %vm318_vm0 = vmmov 0   ;;  %v263_v1 = vld [vmem:[%s389_s1 + $0x8] sm:$0xff]   ;;  %v264_v2 = vld [vmem:[#allocation4 + $0x8] sm:$0xff]  }
  0x1d   :  { %239 = vmatprep.subr.bf16.mxu0 %v317_v0  ;;  %247 = vmatprep.subr.bf16.mxu1 %v317_v0  ;;  %v265_v3 = vld [vmem:[%s389_s1] sm:$0xff]   ;;  %v266_v4 = vld [vmem:[#allocation4] sm:$0xff]   ;;  %v52_v6 = vld [vmem:[#allocation2 + $0x8] sm:$0xff]  ;;  %vm77_vm1 = vcmask 261120   ;;  %vm130_vm2 = vcmask 257024  }
  0x1e   :  { %243 = vmatprep.mubr.msk.bf16.mxu0 %vm318_vm0, %v317_v0  ;;  %251 = vmatprep.mubr.msk.bf16.mxu1 %vm318_vm0, %v317_v0  ;;  %v51_v5 = vld [vmem:[#allocation2] sm:$0xff] }
  0x1f   :  { %240 = vmatpush3.bf16.msra.mxu0 %v263_v1  ;;  %248 = vmatpush3.bf16.msra.mxu1 %v264_v2  ;;  %v53_v7 = vpack.c.bf16 %v52_v6, %v51_v5  ;;  %v217_v8 = vld [vmem:[%s390_s2] ss:$0 sm:$0xff] }
  0x20   :  { %241 = vmatprep.subr.bf16.mxu0 %v317_v0  ;;  %249 = vmatprep.subr.bf16.mxu1 %v317_v0  ;;  %v223_v9 = vld [vmem:[%s392_s4] ss:$0 sm:$0xff] }
  0x23   :  { %242 = vmatpush3.bf16.msra.mxu0 %v265_v3  ;;  %250 = vmatpush3.bf16.msra.mxu1 %v266_v4 }
  0x26   :  { %244 = vmatmul.mubr.msk.bf16.vlgmr.msra.gmra.mxu0 %vm77_vm1, %v53_v7  ;;  %252 = vmatmul.mubr.msk.bf16.vlgmr.msra.gmra.mxu1 %vm77_vm1, %v53_v7 }
  0xe6   :  { %v115_v10 = vpop.f32.mrf.mxu0  ;;  %v190_v12 = vpop.f32.mrf.mxu1 }
  0xe7   :  { %v116_v11 = vadd.f32 %v217_v8, %v115_v10  ;;  %v191_v13 = vadd.f32 %v223_v9, %v190_v12 }
  0xe8   :  { %v245_v14 = vpop.f32.mrf.mxu0  ;;  %v253_v16 = vpop.f32.mrf.mxu1 }
  0xe9   :  { %v229_v15 = vpack.c.bf16 %v116_v11, %v116_v11  ;;  %v231_v17 = vpack.c.bf16 %v191_v13, %v191_v13 }
  0xea   :  { %v118_v18 = vpop.f32.mrf.mxu0  ;;  %v193_v20 = vpop.f32.mrf.mxu1 }
  0xeb   :  { %131 = vst.msk [vmem:[%s393_s5] sm:$0xf] %vm130_vm2, %v229_v15  ;;  %v119_v19 = vadd.f32 %v217_v8, %v118_v18  ;;  %205 = vst.msk [vmem:[%s394_s6] sm:$0xf] %vm130_vm2, %v231_v17  ;;  %v194_v21 = vadd.f32 %v223_v9, %v193_v20 }
  0xec   :  { %v246_v22 = vpop.f32.mrf.mxu0  ;;  %v254_v24 = vpop.f32.mrf.mxu1 }
  0xed   :  { %v230_v23 = vpack.c.bf16 %v119_v19, %v119_v19  ;;  %v232_v25 = vpack.c.bf16 %v194_v21, %v194_v21 }
  0xef   :  { %132 = vst.msk [vmem:[%s393_s5 + $0x4] sm:$0xf] %vm130_vm2, %v230_v23  ;;  %206 = vst.msk [vmem:[%s394_s6 + $0x4] sm:$0xf] %vm130_vm2, %v232_v25 }
  0xf0   :  { %215 = vsyncpa [#allocation3], 1 }
  0xf1   :  { %216 = vsyncpa [#allocation5], 1 }

// kernel: transformer_cross_attn_layer.9
= control target key start
LH: loop header
LB: loop body
LE: loop exit
PB: predicated region body
PF: predicated region fallthrough
CT: control target
= control target key end

     0   :  { %vm44_vm0 = vcmask 261120   ;;  %v420_v14 = vmov 0.0   ;;  %vm421_vm1 = vmmov 0   ;;  %vm172_vm2 = vcmask 257024   ;;  %s571_s0 = inlined_call_operand.vmem [shape: f32[16,32], index: 0, kind: input, shape index: {}]   ;;  %s572_s3 = inlined_call_operand.vmem [shape: bf16[32,32], index: 3, kind: input, shape index: {}]   ;;  %s573_s6 = inlined_call_operand.vmem [shape: bf16[32,32], index: 6, kind: input, shape index: {}]   ;;  %s574_s9 = inlined_call_operand.vmem [shape: bf16[32,32], index: 9, kind: input, shape index: {}]   ;;  %s575_s1 = inlined_call_operand.vmem [shape: f32[1,32], index: 1, kind: input, shape index: {}]   ;;  %s576_s2 = inlined_call_operand.vmem [shape: f32[1,32], index: 2, kind: input, shape index: {}, may-alias: {2,4,7,10}]   ;;  %s577_s5 = inlined_call_operand.vmem [shape: bf16[16,32], index: 5, kind: input, shape index: {}]   ;;  %s578_s8 = inlined_call_operand.vmem [shape: bf16[16,32], index: 8, kind: input, shape index: {}]   ;;  %s579_s4 = inlined_call_operand.vmem [shape: f32[1,32], index: 4, kind: input, shape index: {}, may-alias: {2,4,7,10}]   ;;  %s580_s7 = inlined_call_operand.vmem [shape: f32[1,32], index: 7, kind: input, shape index: {}, may-alias: {2,4,7,10}]   ;;  %s581_s10 = inlined_call_operand.vmem [shape: f32[1,32], index: 10, kind: input, shape index: {}, may-alias: {2,4,7,10}]   ;;  %s582_s11 = inlined_call_operand.vmem [shape: bf16[16,32], index: 11, kind: output, shape index: {0}]   ;;  %s583_s12 = inlined_call_operand.vmem [shape: bf16[16,32], index: 12, kind: output, shape index: {1}]   ;;  %s584_s13 = inlined_call_operand.vmem [shape: bf16[16,32], index: 13, kind: output, shape index: {2}]  }
   0x1   :  { %v42_v0 = vld [vmem:[%s571_s0] sm:$0xff]  ;;  %v43_v1 = vld [vmem:[%s571_s0 + $0x8] sm:$0xff]  ;;  %384 = vmatprep.subr.bf16.mxu0 %v420_v14  ;;  %392 = vmatprep.subr.bf16.mxu1 %v420_v14 }
   0x2   :  { %v45_v2 = vsel %vm44_vm0, %v42_v0, 0.0  ;;  %v48_v3 = vsel %vm44_vm0, %v43_v1, 0.0  ;;  %v410_v15 = vld [vmem:[%s572_s3 + $0x8] sm:$0xff]   ;;  %388 = vmatprep.mubr.msk.bf16.mxu0 %vm421_vm1, %v420_v14  ;;  %396 = vmatprep.mubr.msk.bf16.mxu1 %vm421_vm1, %v420_v14  ;;  %v412_v17 = vld [vmem:[%s572_s3] sm:$0xff]  }
   0x3   :  { %46 = vadd.xlane.f32.xlu0 %v45_v2  ;;  %v411_v16 = vld [vmem:[%s573_s6 + $0x8] sm:$0xff]   ;;  %385 = vmatpush3.bf16.msra.mxu0 %v410_v15  ;;  %v413_v18 = vld [vmem:[%s573_s6] sm:$0xff]  }
   0x4   :  { %393 = vmatpush3.bf16.msra.mxu1 %v411_v16  ;;  %386 = vmatprep.subr.bf16.mxu0 %v420_v14  ;;  %v341_v27 = vld [vmem:[%s575_s1] ss:$0 sm:$0xff]  ;;  %v414_v35 = vld [vmem:[%s574_s9 + $0x8] sm:$0xff]  }
   0x5   :  { %394 = vmatprep.subr.bf16.mxu1 %v420_v14  ;;  %v342_v31 = vld [vmem:[%s576_s2] ss:$0 sm:$0xff] }
   0x6   :  { %v415_v37 = vld [vmem:[%s574_s9] sm:$0xff]  }
   0x7   :  { %49 = vadd.xlane.f32.xlu0 %v48_v3  ;;  %387 = vmatpush3.bf16.msra.mxu0 %v412_v17  ;;  %v368_v38 = vld [vmem:[%s577_s5] sm:$0xff]  }
   0x8   :  { %395 = vmatpush3.bf16.msra.mxu1 %v413_v18  ;;  %400 = vmatprep.subr.bf16.mxu0 %v420_v14  ;;  %v372_v39 = vld [vmem:[%s578_s8] sm:$0xff]   ;;  %v369_v42 = vunpack.c.l.bf16 %v368_v38  ;;  %v370_v52 = vunpack.c.h.bf16 %v368_v38 }
   0x9   :  { %v343_v40 = vld [vmem:[%s579_s4] ss:$0 sm:$0xff]  ;;  %v373_v43 = vunpack.c.l.bf16 %v372_v39  ;;  %v374_v53 = vunpack.c.h.bf16 %v372_v39 }
   0xa   :  { %v349_v41 = vld [vmem:[%s580_s7] ss:$0 sm:$0xff] }
   0xb   :  { %v355_v62 = vld [vmem:[%s581_s10] ss:$0 sm:$0xff] }
  0x8c   :  { %v47_v4 = vpop.xlane.xlu0 %46 }
  0x8d   :  { %v52_v5 = vmul.f32 0.03125, %v47_v4 }
  0x8f   :  { %v54_v6 = vsub.f32 %v42_v0, %v52_v5 }
  0x90   :  { %v50_v7 = vpop.xlane.xlu0 %49 }
  0x91   :  { %v53_v8 = vmul.f32 0.03125, %v50_v7  ;;  %v56_v9 = vmul.f32 %v54_v6, %v54_v6 }
  0x93   :  { %v55_v10 = vsub.f32 %v43_v1, %v53_v8  ;;  %v58_v11 = vsel %vm44_vm0, %v56_v9, 0.0 }
  0x94   :  { %59 = vadd.xlane.f32.xlu1 %v58_v11 }
  0x95   :  { %v57_v12 = vmul.f32 %v55_v10, %v55_v10 }
  0x97   :  { %v61_v13 = vsel %vm44_vm0, %v57_v12, 0.0 }
  0x98   :  { %62 = vadd.xlane.f32.xlu1 %v61_v13 }
 0x11d   :  { %v60_v19 = vpop.xlane.xlu1 %59 }
 0x11e   :  { %v64_v20 = vmul.f32 0.03125, %v60_v19 }
 0x120   :  { %v66_v21 = vadd.f32 1e-05, %v64_v20 }
 0x121   :  { %v63_v22 = vpop.xlane.xlu1 %62 }
 0x122   :  { %416 = vrsqrt.f32 %v66_v21  ;;  %v65_v23 = vmul.f32 0.03125, %v63_v22 }
 0x124   :  { %v67_v24 = vadd.f32 1e-05, %v65_v23 }
 0x126   :  { %418 = vrsqrt.f32 %v67_v24 }
 0x12f   :  { %v417_v25 = vpop.eup %416 }
 0x130   :  { %v70_v26 = vmul.f32 %v417_v25, %v54_v6 }
 0x132   :  { %v79_v30 = vmul.f32 %v341_v27, %v70_v26 }
 0x133   :  { %v419_v28 = vpop.eup %418 }
 0x134   :  { %v71_v29 = vmul.f32 %v419_v28, %v55_v10  ;;  %v88_v33 = vadd.f32 %v342_v31, %v79_v30 }
 0x136   :  { %v80_v32 = vmul.f32 %v341_v27, %v71_v29 }
 0x138   :  { %v89_v34 = vadd.f32 %v342_v31, %v80_v32 }
 0x13a   :  { %v90_v36 = vpack.c.bf16 %v89_v34, %v88_v33 }
 0x13c   :  { %389 = vmatmul.mubr.msk.bf16.vlgmr.msra.gmra.mxu0 %vm44_vm0, %v90_v36  ;;  %397 = vmatmul.mubr.msk.bf16.vlgmr.msra.gmra.mxu1 %vm44_vm0, %v90_v36 }
 0x13d   :  { %401 = vmatpush3.bf16.msra.mxu0 %v414_v35  ;;  %404 = vmatprep.mubr.msk.bf16.mxu0 %vm421_vm1, %v420_v14 }
 0x13e   :  { %402 = vmatprep.subr.bf16.mxu0 %v420_v14 }
 0x141   :  { %403 = vmatpush3.bf16.msra.mxu0 %v415_v37 }
 0x144   :  { %405 = vmatmul.mubr.msk.bf16.vlgmr.msra.gmra.mxu0 %vm44_vm0, %v90_v36 }
 0x1fc   :  { %v151_v44 = vpop.f32.mrf.mxu0  ;;  %v232_v45 = vpop.f32.mrf.mxu1 }
 0x1fd   :  { %v152_v46 = vadd.f32 %v343_v40, %v151_v44  ;;  %v233_v47 = vadd.f32 %v349_v41, %v232_v45 }
 0x1fe   :  { %v390_v48 = vpop.f32.mrf.mxu0  ;;  %v398_v49 = vpop.f32.mrf.mxu1 }
 0x1ff   :  { %v162_v50 = vadd.f32 %v369_v42, %v152_v46  ;;  %v243_v51 = vadd.f32 %v373_v43, %v233_v47 }
 0x200   :  { %v154_v54 = vpop.f32.mrf.mxu0  ;;  %v235_v55 = vpop.f32.mrf.mxu1 }
 0x201   :  { %v361_v56 = vpack.c.bf16 %v162_v50, %v162_v50  ;;  %v363_v57 = vpack.c.bf16 %v243_v51, %v243_v51  ;;  %v155_v58 = vadd.f32 %v343_v40, %v154_v54  ;;  %v236_v59 = vadd.f32 %v349_v41, %v235_v55 }
 0x202   :  { %v391_v60 = vpop.f32.mrf.mxu0  ;;  %v399_v61 = vpop.f32.mrf.mxu1 }
 0x203   :  { %173 = vst.msk [vmem:[%s582_s11] sm:$0xf] %vm172_vm2, %v361_v56  ;;  %253 = vst.msk [vmem:[%s583_s12] sm:$0xf] %vm172_vm2, %v363_v57  ;;  %v163_v63 = vadd.f32 %v370_v52, %v155_v58  ;;  %v244_v0 = vadd.f32 %v374_v53, %v236_v59 }
 0x204   :  { %v312_v1 = vpop.f32.mrf.mxu0 }
 0x205   :  { %v362_v2 = vpack.c.bf16 %v163_v63, %v163_v63  ;;  %v364_v3 = vpack.c.bf16 %v244_v0, %v244_v0  ;;  %v313_v4 = vadd.f32 %v355_v62, %v312_v1 }
 0x206   :  { %v406_v5 = vpop.f32.mrf.mxu0 }
 0x207   :  { %174 = vst.msk [vmem:[%s582_s11 + $0x4] sm:$0xf] %vm172_vm2, %v362_v2  ;;  %254 = vst.msk [vmem:[%s583_s12 + $0x4] sm:$0xf] %vm172_vm2, %v364_v3  ;;  %v365_v6 = vpack.c.bf16 %v313_v4, %v313_v4 }
 0x208   :  { %v315_v7 = vpop.f32.mrf.mxu0 }
 0x209   :  { %327 = vst.msk [vmem:[%s584_s13] sm:$0xf] %vm172_vm2, %v365_v6  ;;  %v316_v8 = vadd.f32 %v355_v62, %v315_v7 }
 0x20a   :  { %v407_v9 = vpop.f32.mrf.mxu0 }
 0x20b   :  { %v366_v10 = vpack.c.bf16 %v316_v8, %v316_v8 }
 0x20d   :  { %328 = vst.msk [vmem:[%s584_s13 + $0x4] sm:$0xf] %vm172_vm2, %v366_v10 }

// kernel: transformer_cross_attn_layer.12
= control target key start
LH: loop header
LB: loop body
LE: loop exit
PB: predicated region body
PF: predicated region fallthrough
CT: control target
= control target key end

     0   :  { %v124_v0 = vmov 0.0   ;;  %vm125_vm0 = vmmov 0   ;;  %vm48_vm1 = vcmask 261120   ;;  %s178_s1 = inlined_call_operand.vmem [shape: bf16[32,32], index: 1, kind: input, shape index: {}]   ;;  %s179_s0 = inlined_call_operand.vmem [shape: bf16[16,32], index: 0, kind: input, shape index: {}]   ;;  %s180_s2 = inlined_call_operand.vmem [shape: f32[1,32], index: 2, kind: input, shape index: {}]   ;;  %s181_s3 = inlined_call_operand.vmem [shape: f32[16,32], index: 3, kind: input, shape index: {}]   ;;  %s182_s4 = inlined_call_operand.vmem [shape: f32[16,32], index: 4, kind: output, shape index: {}]  }
   0x1   :  { %111 = vmatprep.subr.bf16.mxu0 %v124_v0  ;;  %v121_v1 = vld [vmem:[%s178_s1 + $0x8] sm:$0xff]   ;;  %115 = vmatprep.mubr.msk.bf16.mxu0 %vm125_vm0, %v124_v0  ;;  %v122_v2 = vld [vmem:[%s178_s1] sm:$0xff]  }
   0x2   :  { %112 = vmatpush3.bf16.msra.mxu0 %v121_v1  ;;  %v123_v3 = vld [vmem:[%s179_s0] sm:$0xff]   ;;  %v94_v11 = vld [vmem:[%s181_s3 + $0x8] sm:$0xff] }
   0x3   :  { %113 = vmatprep.subr.bf16.mxu0 %v124_v0  ;;  %v103_v4 = vld [vmem:[%s180_s2] ss:$0 sm:$0xff] }
   0x4   :  { %v93_v6 = vld [vmem:[%s181_s3] sm:$0xff] }
   0x6   :  { %114 = vmatpush3.bf16.msra.mxu0 %v122_v2 }
   0x9   :  { %116 = vmatmul.mubr.msk.bf16.vlgmr.msra.gmra.mxu0 %vm48_vm1, %v123_v3 }
  0xc9   :  { %v86_v5 = vpop.f32.mrf.mxu0 }
  0xca   :  { %v87_v7 = vadd.f32 %v103_v4, %v86_v5 }
  0xcb   :  { %v117_v8 = vpop.f32.mrf.mxu0 }
  0xcc   :  { %v95_v9 = vadd.f32 %v93_v6, %v87_v7 }
  0xcd   :  { %v89_v10 = vpop.f32.mrf.mxu0 }
  0xce   :  { %97 = vst.msk [vmem:[%s182_s4] sm:$0xff] %vm48_vm1, %v95_v9  ;;  %v90_v12 = vadd.f32 %v103_v4, %v89_v10 }
  0xcf   :  { %v118_v13 = vpop.f32.mrf.mxu0 }
  0xd0   :  { %v96_v14 = vadd.f32 %v94_v11, %v90_v12 }
  0xd2   :  { %98 = vst.msk [vmem:[%s182_s4 + $0x8] sm:$0xff] %vm48_vm1, %v96_v14 }

// kernel: transformer_cross_attn_layer.11
= control target key start
LH: loop header
LB: loop body
LE: loop exit
PB: predicated region body
PF: predicated region fallthrough
CT: control target
= control target key end

     0   :  { %s1869_s12 = smov 0   ;;  %s1871_s13 = smov 0   ;;  %s2148_s0 = inlined_call_operand.vmem [shape: bf16[8,2,1,32], index: 0, kind: input, shape index: {}]   ;;  %s2149_s1 = inlined_call_operand.vmem [shape: bf16[8,2,1,32], index: 1, kind: input, shape index: {}]   ;;  %s2150_s2 = inlined_call_operand.vmem [shape: bf16[8,2,1,32], index: 2, kind: input, shape index: {}]   ;;  %s2151_s3 = inlined_call_operand.vmem [shape: bf16[8,2,1,32], index: 3, kind: output, shape index: {}]  }
   0x1   :  { %s1873_s14 = smov 0   ;;  %s1875_s15 = smov 0  }
   0x2   :  { %s1877_s16 = smov 0  }
   0x3 LB: > { %s25_s17 = sadd.s32 1, %s1834_s15  ;;  %s1624_s18 = sadd.s32 4294967295, %s1838_s16   ;;  %s1838_s16 = sphi %s1877_s16, %s13_s16   ;;  %s1834_s15 = sphi %s1875_s15, %s2159_s15   ;;  %s1830_s14 = sphi %s1873_s14, %s2158_s14   ;;  %s1826_s13 = sphi %s1871_s13, %s2157_s13   ;;  %s1822_s12 = sphi %s1869_s12, %s2156_s12  }
   0x4   : > { %p27_p0 = scmp.ge.s32.totalorder %s25_s17, 2  ;;  %p41_p1 = scmp.ne.s32.totalorder %s1826_s13, %s1822_s12 }
   0x5   : > { %p42_p2 = scmp.eq.s32.totalorder %s1838_s16, 0  ;;  %p125_p4 = scmp.eq.s32.totalorder %s1624_s18, 1 }
   0x6   : > { %s2161_s17 = smov (%p27_p0, %s25_s17), 0  ;;  %s34_s21 = sadd.s32 1, %s1826_s13 }
   0x7   : > { %p1901_p3 = por %p42_p2, %p41_p1  ;;  %s30_s20 = ssub.s32 %s1834_s15, %s2161_s17 }
   0x8   : > { %p32_p5 = scmp.eq.s32.totalorder %s30_s20, 0  ;;  %p1908_p6 = por %p125_p4, %p41_p1 }
   0x9   : > { %p1627_p7 = scmp.ge.s32.totalorder %s1838_s16, 2 }
   0xa   : > { %s1913_s23 = scalar_select %p32_p5, %s1826_s13, %s34_s21  }
   0xb   : > { %147 = sbr.rel (%p1627_p7) target bundleno = 40 (0x28), region = 16 }
  0x10   : > { %150 = sbr.rel (!%p1901_p3) target bundleno = 24 (0x18), region = 20  ;;  %s152_s24 = sand.u32 (%p1901_p3), 1, %s1826_s13  }
  0x11   : > { %s158_s27 = scalar_lea.vmem (%p1901_p3), %s2148_s0, %s1834_s15  ;;  %s1628_s28 = sshll.u32 (%p1901_p3), %s152_s24, 3 }
  0x12   : > { %v175_v0 = vld [vmem:[%s158_s27] sm:$0x1] (%p1901_p3)  ;;  %v177_v1 = vld [vmem:[%s158_s27 + $0x2] sm:$0x1] (%p1901_p3)  ;;  %v179_v2 = vld [vmem:[%s158_s27 + $0x4] sm:$0x1] (%p1901_p3) }
  0x13   : > { %v181_v3 = vld [vmem:[%s158_s27 + $0x6] sm:$0x1] (%p1901_p3)  ;;  %s154_s29 = scalar_lea.vmem (%p1901_p3), [#allocation2], %s1628_s28  ;;  %v183_v4 = vld [vmem:[%s158_s27 + $0x8] sm:$0x1] (%p1901_p3) }
  0x14   : > { %176 = vst [vmem:[%s154_s29] sm:$0x1] (%p1901_p3), %v175_v0  ;;  %178 = vst [vmem:[%s154_s29 + $0x1] sm:$0x1] (%p1901_p3), %v177_v1  ;;  %v185_v5 = vld [vmem:[%s158_s27 + $0xa] sm:$0x1] (%p1901_p3) }
  0x15   : > { %180 = vst [vmem:[%s154_s29 + $0x2] sm:$0x1] %v179_v2  ;;  %182 = vst [vmem:[%s154_s29 + $0x3] sm:$0x1] %v181_v3  ;;  %v187_v6 = vld [vmem:[%s158_s27 + $0xc] sm:$0x1] }
  0x16   : > { %184 = vst [vmem:[%s154_s29 + $0x4] sm:$0x1] %v183_v4  ;;  %186 = vst [vmem:[%s154_s29 + $0x5] sm:$0x1] %v185_v5  ;;  %v189_v7 = vld [vmem:[%s158_s27 + $0xe] sm:$0x1] }
  0x17   : > { %188 = vst [vmem:[%s154_s29 + $0x6] sm:$0x1] %v187_v6  ;;  %190 = vst [vmem:[%s154_s29 + $0x7] sm:$0x1] %v189_v7 }
  0x18 PF: > { %230 = sbr.rel (!%p1901_p3) target bundleno = 32 (0x20), region = 61  ;;  %s232_s30 = sand.u32 (%p1901_p3), 1, %s1826_s13  }
  0x19   : > { %s235_s6 = scalar_lea.vmem (%p1901_p3), %s2149_s1, %s1834_s15  ;;  %s1629_s7 = sshll.u32 (%p1901_p3), %s232_s30, 3 }
  0x1a   : > { %v252_v8 = vld [vmem:[%s235_s6] sm:$0x1] (%p1901_p3)  ;;  %v254_v9 = vld [vmem:[%s235_s6 + $0x2] sm:$0x1] (%p1901_p3)  ;;  %v256_v10 = vld [vmem:[%s235_s6 + $0x4] sm:$0x1] (%p1901_p3) }
  0x1b   : > { %v258_v11 = vld [vmem:[%s235_s6 + $0x6] sm:$0x1] (%p1901_p3)  ;;  %s234_s8 = scalar_lea.vmem (%p1901_p3), [#allocation3], %s1629_s7  ;;  %v260_v12 = vld [vmem:[%s235_s6 + $0x8] sm:$0x1] (%p1901_p3) }
  0x1c   : > { %253 = vst [vmem:[%s234_s8] sm:$0x1] (%p1901_p3), %v252_v8  ;;  %255 = vst [vmem:[%s234_s8 + $0x1] sm:$0x1] (%p1901_p3), %v254_v9  ;;  %v262_v13 = vld [vmem:[%s235_s6 + $0xa] sm:$0x1] (%p1901_p3) }
  0x1d   : > { %257 = vst [vmem:[%s234_s8 + $0x2] sm:$0x1] %v256_v10  ;;  %259 = vst [vmem:[%s234_s8 + $0x3] sm:$0x1] %v258_v11  ;;  %v264_v14 = vld [vmem:[%s235_s6 + $0xc] sm:$0x1] }
  0x1e   : > { %261 = vst [vmem:[%s234_s8 + $0x4] sm:$0x1] %v260_v12  ;;  %263 = vst [vmem:[%s234_s8 + $0x5] sm:$0x1] %v262_v13  ;;  %v266_v15 = vld [vmem:[%s235_s6 + $0xe] sm:$0x1] }
  0x1f   : > { %265 = vst [vmem:[%s234_s8 + $0x6] sm:$0x1] %v264_v14  ;;  %267 = vst [vmem:[%s234_s8 + $0x7] sm:$0x1] %v266_v15 }
  0x20 PF: > { %307 = sbr.rel (!%p1901_p3) target bundleno = 40 (0x28), region = 102  ;;  %s309_s9 = sand.u32 (%p1901_p3), 1, %s1826_s13  }
  0x21   : > { %s312_s18 = scalar_lea.vmem (%p1901_p3), %s2150_s2, %s1834_s15  ;;  %s1630_s20 = sshll.u32 (%p1901_p3), %s309_s9, 3 }
  0x22   : > { %v329_v16 = vld [vmem:[%s312_s18] sm:$0x1] (%p1901_p3)  ;;  %v331_v17 = vld [vmem:[%s312_s18 + $0x2] sm:$0x1] (%p1901_p3)  ;;  %v333_v18 = vld [vmem:[%s312_s18 + $0x4] sm:$0x1] (%p1901_p3) }
  0x23   : > { %v335_v19 = vld [vmem:[%s312_s18 + $0x6] sm:$0x1] (%p1901_p3)  ;;  %s311_s21 = scalar_lea.vmem (%p1901_p3), [#allocation4], %s1630_s20  ;;  %v337_v20 = vld [vmem:[%s312_s18 + $0x8] sm:$0x1] (%p1901_p3) }
  0x24   : > { %330 = vst [vmem:[%s311_s21] sm:$0x1] (%p1901_p3), %v329_v16  ;;  %332 = vst [vmem:[%s311_s21 + $0x1] sm:$0x1] (%p1901_p3), %v331_v17  ;;  %v339_v21 = vld [vmem:[%s312_s18 + $0xa] sm:$0x1] (%p1901_p3) }
  0x25   : > { %334 = vst [vmem:[%s311_s21 + $0x2] sm:$0x1] %v333_v18  ;;  %336 = vst [vmem:[%s311_s21 + $0x3] sm:$0x1] %v335_v19  ;;  %v341_v22 = vld [vmem:[%s312_s18 + $0xc] sm:$0x1] }
  0x26   : > { %338 = vst [vmem:[%s311_s21 + $0x4] sm:$0x1] %v337_v20  ;;  %340 = vst [vmem:[%s311_s21 + $0x5] sm:$0x1] %v339_v21  ;;  %v343_v23 = vld [vmem:[%s312_s18 + $0xe] sm:$0x1] }
  0x27   : > { %342 = vst [vmem:[%s311_s21 + $0x6] sm:$0x1] %v341_v22  ;;  %344 = vst [vmem:[%s311_s21 + $0x7] sm:$0x1] %v343_v23 }
  0x28 PF: > { %p1631_p8 = scmp.ge.s32.totalorder %s1838_s16, 1  ;;  %p383_p9 = scmp.lt.s32.totalorder %s1838_s16, 3 }
  0x2a   : > { %p384_p10 = pnand %p1631_p8, %p383_p9 }
  0x2b   : > { %s390_s19 = sand.u32 (!%p384_p10), 1, %s1822_s12   ;;  %s1843_s26 = smov (!%p384_p10), 120  }
  0x2c   : > { %387 = sbr.rel (%p384_p10) target bundleno = 1178 (0x49a), region = 143  ;;  %s1941_s24 = sshll.u32 (!%p384_p10), %s390_s19, 3 }
  0x2d   : > { %s399_s25 = scalar_lea.vmem (!%p384_p10), [#allocation3], %s1941_s24  ;;  %s1960_s12 = scalar_lea.vmem (!%p384_p10), [#allocation2], %s1941_s24 }
  0x2e   : > { %s1844_s27 = smov (!%p384_p10), 112   ;;  %s1845_s28 = smov (!%p384_p10), 104  }
  0x2f   : > { %s406_s29 = scalar_lea.vmem (!%p384_p10), [#allocation4], %s1941_s24  ;;  %s1846_s30 = smov (!%p384_p10), 8  }
  0x30   : > { %s1847_s4 = smov (!%p384_p10), 16   ;;  %s1848_s5 = smov (!%p384_p10), 24  }
  0x31   : > { %v479_v24 = vlaneseq  ;;  %v1840_v25 = vmov 0.0   ;;  %v1841_v26 = vmov 1966171168   ;;  %vm1842_vm0 = vmmov 0   ;;  %s2082_s6 = scalar_lea.vmem [#allocation5], %s1941_s24  ;;  %s1453_s9 = scalar_lea.vmem (%p1908_p6), %s2151_s3, %s1830_s14 }
  0x32   : > { %1687 = vmatprep.subr.bf16.mxu0 %v1840_v25  ;;  %v477_v27 = vunpack.c.l.s4 %v1841_v26  ;;  %1693 = vmatprep.subr.bf16.mxu1 %v1840_v25  ;;  %v1644_v29 = vld.sshfl [vmem:[%s399_s25] sm:$0x1 pattern:$0x75316420]  ;;  %vm590_vm1 = vcmask 1041409   ;;  %vm593_vm2 = vcmask 1042434  }
  0x33   : > { %v480_v28 = vshrl.u32 %v479_v24, 7  ;;  %v1645_v31 = vld.sshfl [vmem:[%s399_s25 + $0x1] sm:$0x1 pattern:$0x75316420]  ;;  %1689 = vmatprep.mubr.msk.bf16.mxu0 %vm1842_vm0, %v1840_v25  ;;  %1695 = vmatprep.mubr.msk.bf16.mxu1 %vm1842_vm0, %v1840_v25  ;;  %vm596_vm3 = vcmask 1043459  }
  0x34   : > { %v478_v30 = vunpack.c.0.s8 %v477_v27  ;;  %v1646_v32 = vld.sshfl [vmem:[%s399_s25 + $0x2] sm:$0x1 pattern:$0x75316420]  ;;  %vm599_vm4 = vcmask 1044484   ;;  %vm602_vm5 = vcmask 1045509  }
  0x35   : > { %v1647_v34 = vld.sshfl [vmem:[%s399_s25 + $0x3] sm:$0x1 pattern:$0x75316420]  ;;  %vm605_vm6 = vcmask 1046534   ;;  %vm608_vm7 = vcmask 1047559  }
  0x36   : > { %v1949_v33 = vsub.s32 %v478_v30, %v480_v28  ;;  %v1648_v35 = vld.sshfl [vmem:[%s399_s25 + $0x4] sm:$0x1 pattern:$0x75316420]  ;;  %vm754_vm8 = vcmask 64512   ;;  %vm958_vm9 = vcmask 1043456  }
  0x37   : > { %v1649_v40 = vld.sshfl [vmem:[%s399_s25 + $0x5] sm:$0x1 pattern:$0x75316420]  ;;  %vm1346_vm10 = vcmask 130048   ;;  %vm1348_vm11 = vcmask 195584  }
  0x38   : > { %v632_v36 = vrot.slane %v1644_v29, %v1949_v33  ;;  %v646_v37 = vrot.slane %v1645_v31, %v1949_v33  ;;  %v660_v38 = vrot.slane %v1646_v32, %v1949_v33  ;;  %v674_v39 = vrot.slane %v1647_v34, %v1949_v33  ;;  %v1650_v42 = vld.sshfl [vmem:[%s399_s25 + $0x6] sm:$0x1 pattern:$0x75316420] }
  0x39   : > { %v688_v41 = vrot.slane %v1648_v35, %v1949_v33  ;;  %v702_v43 = vrot.slane %v1649_v40, %v1949_v33  ;;  %v1651_v47 = vld.sshfl [vmem:[%s399_s25 + $0x7] sm:$0x1 pattern:$0x75316420]  ;;  %v716_v48 = vrot.slane %v1650_v42, %v1949_v33  ;;  %vm1416_vm12 = vcmask 253952  }
  0x3a   : > { %v731_v44 = vunpack.c.l.b16 %v632_v36  ;;  %v732_v45 = vunpack.c.l.b16 %v646_v37  ;;  %v733_v46 = vunpack.c.l.b16 %v660_v38  ;;  %v734_v49 = vunpack.c.l.b16 %v674_v39  ;;  %v1636_v55 = vld.sshfl [vmem:[%s1960_s12] sm:$0x1 pattern:$0x75316420] }
  0x3b   : > { %v735_v50 = vunpack.c.l.b16 %v688_v41  ;;  %v730_v51 = vrot.slane %v1651_v47, %v1949_v33  ;;  %v736_v52 = vunpack.c.l.b16 %v702_v43  ;;  %v737_v56 = vunpack.c.l.b16 %v716_v48  ;;  %v1637_v59 = vld.sshfl [vmem:[%s1960_s12 + $0x1] sm:$0x1 pattern:$0x75316420] }
  0x3c   : > { %v739_v53 = vrot.slane %v732_v45, 7  ;;  %v741_v54 = vrot.slane %v733_v46, 6  ;;  %v743_v57 = vrot.slane %v734_v49, 5  ;;  %v482_v60 = vrot.slane %v1636_v55, %v1949_v33 }
  0x3d   : > { %v745_v58 = vrot.slane %v735_v50, 4  ;;  %v738_v61 = vunpack.c.l.b16 %v730_v51  ;;  %v747_v63 = vrot.slane %v736_v52, 3  ;;  %v1638_v0 = vld.sshfl [vmem:[%s1960_s12 + $0x2] sm:$0x1 pattern:$0x75316420]  ;;  %v496_v1 = vrot.slane %v1637_v59, %v1949_v33 }
  0x3e   : > { %v740_v62 = vsel %vm590_vm1, %v739_v53, %v731_v44  ;;  %v749_v3 = vrot.slane %v737_v56, 2  ;;  %v1639_v4 = vld.sshfl [vmem:[%s1960_s12 + $0x3] sm:$0x1 pattern:$0x75316420]  ;;  %v510_v5 = vrot.slane %v1638_v0, %v1949_v33  ;;  %v581_v6 = vunpack.c.l.b16 %v482_v60 }
  0x3f   : > { %v742_v2 = vsel %vm593_vm2, %v741_v54, %v740_v62  ;;  %v751_v8 = vrot.slane %v738_v61, 1  ;;  %v1640_v9 = vld.sshfl [vmem:[%s1960_s12 + $0x4] sm:$0x1 pattern:$0x75316420]  ;;  %v524_v10 = vrot.slane %v1639_v4, %v1949_v33  ;;  %v582_v11 = vunpack.c.l.b16 %v496_v1 }
  0x40   : > { %v744_v7 = vsel %vm596_vm3, %v743_v57, %v742_v2  ;;  %v1641_v13 = vld.sshfl [vmem:[%s1960_s12 + $0x5] sm:$0x1 pattern:$0x75316420]  ;;  %v538_v14 = vrot.slane %v1640_v9, %v1949_v33  ;;  %v583_v15 = vunpack.c.l.b16 %v510_v5  ;;  %vm1417_vm13 = vsmask.f32 256 }
  0x41   : > { %v746_v12 = vsel %vm599_vm4, %v745_v58, %v744_v7  ;;  %v1642_v17 = vld.sshfl [vmem:[%s1960_s12 + $0x6] sm:$0x1 pattern:$0x75316420]  ;;  %v552_v18 = vrot.slane %v1641_v13, %v1949_v33  ;;  %v584_v19 = vunpack.c.l.b16 %v524_v10  ;;  %v589_v20 = vrot.slane %v582_v11, 7  ;;  %vm2077_vm14 = vmand %vm1416_vm12, %vm1417_vm13 }
  0x42   : > { %v748_v16 = vsel %vm602_vm5, %v747_v63, %v746_v12  ;;  %v1643_v22 = vld.sshfl [vmem:[%s1960_s12 + $0x7] sm:$0x1 pattern:$0x75316420]  ;;  %v566_v23 = vrot.slane %v1642_v17, %v1949_v33  ;;  %v585_v24 = vunpack.c.l.b16 %v538_v14  ;;  %v592_v26 = vrot.slane %v583_v15, 6 }
  0x43   : > { %v750_v21 = vsel %vm605_vm6, %v749_v3, %v748_v16  ;;  %v580_v28 = vrot.slane %v1643_v22, %v1949_v33  ;;  %v586_v29 = vunpack.c.l.b16 %v552_v18  ;;  %v591_v30 = vsel %vm590_vm1, %v589_v20, %v581_v6  ;;  %v1654_v53 = vld.sshfl [vmem:[%s406_s29 + $0x1] sm:$0x1 pattern:$0x75316420] }
  0x44   : > { %v752_v27 = vsel %vm608_vm7, %v751_v8, %v750_v21  ;;  %v587_v32 = vunpack.c.l.b16 %v566_v23  ;;  %v594_v34 = vsel %vm593_vm2, %v592_v26, %v591_v30  ;;  %v595_v35 = vrot.slane %v584_v19, 5  ;;  %v1655_v54 = vld.sshfl [vmem:[%s406_s29 + $0x2] sm:$0x1 pattern:$0x75316420] }
  0x45   : > { %v1986_v31 = vpack.c.b16 %v752_v27, %v752_v27  ;;  %v588_v36 = vunpack.c.l.b16 %v580_v28  ;;  %v598_v37 = vrot.slane %v585_v24, 4  ;;  %v601_v38 = vrot.slane %v586_v29, 3  ;;  %v1653_v56 = vld.sshfl [vmem:[%s406_s29] sm:$0x1 pattern:$0x75316420] }
  0x46   : > { %v597_v40 = vsel %vm596_vm3, %v595_v35, %v594_v34  ;;  %v604_v41 = vrot.slane %v587_v32, 2  ;;  %v847_v55 = vrot.slane %v1654_v53, %v1949_v33  ;;  %v861_v57 = vrot.slane %v1655_v54, %v1949_v33  ;;  %v1656_v58 = vld.sshfl [vmem:[%s406_s29 + $0x3] sm:$0x1 pattern:$0x75316420] }
  0x47   : > { %v759_v39 = vsel %vm754_vm8, %v1986_v31, 0  ;;  %v600_v42 = vsel %vm599_vm4, %v598_v37, %v597_v40  ;;  %v607_v43 = vrot.slane %v588_v36, 1  ;;  %v833_v59 = vrot.slane %v1653_v56, %v1949_v33  ;;  %v1657_v61 = vld.sshfl [vmem:[%s406_s29 + $0x4] sm:$0x1 pattern:$0x75316420] }
  0x48   : > { %1688 = vmatpush3.bf16.xpose.msra.mxu0 %v759_v39  ;;  %v603_v44 = vsel %vm602_vm5, %v601_v38, %v600_v42  ;;  %v933_v60 = vunpack.c.l.b16 %v847_v55  ;;  %v875_v62 = vrot.slane %v1656_v58, %v1949_v33  ;;  %v934_v63 = vunpack.c.l.b16 %v861_v57  ;;  %v1658_v0 = vld.sshfl [vmem:[%s406_s29 + $0x5] sm:$0x1 pattern:$0x75316420] }
  0x49   : > { %1705 = vmatprep.subr.bf16.mxu0 %v1840_v25  ;;  %v606_v45 = vsel %vm605_vm6, %v604_v41, %v603_v44  ;;  %v889_v1 = vrot.slane %v1657_v61, %v1949_v33  ;;  %v932_v2 = vunpack.c.l.b16 %v833_v59  ;;  %v1659_v4 = vld.sshfl [vmem:[%s406_s29 + $0x6] sm:$0x1 pattern:$0x75316420]  ;;  %v903_v5 = vrot.slane %v1658_v0, %v1949_v33 }
  0x4a   : > { %v609_v46 = vsel %vm608_vm7, %v607_v43, %v606_v45  ;;  %v940_v3 = vrot.slane %v933_v60, 7  ;;  %v935_v6 = vunpack.c.l.b16 %v875_v62  ;;  %v942_v7 = vrot.slane %v934_v63, 6  ;;  %v1660_v8 = vld.sshfl [vmem:[%s406_s29 + $0x7] sm:$0x1 pattern:$0x75316420] }
  0x4b   : > { %v610_v47 = vpack.c.b16 %v609_v46, %v609_v46  ;;  %v917_v9 = vrot.slane %v1659_v4, %v1949_v33  ;;  %v936_v10 = vunpack.c.l.b16 %v889_v1  ;;  %v931_v12 = vrot.slane %v1660_v8, %v1949_v33 }
  0x4c   : > { %v941_v11 = vsel %vm590_vm1, %v940_v3, %v932_v2  ;;  %v937_v13 = vunpack.c.l.b16 %v903_v5  ;;  %v944_v15 = vrot.slane %v935_v6, 5 }
  0x4d   : > { %1003 = vrot.lane.b32.xlu1 %v610_v47, %s1843_s26  ;;  %v943_v14 = vsel %vm593_vm2, %v942_v7, %v941_v11  ;;  %v938_v16 = vunpack.c.l.b16 %v917_v9  ;;  %v946_v17 = vrot.slane %v936_v10, 4  ;;  %v939_v18 = vunpack.c.l.b16 %v931_v12 }
  0x4e   : > { %v945_v19 = vsel %vm596_vm3, %v944_v15, %v943_v14  ;;  %v948_v20 = vrot.slane %v937_v13, 3 }
  0x4f   : > { %1690 = vmatmul.mubr.msk.bf16.vlgmr.msra.gmra.mxu0 %vm754_vm8, %v610_v47  ;;  %v947_v21 = vsel %vm599_vm4, %v946_v17, %v945_v19  ;;  %v950_v22 = vrot.slane %v938_v16, 2  ;;  %v952_v24 = vrot.slane %v939_v18, 1 }
  0x50   : > { %1707 = vmatprep.mubr.msk.bf16.mxu0 %vm1842_vm0, %v1840_v25  ;;  %v949_v23 = vsel %vm602_vm5, %v948_v20, %v947_v21 }
  0x51   : > { %1115 = vrot.lane.b32.xlu1 %v1986_v31, %s1844_s27  ;;  %v951_v26 = vsel %vm605_vm6, %v950_v22, %v949_v23 }
  0x52   : > { %v953_v27 = vsel %vm608_vm7, %v952_v24, %v951_v26 }
  0x53   : > { %v954_v28 = vpack.c.b16 %v953_v27, %v953_v27 }
  0x55   : > { %1113 = vrot.lane.b32.xlu1 %v610_v47, %s1844_s27  ;;  %v960_v29 = vsel %vm958_vm9, %v954_v28, 0 }
  0x56   : > { %1694 = vmatpush3.bf16.msra.mxu1 %v960_v29 }
  0x57   : > { %1699 = vmatprep.subr.bf16.mxu1 %v1840_v25 }
  0x59   : > { %1225 = vrot.lane.b32.xlu1 %v1986_v31, %s1845_s28 }
  0x5d   : > { %1223 = vrot.lane.b32.xlu1 %v610_v47, %s1845_s28 }
  0xbf   : > { %v1004_v36 = vpop.permute.xlu1 %1003 }
  0xc3   : > { %v1116_v39 = vpop.permute.xlu1 %1115 }
  0xc4   : > { %v1121_v40 = vsel %vm754_vm8, %v1116_v39, 0 }
  0xc7   : > { %v1114_v41 = vpop.permute.xlu1 %1113 }
  0xcb   : > { %v1226_v42 = vpop.permute.xlu1 %1225 }
  0xcc   : > { %v1231_v43 = vsel %vm754_vm8, %v1226_v42, 0 }
  0xcf   : > { %v1224_v44 = vpop.permute.xlu1 %1223 }
 0x10f   : > { %v795_v48 = vpop.f32.mrf.mxu0 }
 0x110   : > { %v801_v49 = vsel %vm754_vm8, %v795_v48, -inf }
 0x111   : > { %802 = vmax.xlane.f32.xlu0 %v801_v49  ;;  %v1691_v50 = vpop.f32.mrf.mxu0 }
 0x113   : > { %v798_v51 = vpop.f32.mrf.mxu0 }
 0x115   : > { %v1692_v52 = vpop.f32.mrf.mxu0 }
 0x127   : > { %1005 = vrot.lane.b32.xlu0 %v1986_v31, %s1843_s26 }
 0x19a   : > { %v803_v30 = vpop.xlane.xlu0 %802 }
 0x19b   : > { %v804_v32 = vsub.f32 %v795_v48, %v803_v30 }
 0x19d   : > { %v805_v34 = vmul.f32 1.442695, %v804_v32 }
 0x19e   : > { %v1006_v35 = vpop.permute.xlu0 %1005 }
 0x19f   : > { %1784 = vpow2.f32 %v805_v34  ;;  %v1011_v37 = vsel %vm754_vm8, %v1006_v35, 0 }
 0x1ac   : > { %v2028_v31 = vpop.eup %1784 }
 0x1ad   : > { %v811_v38 = vpack.c.bf16 %v2028_v31, %v2028_v31  ;;  %v807_v24 = vsel %vm754_vm8, %v2028_v31, 0.0 }
 0x1af   : > { %1696 = vmatmul.mubr.msk.bf16.vlgmr.msra.gmra.mxu1 %vm754_vm8, %v811_v38 }
 0x1b0   : > { %1700 = vmatpush3.bf16.xpose.msra.mxu1 %v1011_v37  ;;  %1701 = vmatprep.mubr.msk.bf16.mxu1 %vm1842_vm0, %v1840_v25 }
 0x1b1   : > { %1711 = vmatprep.subr.bf16.mxu1 %v1840_v25 }
 0x1b7   : > { %1702 = vmatmul.mubr.msk.bf16.vlgmr.msra.gmra.mxu1 %vm754_vm8, %v1004_v36 }
 0x1b8   : > { %1712 = vmatpush3.bf16.xpose.msra.mxu1 %v1121_v40  ;;  %1713 = vmatprep.mubr.msk.bf16.mxu1 %vm1842_vm0, %v1840_v25 }
 0x1b9   : > { %1723 = vmatprep.subr.bf16.mxu1 %v1840_v25 }
 0x1bf   : > { %1714 = vmatmul.mubr.msk.bf16.vlgmr.msra.gmra.mxu1 %vm754_vm8, %v1114_v41 }
 0x1c0   : > { %1724 = vmatpush3.bf16.xpose.msra.mxu1 %v1231_v43  ;;  %1725 = vmatprep.mubr.msk.bf16.mxu1 %vm1842_vm0, %v1840_v25 }
 0x1c7   : > { %1726 = vmatmul.mubr.msk.bf16.vlgmr.msra.gmra.mxu1 %vm754_vm8, %v1224_v44 }
 0x26f   : > { %v2047_v45 = vpop.f32.mrf.mxu1 }
 0x271   : > { %v1697_v46 = vpop.f32.mrf.mxu1 }
 0x273   : > { %v999_v47 = vpop.f32.mrf.mxu1 }
 0x275   : > { %v1698_v48 = vpop.f32.mrf.mxu1 }
 0x277   : > { %v1047_v49 = vpop.f32.mrf.mxu1 }
 0x278   : > { %v1053_v50 = vsel %vm754_vm8, %v1047_v49, -inf }
 0x279   : > { %1054 = vmax.xlane.f32.xlu1 %v1053_v50  ;;  %v1703_v51 = vpop.f32.mrf.mxu1 }
 0x27b   : > { %v1050_v52 = vpop.f32.mrf.mxu1 }
 0x27d   : > { %v1704_v53 = vpop.f32.mrf.mxu1 }
 0x27f   : > { %v1157_v54 = vpop.f32.mrf.mxu1 }
 0x280   : > { %v1163_v55 = vsel %vm754_vm8, %v1157_v54, -inf }
 0x281   : > { %1164 = vmax.xlane.f32.xlu0 %v1163_v55  ;;  %v1715_v56 = vpop.f32.mrf.mxu1 }
 0x283   : > { %v1160_v57 = vpop.f32.mrf.mxu1 }
 0x285   : > { %v1716_v58 = vpop.f32.mrf.mxu1 }
 0x287   : > { %v1267_v59 = vpop.f32.mrf.mxu1 }
 0x288   : > { %v1273_v63 = vsel %vm754_vm8, %v1267_v59, -inf }
 0x289   : > { %v1727_v60 = vpop.f32.mrf.mxu1 }
 0x28a   : > { %1174 = vrot.lane.b32.xlu1 %v954_v28, %s1844_s27 }
 0x28b   : > { %v1270_v61 = vpop.f32.mrf.mxu1 }
 0x28d   : > { %v1728_v62 = vpop.f32.mrf.mxu1 }
 0x28e   : > { %v1419_v62 = vld [vmem:[%s2082_s6] sm:$0x1] }
 0x297   : > { %1064 = vrot.lane.b32.xlu0 %v954_v28, %s1843_s26 }
 0x2ae   : > { %1274 = vmax.xlane.f32.xlu1 %v1273_v63 }
 0x2bf   : > { %1284 = vrot.lane.b32.xlu1 %v954_v28, %s1845_s28 }
 0x302   : > { %v1055_v0 = vpop.xlane.xlu1 %1054 }
 0x303   : > { %v1056_v1 = vsub.f32 %v1047_v49, %v1055_v0 }
 0x305   : > { %v1057_v2 = vmul.f32 1.442695, %v1056_v1 }
 0x306   : > { %v1175_v9 = vpop.permute.xlu1 %1174 }
 0x307   : > { %1786 = vpow2.f32 %v1057_v2  ;;  %v1180_v12 = vsel %vm958_vm9, %v1175_v9, 0 }
 0x30a   : > { %v1165_v3 = vpop.xlane.xlu0 %1164 }
 0x30b   : > { %v1166_v4 = vsub.f32 %v1157_v54, %v1165_v3 }
 0x30d   : > { %v1167_v5 = vmul.f32 1.442695, %v1166_v4  ;;  %v1422_v4 = vld [vmem:[%s2082_s6 + $0x1] sm:$0x1] }
 0x30e   : > { %v1065_v6 = vpop.permute.xlu0 %1064 }
 0x30f   : > { %1788 = vpow2.f32 %v1167_v5  ;;  %v1070_v7 = vsel %vm958_vm9, %v1065_v6, 0  ;;  %v1425_v5 = vld [vmem:[%s2082_s6 + $0x2] sm:$0x1]  ;;  %v1431_v6 = vld [vmem:[%s2082_s6 + $0x4] sm:$0x1] }
 0x310   : > { %1706 = vmatpush3.bf16.msra.mxu0 %v1070_v7 }
 0x311   : > { %1717 = vmatprep.subr.bf16.mxu0 %v1840_v25 }
 0x314   : > { %v1787_v8 = vpop.eup %1786 }
 0x315   : > { %v1059_v10 = vsel %vm754_vm8, %v1787_v8, 0.0  ;;  %v1063_v11 = vpack.c.bf16 %v1787_v8, %v1787_v8 }
 0x316   : > { %1060 = vadd.xlane.f32.xlu0 %v1059_v10 }
 0x317   : > { %1708 = vmatmul.mubr.msk.bf16.vlgmr.msra.gmra.mxu0 %vm754_vm8, %v1063_v11  ;;  %v1428_v11 = vld [vmem:[%s2082_s6 + $0x3] sm:$0x1] }
 0x318   : > { %1718 = vmatpush3.bf16.msra.mxu0 %v1180_v12  ;;  %1719 = vmatprep.mubr.msk.bf16.mxu0 %vm1842_vm0, %v1840_v25  ;;  %v1434_v12 = vld [vmem:[%s2082_s6 + $0x5] sm:$0x1] }
 0x319   : > { %1729 = vmatprep.subr.bf16.mxu0 %v1840_v25 }
 0x31c   : > { %v1789_v13 = vpop.eup %1788 }
 0x31d   : > { %v1169_v14 = vsel %vm754_vm8, %v1789_v13, 0.0  ;;  %v1173_v15 = vpack.c.bf16 %v1789_v13, %v1789_v13  ;;  %v1437_v13 = vld [vmem:[%s2082_s6 + $0x6] sm:$0x1] }
 0x31e   : > { %1170 = vadd.xlane.f32.xlu1 %v1169_v14 }
 0x31f   : > { %1720 = vmatmul.mubr.msk.bf16.vlgmr.msra.gmra.mxu0 %vm754_vm8, %v1173_v15 }
 0x320   : > { %1731 = vmatprep.mubr.msk.bf16.mxu0 %vm1842_vm0, %v1840_v25 }
 0x337   : > { %v1275_v16 = vpop.xlane.xlu1 %1274 }
 0x338   : > { %v1276_v17 = vsub.f32 %v1267_v59, %v1275_v16 }
 0x33a   : > { %v1277_v18 = vmul.f32 1.442695, %v1276_v17 }
 0x33b   : > { %v1285_v19 = vpop.permute.xlu1 %1284 }
 0x33c   : > { %1790 = vpow2.f32 %v1277_v18  ;;  %v1290_v20 = vsel %vm958_vm9, %v1285_v19, 0 }
 0x33d   : > { %1730 = vmatpush3.bf16.msra.mxu0 %v1290_v20  ;;  %v1440_v20 = vld [vmem:[%s2082_s6 + $0x7] sm:$0x1] }
 0x349   : > { %v1791_v21 = vpop.eup %1790 }
 0x34a   : > { %v1279_v22 = vsel %vm754_vm8, %v1791_v21, 0.0  ;;  %v1283_v23 = vpack.c.bf16 %v1791_v21, %v1791_v21 }
 0x34b   : > { %1280 = vadd.xlane.f32.xlu0 %v1279_v22 }
 0x34c   : > { %1732 = vmatmul.mubr.msk.bf16.vlgmr.msra.gmra.mxu0 %vm754_vm8, %v1283_v23 }
 0x34f   : > { %808 = vadd.xlane.f32.xlu0 %v807_v24 }
 0x39f   : > { %v1061_v25 = vpop.xlane.xlu0 %1060 }
 0x3a0   : > { %1792 = vrcp.f32 %v1061_v25 }
 0x3a7   : > { %v1171_v26 = vpop.xlane.xlu1 %1170 }
 0x3a8   : > { %1794 = vrcp.f32 %v1171_v26 }
 0x3ad   : > { %v1793_v27 = vpop.eup %1792 }
 0x3b5   : > { %v1795_v35 = vpop.eup %1794 }
 0x3d4   : > { %v1281_v40 = vpop.xlane.xlu0 %1280 }
 0x3d5   : > { %1796 = vrcp.f32 %v1281_v40 }
 0x3d7   : > { %v1106_v28 = vpop.f32.mrf.mxu0 }
 0x3d8   : > { %v1112_v29 = vmul.f32 %v1793_v27, %v1106_v28  ;;  %v809_v48 = vpop.xlane.xlu0 %808 }
 0x3d9   : > { %v1709_v30 = vpop.f32.mrf.mxu0  ;;  %1798 = vrcp.f32 %v809_v48 }
 0x3da   : > { %1334 = vrot.lane.b32.xlu1 %v1112_v29, %s1846_s30 }
 0x3db   : > { %v1109_v32 = vpop.f32.mrf.mxu0 }
 0x3dd   : > { %v1710_v34 = vpop.f32.mrf.mxu0 }
 0x3df   : > { %v1216_v36 = vpop.f32.mrf.mxu0 }
 0x3e0   : > { %v1222_v37 = vmul.f32 %v1795_v35, %v1216_v36 }
 0x3e1   : > { %v1721_v38 = vpop.f32.mrf.mxu0 }
 0x3e2   : > { %1338 = vrot.lane.b32.xlu0 %v1222_v37, %s1847_s4  ;;  %v1797_v41 = vpop.eup %1796 }
 0x3e3   : > { %v1219_v31 = vpop.f32.mrf.mxu0 }
 0x3e5   : > { %v1722_v39 = vpop.f32.mrf.mxu0 }
 0x3e6   : > { %v1799_v49 = vpop.eup %1798 }
 0x3e7   : > { %v1002_v51 = vmul.f32 %v1799_v49, %v2047_v45 }
 0x40c   : > { %v1326_v42 = vpop.f32.mrf.mxu0 }
 0x40d   : > { %v1332_v43 = vmul.f32 %v1797_v41, %v1326_v42 }
 0x40e   : > { %v1733_v44 = vpop.f32.mrf.mxu0 }
 0x40f   : > { %1342 = vrot.lane.b32.xlu1 %v1332_v43, %s1848_s5 }
 0x410   : > { %v1329_v46 = vpop.f32.mrf.mxu0 }
 0x412   : > { %v1734_v47 = vpop.f32.mrf.mxu0 }
 0x44c   : > { %v1335_v50 = vpop.permute.xlu1 %1334 }
 0x44d   : > { %v1345_v53 = vsel %vm754_vm8, %v1002_v51, %v1335_v50 }
 0x454   : > { %v1339_v52 = vpop.permute.xlu0 %1338 }
 0x455   : > { %v1347_v54 = vsel %vm1346_vm10, %v1345_v53, %v1339_v52 }
 0x481   : > { %v1343_v55 = vpop.permute.xlu1 %1342 }
 0x482   : > { %v1349_v56 = vsel %vm1348_vm11, %v1347_v54, %v1343_v55 }
 0x483   : > { %v1351_v57 = vcombine.high %v1349_v56, %v1349_v56  ;;  %v1358_v58 = vrot.slane %v1349_v56, %v1949_v33 }
 0x485   : > { %v1365_v59 = vrot.slane %v1351_v57, %v1949_v33  ;;  %v1366_v60 = vcombine.high %v1358_v58, %v1358_v58  ;;  %v1374_v61 = vrot.slane %v1358_v58, %v1949_v33 }
 0x487   : > { %v1367_v63 = vcombine.high %v1365_v59, %v1365_v59  ;;  %v1381_v0 = vrot.slane %v1365_v59, %v1949_v33  ;;  %v1388_v1 = vrot.slane %v1366_v60, %v1949_v33  ;;  %v1396_v2 = vcombine.high %v1374_v61, %v1374_v61 }
 0x488   : > { %v1408_v3 = vpack.c.bf16 %v1374_v61, %v1374_v61 }
 0x489   : > { %v1395_v7 = vrot.slane %v1367_v63, %v1949_v33  ;;  %v1397_v8 = vcombine.high %v1381_v0, %v1381_v0  ;;  %v1398_v9 = vcombine.high %v1388_v1, %v1388_v1  ;;  %v1409_v10 = vpack.c.bf16 %v1388_v1, %v1388_v1 }
 0x48a   : > { %v1410_v14 = vpack.c.bf16 %v1396_v2, %v1396_v2  ;;  %v1412_v15 = vpack.c.bf16 %v1381_v0, %v1381_v0  ;;  %v1420_v16 = vsel %vm2077_vm14, %v1408_v3, %v1419_v62 }
 0x48b   : > { %v1399_v17 = vcombine.high %v1395_v7, %v1395_v7  ;;  %v1411_v18 = vpack.c.bf16 %v1398_v9, %v1398_v9  ;;  %v1413_v19 = vpack.c.bf16 %v1395_v7, %v1395_v7  ;;  %v1414_v33 = vpack.c.bf16 %v1397_v8, %v1397_v8  ;;  %1421 = vst [vmem:[%s2082_s6] sm:$0x1] %v1420_v16 }
 0x48c   : > { %v1423_v21 = vsel %vm2077_vm14, %v1409_v10, %v1422_v4  ;;  %v1426_v22 = vsel %vm2077_vm14, %v1410_v14, %v1425_v5  ;;  %v1432_v23 = vsel %vm2077_vm14, %v1412_v15, %v1431_v6  ;;  %1449 = sbr.rel (!%p1908_p6) target bundleno = 1178 (0x49a), region = 159 }
 0x48d   : > { %v1415_v24 = vpack.c.bf16 %v1399_v17, %v1399_v17  ;;  %1424 = vst [vmem:[%s2082_s6 + $0x1] sm:$0x1] %v1423_v21  ;;  %1427 = vst [vmem:[%s2082_s6 + $0x2] sm:$0x1] %v1426_v22  ;;  %v1429_v25 = vsel %vm2077_vm14, %v1411_v18, %v1428_v11  ;;  %v1435_v26 = vsel %vm2077_vm14, %v1413_v19, %v1434_v12 }
 0x48e   : > { %1433 = vst [vmem:[%s2082_s6 + $0x4] sm:$0x1] %v1432_v23  ;;  %v1438_v27 = vsel %vm2077_vm14, %v1414_v33, %v1437_v13  ;;  %1430 = vst [vmem:[%s2082_s6 + $0x3] sm:$0x1] %v1429_v25 }
 0x48f   : > { %1436 = vst [vmem:[%s2082_s6 + $0x5] sm:$0x1] %v1435_v26  ;;  %1439 = vst [vmem:[%s2082_s6 + $0x6] sm:$0x1] %v1438_v27  ;;  %v1441_v28 = vsel %vm2077_vm14, %v1415_v24, %v1440_v20 }
 0x490   : > { %1442 = vst [vmem:[%s2082_s6 + $0x7] sm:$0x1] %v1441_v28 }
 0x492   : > { %v1470_v29 = vld [vmem:[%s2082_s6] sm:$0x1] }
 0x493   : > { %1471 = vst [vmem:[%s1453_s9] sm:$0x1] %v1470_v29 }
 0x494   : > { %v1472_v30 = vld [vmem:[%s2082_s6 + $0x1] sm:$0x1]  ;;  %v1474_v32 = vld [vmem:[%s2082_s6 + $0x2] sm:$0x1] }
 0x495   : > { %1473 = vst [vmem:[%s1453_s9 + $0x2] sm:$0x1] %v1472_v30  ;;  %1475 = vst [vmem:[%s1453_s9 + $0x4] sm:$0x1] %v1474_v32  ;;  %v1476_v34 = vld [vmem:[%s2082_s6 + $0x3] sm:$0x1] }
 0x496   : > { %v1478_v35 = vld [vmem:[%s2082_s6 + $0x4] sm:$0x1]  ;;  %v1480_v36 = vld [vmem:[%s2082_s6 + $0x5] sm:$0x1]  ;;  %1477 = vst [vmem:[%s1453_s9 + $0x6] sm:$0x1] %v1476_v34 }
 0x497   : > { %1479 = vst [vmem:[%s1453_s9 + $0x8] sm:$0x1] %v1478_v35  ;;  %1481 = vst [vmem:[%s1453_s9 + $0xa] sm:$0x1] %v1480_v36  ;;  %v1482_v37 = vld [vmem:[%s2082_s6 + $0x6] sm:$0x1] }
 0x498   : > { %v1484_v38 = vld [vmem:[%s2082_s6 + $0x7] sm:$0x1]  ;;  %1483 = vst [vmem:[%s1453_s9 + $0xc] sm:$0x1] %v1482_v37 }
 0x499   : > { %1485 = vst [vmem:[%s1453_s9 + $0xe] sm:$0x1] %v1484_v38 }
 0x49a PF: > { %s13_s16 = sadd.s32 1, %s1838_s16   ;;  %s2156_s12 = smov %s1826_s13 }
 0x49b   : > { %p10_p11 = scmp.ge.s32.totalorder %s13_s16, 4   ;;  %s2157_s13 = smov %s1913_s23 }
 0x49c   : > { %s2158_s14 = smov %s1834_s15  ;;  %s2159_s15 = smov %s2161_s17 }
 0x49d   :  { %12 = sbr.rel (!%p10_p11) target bundleno = 3 (0x3), region = 247 }

// kernel: transformer_cross_attn_layer.13
= control target key start
LH: loop header
LB: loop body
LE: loop exit
PB: predicated region body
PF: predicated region fallthrough
CT: control target
= control target key end

     0   :  { %vm34_vm0 = vcmask 261120   ;;  %v301_v14 = vmov 0.0   ;;  %vm302_vm1 = vmmov 0   ;;  %vm162_vm2 = vcmask 257024   ;;  %s408_s0 = inlined_call_operand.vmem [shape: f32[16,32], index: 0, kind: input, shape index: {}]   ;;  %s409_s3 = inlined_call_operand.vmem [shape: bf16[32,32], index: 3, kind: input, shape index: {}]   ;;  %s410_s6 = inlined_call_operand.vmem [shape: bf16[32,32], index: 6, kind: input, shape index: {}]   ;;  %s411_s1 = inlined_call_operand.vmem [shape: f32[1,32], index: 1, kind: input, shape index: {}]   ;;  %s412_s2 = inlined_call_operand.vmem [shape: f32[1,32], index: 2, kind: input, shape index: {}, may-alias: {2,4,7}]   ;;  %s413_s5 = inlined_call_operand.vmem [shape: bf16[16,32], index: 5, kind: input, shape index: {}]   ;;  %s414_s4 = inlined_call_operand.vmem [shape: f32[1,32], index: 4, kind: input, shape index: {}, may-alias: {2,4,7}]   ;;  %s415_s7 = inlined_call_operand.vmem [shape: f32[1,32], index: 7, kind: input, shape index: {}, may-alias: {2,4,7}]   ;;  %s416_s9 = inlined_call_operand.vmem [shape: bf16[16,32], index: 9, kind: output, shape index: {1}]   ;;  %s417_s8 = inlined_call_operand.vmem [shape: bf16[16,32], index: 8, kind: output, shape index: {0}]  }
   0x1   :  { %v32_v0 = vld [vmem:[%s408_s0] sm:$0xff]  ;;  %v33_v1 = vld [vmem:[%s408_s0 + $0x8] sm:$0xff]  ;;  %275 = vmatprep.subr.bf16.mxu0 %v301_v14  ;;  %283 = vmatprep.subr.bf16.mxu1 %v301_v14 }
   0x2   :  { %v35_v2 = vsel %vm34_vm0, %v32_v0, 0.0  ;;  %v38_v3 = vsel %vm34_vm0, %v33_v1, 0.0  ;;  %v293_v15 = vld [vmem:[%s409_s3 + $0x8] sm:$0xff]   ;;  %279 = vmatprep.mubr.msk.bf16.mxu0 %vm302_vm1, %v301_v14  ;;  %287 = vmatprep.mubr.msk.bf16.mxu1 %vm302_vm1, %v301_v14  ;;  %v295_v17 = vld [vmem:[%s409_s3] sm:$0xff]  }
   0x3   :  { %36 = vadd.xlane.f32.xlu0 %v35_v2  ;;  %v294_v16 = vld [vmem:[%s410_s6 + $0x8] sm:$0xff]   ;;  %276 = vmatpush3.bf16.msra.mxu0 %v293_v15  ;;  %v296_v18 = vld [vmem:[%s410_s6] sm:$0xff]  }
   0x4   :  { %284 = vmatpush3.bf16.msra.mxu1 %v294_v16  ;;  %277 = vmatprep.subr.bf16.mxu0 %v301_v14  ;;  %v247_v27 = vld [vmem:[%s411_s1] ss:$0 sm:$0xff] }
   0x5   :  { %285 = vmatprep.subr.bf16.mxu1 %v301_v14  ;;  %v248_v31 = vld [vmem:[%s412_s2] ss:$0 sm:$0xff] }
   0x6   :  { %v266_v36 = vld [vmem:[%s413_s5] sm:$0xff]  }
   0x7   :  { %39 = vadd.xlane.f32.xlu0 %v38_v3  ;;  %278 = vmatpush3.bf16.msra.mxu0 %v295_v17  ;;  %v249_v37 = vld [vmem:[%s414_s4] ss:$0 sm:$0xff]  ;;  %v267_v39 = vunpack.c.l.bf16 %v266_v36  ;;  %v268_v48 = vunpack.c.h.bf16 %v266_v36 }
   0x8   :  { %286 = vmatpush3.bf16.msra.mxu1 %v296_v18  ;;  %v255_v38 = vld [vmem:[%s415_s7] ss:$0 sm:$0xff] }
  0x8c   :  { %v37_v4 = vpop.xlane.xlu0 %36 }
  0x8d   :  { %v42_v5 = vmul.f32 0.03125, %v37_v4 }
  0x8f   :  { %v44_v6 = vsub.f32 %v32_v0, %v42_v5 }
  0x90   :  { %v40_v7 = vpop.xlane.xlu0 %39 }
  0x91   :  { %v43_v8 = vmul.f32 0.03125, %v40_v7  ;;  %v46_v9 = vmul.f32 %v44_v6, %v44_v6 }
  0x93   :  { %v45_v10 = vsub.f32 %v33_v1, %v43_v8  ;;  %v48_v11 = vsel %vm34_vm0, %v46_v9, 0.0 }
  0x94   :  { %49 = vadd.xlane.f32.xlu1 %v48_v11 }
  0x95   :  { %v47_v12 = vmul.f32 %v45_v10, %v45_v10 }
  0x97   :  { %v51_v13 = vsel %vm34_vm0, %v47_v12, 0.0 }
  0x98   :  { %52 = vadd.xlane.f32.xlu1 %v51_v13 }
 0x11d   :  { %v50_v19 = vpop.xlane.xlu1 %49 }
 0x11e   :  { %v54_v20 = vmul.f32 0.03125, %v50_v19 }
 0x120   :  { %v56_v21 = vadd.f32 1e-05, %v54_v20 }
 0x121   :  { %v53_v22 = vpop.xlane.xlu1 %52 }
 0x122   :  { %297 = vrsqrt.f32 %v56_v21  ;;  %v55_v23 = vmul.f32 0.03125, %v53_v22 }
 0x124   :  { %v57_v24 = vadd.f32 1e-05, %v55_v23 }
 0x126   :  { %299 = vrsqrt.f32 %v57_v24 }
 0x12f   :  { %v298_v25 = vpop.eup %297 }
 0x130   :  { %v60_v26 = vmul.f32 %v298_v25, %v44_v6 }
 0x132   :  { %v69_v30 = vmul.f32 %v247_v27, %v60_v26 }
 0x133   :  { %v300_v28 = vpop.eup %299 }
 0x134   :  { %v61_v29 = vmul.f32 %v300_v28, %v45_v10  ;;  %v78_v33 = vadd.f32 %v248_v31, %v69_v30 }
 0x136   :  { %v70_v32 = vmul.f32 %v247_v27, %v61_v29 }
 0x138   :  { %v79_v34 = vadd.f32 %v248_v31, %v70_v32 }
 0x13a   :  { %v80_v35 = vpack.c.bf16 %v79_v34, %v78_v33 }
 0x13c   :  { %280 = vmatmul.mubr.msk.bf16.vlgmr.msra.gmra.mxu0 %vm34_vm0, %v80_v35  ;;  %288 = vmatmul.mubr.msk.bf16.vlgmr.msra.gmra.mxu1 %vm34_vm0, %v80_v35 }
 0x1fc   :  { %v141_v40 = vpop.f32.mrf.mxu0  ;;  %v222_v41 = vpop.f32.mrf.mxu1 }
 0x1fd   :  { %v142_v42 = vadd.f32 %v249_v37, %v141_v40  ;;  %v223_v43 = vadd.f32 %v255_v38, %v222_v41 }
 0x1fe   :  { %v281_v44 = vpop.f32.mrf.mxu0  ;;  %v289_v45 = vpop.f32.mrf.mxu1 }
 0x1ff   :  { %v152_v46 = vadd.f32 %v267_v39, %v142_v42  ;;  %v263_v47 = vpack.c.bf16 %v223_v43, %v223_v43 }
 0x200   :  { %v144_v49 = vpop.f32.mrf.mxu0  ;;  %v225_v50 = vpop.f32.mrf.mxu1 }
 0x201   :  { %v261_v51 = vpack.c.bf16 %v152_v46, %v152_v46  ;;  %237 = vst.msk [vmem:[%s416_s9] sm:$0xf] %vm162_vm2, %v263_v47  ;;  %v145_v52 = vadd.f32 %v249_v37, %v144_v49  ;;  %v226_v53 = vadd.f32 %v255_v38, %v225_v50 }
 0x202   :  { %v282_v54 = vpop.f32.mrf.mxu0  ;;  %v290_v55 = vpop.f32.mrf.mxu1 }
 0x203   :  { %163 = vst.msk [vmem:[%s417_s8] sm:$0xf] %vm162_vm2, %v261_v51  ;;  %v153_v56 = vadd.f32 %v268_v48, %v145_v52  ;;  %v264_v57 = vpack.c.bf16 %v226_v53, %v226_v53 }
 0x205   :  { %v262_v58 = vpack.c.bf16 %v153_v56, %v153_v56  ;;  %238 = vst.msk [vmem:[%s416_s9 + $0x4] sm:$0xf] %vm162_vm2, %v264_v57 }
 0x207   :  { %164 = vst.msk [vmem:[%s417_s8 + $0x4] sm:$0xf] %vm162_vm2, %v262_v58 }

// kernel: transformer_cross_attn_layer.15
= control target key start
LH: loop header
LB: loop body
LE: loop exit
PB: predicated region body
PF: predicated region fallthrough
CT: control target
= control target key end

     0   :  { %v162_v1 = vmov 0.0   ;;  %vm163_vm0 = vmmov 0   ;;  %s216_s0 = inlined_call_operand.vmem [shape: bf16[16,32], index: 0, kind: input, shape index: {}]   ;;  %s217_s1 = inlined_call_operand.vmem [shape: bf16[32,32], index: 1, kind: input, shape index: {}]   ;;  %s218_s2 = inlined_call_operand.vmem [shape: f32[1,32], index: 2, kind: input, shape index: {}]   ;;  %s219_s3 = inlined_call_operand.vmem [shape: f32[16,32], index: 3, kind: input, shape index: {}]   ;;  %s220_s4 = inlined_call_operand.hbm [shape: f32[16,32], index: 4, kind: output, shape index: {}]  }
   0x1   :  { %v137_v0 = vld [vmem:[%s217_s1 + $0x8] sm:$0xff]   ;;  %124 = vmatprep.subr.bf16.mxu0 %v162_v1  ;;  %v138_v2 = vld [vmem:[%s217_s1] sm:$0xff]   ;;  %128 = vmatprep.mubr.msk.bf16.mxu0 %vm163_vm0, %v162_v1 }
   0x2   :  { %125 = vmatpush3.bf16.msra.mxu0 %v137_v0 }
   0x3   :  { %126 = vmatprep.subr.bf16.mxu0 %v162_v1 }
   0x4   :  { %9 = vsyncpa [#allocation3], 0  ;;  %v139_v3 = vld [vmem:[%s216_s0] sm:$0xff]   ;;  %vm49_vm1 = vcmask 261120   ;;  %s164_s1 = smov [#allocation2]   ;;  %v95_v11 = vld [vmem:[%s219_s3 + $0x8] sm:$0xff] }
   0x5   :  { %v116_v4 = vld [vmem:[%s218_s2] ss:$0 sm:$0xff]  ;;  %s105_s25 = sshll.u32 %s164_s1, 4  ;;  %s106_s25 = int_to_ptr.vmem [resolvable:$true] %s105_s25 }
   0x6   :  { %127 = vmatpush3.bf16.msra.mxu0 %v138_v2  ;;  %v94_v6 = vld [vmem:[%s219_s3] sm:$0xff]  ;;  %s140_s2 = scalar_lea.vmem %s106_s25, 256  ;;  %p145_p1 = scmp.lt.s32.totalorder %s106_s25, %s106_s25 }
   0x7   :  { %p141_p0 = scmp.ne.s32.totalorder %s106_s25, %s140_s2  ;;  %p146_p2 = scmp.lt.s32.totalorder %s140_s2, %s140_s2 }
   0x9   :  { %129 = vmatmul.mubr.msk.bf16.vlgmr.msra.gmra.mxu0 %vm49_vm1, %v139_v3  ;;  %p147_p3 = por %p146_p2, %p145_p1 }
   0xb   :  { %p148_p4 = pnand %p147_p3, %p141_p0 }
  0xc9   :  { %v87_v5 = vpop.f32.mrf.mxu0 }
  0xca   :  { %v88_v7 = vadd.f32 %v116_v4, %v87_v5 }
  0xcb   :  { %v130_v8 = vpop.f32.mrf.mxu0 }
  0xcc   :  { %v96_v9 = vadd.f32 %v94_v6, %v88_v7 }
  0xcd   :  { %v90_v10 = vpop.f32.mrf.mxu0 }
  0xce   :  { %98 = vst.msk [vmem:[#allocation2] sm:$0xff] %vm49_vm1, %v96_v9  ;;  %v91_v12 = vadd.f32 %v116_v4, %v90_v10 }
  0xcf   :  { %v131_v13 = vpop.f32.mrf.mxu0 }
  0xd0   :  { %v97_v14 = vadd.f32 %v95_v11, %v91_v12 }
  0xd2   :  { %99 = vst.msk [vmem:[#allocation2 + $0x8] sm:$0xff] %vm49_vm1, %v97_v14 }
  0xd3   :  { %151 = shalt.err (!%p148_p4)
}
  0xd4   :  { %s165_s27 = smov 128   ;;  %s166_s28 = smov 8  }
  0xd5   :  { %111 = dma.vmem_to_hbm [thread:$0]  %s106_s25, 256, %s220_s4, [#allocation3], %s165_s27, %s165_s27, %s166_s28  }
  0xd6   :  { %160 = dma.done.wait [#allocation3], 256  }
  0xd7   :  { %161 = vsyncadd [#allocation3], 4294967040 }
  0xd8   :  { %115 = vsyncpa [#allocation3], 1 }

// kernel: transformer_cross_attn_layer.14
= control target key start
LH: loop header
LB: loop body
LE: loop exit
PB: predicated region body
PF: predicated region fallthrough
CT: control target
= control target key end

     0   :  { %10 = vsyncpa [#allocation7], 0  ;;  %s2367_s0 = inlined_call_operand.vmem [shape: bf16[8,2,1,32], index: 0, kind: input, shape index: {}]   ;;  %s2368_s1 = inlined_call_operand.vmem [shape: bf16[8,2,1,32], index: 1, kind: input, shape index: {}]   ;;  %s2369_s2 = inlined_call_operand.vmem [shape: bf16[8,2,1,32], index: 2, kind: input, shape index: {}]   ;;  %s2370_s3 = inlined_call_operand.vmem [shape: bf16[8,2,1,32], index: 3, kind: output, shape index: {0}]   ;;  %s2371_s4 = inlined_call_operand.hbm [shape: f32[2,8,8], index: 4, kind: output, shape index: {1}]  }
   0x1   :  { %12 = vsyncpa [#allocation7 + $0x1], 0  ;;  %s2036_s15 = smov 0   ;;  %s2038_s16 = smov 0  }
   0x2   :  { %s2040_s17 = smov 0   ;;  %s2042_s18 = smov 0  }
   0x3   :  { %s2044_s19 = smov 0   ;;  %s2046_s20 = smov 0  }
   0x4 LB: > { %s1729_s21 = sadd.s32 4294967295, %s1999_s20   ;;  %s1730_s22 = sadd.s32 4294967294, %s1999_s20   ;;  %s1999_s20 = sphi %s2046_s20, %s18_s20   ;;  %s1995_s19 = sphi %s2044_s19, %s2383_s19   ;;  %s1991_s18 = sphi %s2042_s18, %s2382_s18   ;;  %s1987_s17 = sphi %s2040_s17, %s2381_s17   ;;  %s1983_s16 = sphi %s2038_s16, %s2380_s16   ;;  %s1979_s15 = sphi %s2036_s15, %s2379_s15  }
   0x5   : > { %s30_s23 = sadd.s32 1, %s1995_s19  ;;  %s39_s24 = sadd.s32 1, %s1987_s17 }
   0x6   : > { %p32_p0 = scmp.ge.s32.totalorder %s30_s23, 2  ;;  %p46_p1 = scmp.ne.s32.totalorder %s1987_s17, %s1983_s16 }
   0x7   : > { %p47_p2 = scmp.eq.s32.totalorder %s1999_s20, 0  ;;  %p130_p3 = scmp.eq.s32.totalorder %s1729_s21, 1 }
   0x8   : > { %s2385_s23 = smov (%p32_p0, %s30_s23), 0  ;;  %p163_p6 = scmp.ne.s32.totalorder %s1983_s16, %s1979_s15 }
   0x9   : > { %p2075_p4 = por %p47_p2, %p46_p1  ;;  %p2079_p5 = por %p130_p3, %p46_p1 }
   0xa   : > { %s35_s27 = ssub.s32 %s1995_s19, %s2385_s23  ;;  %p164_p8 = scmp.eq.s32.totalorder %s1730_s22, 1 }
   0xb   : > { %p37_p7 = scmp.eq.s32.totalorder %s35_s27, 0  ;;  %p2372_p10 = scmp.ge.s32.totalorder %s1999_s20, 2 }
   0xc   : > { %p2090_p9 = por %p164_p8, %p163_p6 }
   0xd   : > { %s2088_s28 = scalar_select %p37_p7, %s1987_s17, %s39_s24  }
   0xe   : > { %180 = sbr.rel (%p2372_p10) target bundleno = 43 (0x2b), region = 16 }
  0x13   : > { %183 = sbr.rel (!%p2075_p4) target bundleno = 27 (0x1b), region = 20  ;;  %s185_s30 = sand.u32 (%p2075_p4), 1, %s1987_s17  }
  0x14   : > { %s191_s7 = scalar_lea.vmem (%p2075_p4), %s2367_s0, %s1995_s19  ;;  %s1733_s8 = sshll.u32 (%p2075_p4), %s185_s30, 3 }
  0x15   : > { %v208_v0 = vld [vmem:[%s191_s7] sm:$0x1] (%p2075_p4)  ;;  %v210_v1 = vld [vmem:[%s191_s7 + $0x2] sm:$0x1] (%p2075_p4)  ;;  %v212_v2 = vld [vmem:[%s191_s7 + $0x4] sm:$0x1] (%p2075_p4) }
  0x16   : > { %v214_v3 = vld [vmem:[%s191_s7 + $0x6] sm:$0x1] (%p2075_p4)  ;;  %s187_s9 = scalar_lea.vmem (%p2075_p4), [#allocation2], %s1733_s8  ;;  %v216_v4 = vld [vmem:[%s191_s7 + $0x8] sm:$0x1] (%p2075_p4) }
  0x17   : > { %209 = vst [vmem:[%s187_s9] sm:$0x1] (%p2075_p4), %v208_v0  ;;  %211 = vst [vmem:[%s187_s9 + $0x1] sm:$0x1] (%p2075_p4), %v210_v1  ;;  %v218_v5 = vld [vmem:[%s191_s7 + $0xa] sm:$0x1] (%p2075_p4) }
  0x18   : > { %213 = vst [vmem:[%s187_s9 + $0x2] sm:$0x1] %v212_v2  ;;  %215 = vst [vmem:[%s187_s9 + $0x3] sm:$0x1] %v214_v3  ;;  %v220_v6 = vld [vmem:[%s191_s7 + $0xc] sm:$0x1] }
  0x19   : > { %217 = vst [vmem:[%s187_s9 + $0x4] sm:$0x1] %v216_v4  ;;  %219 = vst [vmem:[%s187_s9 + $0x5] sm:$0x1] %v218_v5  ;;  %v222_v7 = vld [vmem:[%s191_s7 + $0xe] sm:$0x1] }
  0x1a   : > { %221 = vst [vmem:[%s187_s9 + $0x6] sm:$0x1] %v220_v6  ;;  %223 = vst [vmem:[%s187_s9 + $0x7] sm:$0x1] %v222_v7 }
  0x1b PF: > { %263 = sbr.rel (!%p2075_p4) target bundleno = 35 (0x23), region = 61  ;;  %s265_s10 = sand.u32 (%p2075_p4), 1, %s1987_s17  }
  0x1c   : > { %s268_s13 = scalar_lea.vmem (%p2075_p4), %s2368_s1, %s1995_s19  ;;  %s1734_s14 = sshll.u32 (%p2075_p4), %s265_s10, 3 }
  0x1d   : > { %v285_v8 = vld [vmem:[%s268_s13] sm:$0x1] (%p2075_p4)  ;;  %v287_v9 = vld [vmem:[%s268_s13 + $0x2] sm:$0x1] (%p2075_p4)  ;;  %v289_v10 = vld [vmem:[%s268_s13 + $0x4] sm:$0x1] (%p2075_p4) }
  0x1e   : > { %v291_v11 = vld [vmem:[%s268_s13 + $0x6] sm:$0x1] (%p2075_p4)  ;;  %s267_s21 = scalar_lea.vmem (%p2075_p4), [#allocation3], %s1734_s14  ;;  %v293_v12 = vld [vmem:[%s268_s13 + $0x8] sm:$0x1] (%p2075_p4) }
  0x1f   : > { %286 = vst [vmem:[%s267_s21] sm:$0x1] (%p2075_p4), %v285_v8  ;;  %288 = vst [vmem:[%s267_s21 + $0x1] sm:$0x1] (%p2075_p4), %v287_v9  ;;  %v295_v13 = vld [vmem:[%s268_s13 + $0xa] sm:$0x1] (%p2075_p4) }
  0x20   : > { %290 = vst [vmem:[%s267_s21 + $0x2] sm:$0x1] %v289_v10  ;;  %292 = vst [vmem:[%s267_s21 + $0x3] sm:$0x1] %v291_v11  ;;  %v297_v14 = vld [vmem:[%s268_s13 + $0xc] sm:$0x1] }
  0x21   : > { %294 = vst [vmem:[%s267_s21 + $0x4] sm:$0x1] %v293_v12  ;;  %296 = vst [vmem:[%s267_s21 + $0x5] sm:$0x1] %v295_v13  ;;  %v299_v15 = vld [vmem:[%s268_s13 + $0xe] sm:$0x1] }
  0x22   : > { %298 = vst [vmem:[%s267_s21 + $0x6] sm:$0x1] %v297_v14  ;;  %300 = vst [vmem:[%s267_s21 + $0x7] sm:$0x1] %v299_v15 }
  0x23 PF: > { %340 = sbr.rel (!%p2075_p4) target bundleno = 43 (0x2b), region = 102  ;;  %s342_s22 = sand.u32 (%p2075_p4), 1, %s1987_s17  }
  0x24   : > { %s345_s30 = scalar_lea.vmem (%p2075_p4), %s2369_s2, %s1995_s19  ;;  %s1735_s5 = sshll.u32 (%p2075_p4), %s342_s22, 3 }
  0x25   : > { %v362_v16 = vld [vmem:[%s345_s30] sm:$0x1] (%p2075_p4)  ;;  %v364_v17 = vld [vmem:[%s345_s30 + $0x2] sm:$0x1] (%p2075_p4)  ;;  %v366_v18 = vld [vmem:[%s345_s30 + $0x4] sm:$0x1] (%p2075_p4) }
  0x26   : > { %v368_v19 = vld [vmem:[%s345_s30 + $0x6] sm:$0x1] (%p2075_p4)  ;;  %s344_s6 = scalar_lea.vmem (%p2075_p4), [#allocation4], %s1735_s5  ;;  %v370_v20 = vld [vmem:[%s345_s30 + $0x8] sm:$0x1] (%p2075_p4) }
  0x27   : > { %363 = vst [vmem:[%s344_s6] sm:$0x1] (%p2075_p4), %v362_v16  ;;  %365 = vst [vmem:[%s344_s6 + $0x1] sm:$0x1] (%p2075_p4), %v364_v17  ;;  %v372_v21 = vld [vmem:[%s345_s30 + $0xa] sm:$0x1] (%p2075_p4) }
  0x28   : > { %367 = vst [vmem:[%s344_s6 + $0x2] sm:$0x1] %v366_v18  ;;  %369 = vst [vmem:[%s344_s6 + $0x3] sm:$0x1] %v368_v19  ;;  %v374_v22 = vld [vmem:[%s345_s30 + $0xc] sm:$0x1] }
  0x29   : > { %371 = vst [vmem:[%s344_s6 + $0x4] sm:$0x1] %v370_v20  ;;  %373 = vst [vmem:[%s344_s6 + $0x5] sm:$0x1] %v372_v21  ;;  %v376_v23 = vld [vmem:[%s345_s30 + $0xe] sm:$0x1] }
  0x2a   : > { %375 = vst [vmem:[%s344_s6 + $0x6] sm:$0x1] %v374_v22  ;;  %377 = vst [vmem:[%s344_s6 + $0x7] sm:$0x1] %v376_v23 }
  0x2b PF: > { %p1736_p11 = scmp.ge.s32.totalorder %s1999_s20, 1  ;;  %p416_p12 = scmp.lt.s32.totalorder %s1999_s20, 3 }
  0x2d   : > { %p417_p13 = pnand %p1736_p11, %p416_p12 }
  0x2e   : > { %s423_s25 = sand.u32 (!%p417_p13), 1, %s1983_s16   ;;  %s2004_s10 = smov (!%p417_p13), 120  }
  0x2f   : > { %420 = sbr.rel (%p417_p13) target bundleno = 1204 (0x4b4), region = 143  ;;  %s2124_s7 = sshll.u32 (!%p417_p13), %s423_s25, 3 }
  0x30   : > { %s432_s8 = scalar_lea.vmem (!%p417_p13), [#allocation3], %s2124_s7  ;;  %s2143_s9 = scalar_lea.vmem (!%p417_p13), [#allocation2], %s2124_s7 }
  0x31   : > { %s2005_s11 = smov (!%p417_p13), 112   ;;  %s2006_s12 = smov (!%p417_p13), 104  }
  0x32   : > { %s439_s13 = scalar_lea.vmem (!%p417_p13), [#allocation4], %s2124_s7  ;;  %s2007_s14 = smov (!%p417_p13), 8  }
  0x33   : > { %s2008_s21 = smov (!%p417_p13), 16   ;;  %s473_s22 = scalar_lea.vmem (!%p417_p13), [#allocation6], %s2124_s7 }
  0x34   : > { %v519_v24 = vlaneseq  ;;  %v2001_v25 = vmov 0.0   ;;  %v2002_v26 = vmov 1966171168   ;;  %vm2003_vm0 = vmmov 0   ;;  %s2009_s24 = smov 24   ;;  %s2270_s27 = scalar_lea.vmem [#allocation5], %s2124_s7 }
  0x35   : > { %1795 = vmatprep.subr.bf16.mxu0 %v2001_v25  ;;  %v517_v27 = vunpack.c.l.s4 %v2002_v26  ;;  %1801 = vmatprep.subr.bf16.mxu1 %v2001_v25  ;;  %v1750_v29 = vld.sshfl [vmem:[%s432_s8] sm:$0x1 pattern:$0x75316420]  ;;  %vm630_vm1 = vcmask 1041409   ;;  %vm633_vm2 = vcmask 1042434  }
  0x36   : > { %v520_v28 = vshrl.u32 %v519_v24, 7  ;;  %v1751_v31 = vld.sshfl [vmem:[%s432_s8 + $0x1] sm:$0x1 pattern:$0x75316420]  ;;  %1797 = vmatprep.mubr.msk.bf16.mxu0 %vm2003_vm0, %v2001_v25  ;;  %1803 = vmatprep.mubr.msk.bf16.mxu1 %vm2003_vm0, %v2001_v25  ;;  %vm636_vm3 = vcmask 1043459  }
  0x37   : > { %v518_v30 = vunpack.c.0.s8 %v517_v27  ;;  %v1752_v32 = vld.sshfl [vmem:[%s432_s8 + $0x2] sm:$0x1 pattern:$0x75316420]  ;;  %vm639_vm4 = vcmask 1044484   ;;  %vm642_vm5 = vcmask 1045509  }
  0x38   : > { %v1753_v34 = vld.sshfl [vmem:[%s432_s8 + $0x3] sm:$0x1 pattern:$0x75316420]  ;;  %vm645_vm6 = vcmask 1046534   ;;  %vm648_vm7 = vcmask 1047559  }
  0x39   : > { %v2132_v33 = vsub.s32 %v518_v30, %v520_v28  ;;  %v1754_v35 = vld.sshfl [vmem:[%s432_s8 + $0x4] sm:$0x1 pattern:$0x75316420]  ;;  %vm794_vm8 = vcmask 64512   ;;  %vm999_vm9 = vcmask 1043456  }
  0x3a   : > { %v1755_v40 = vld.sshfl [vmem:[%s432_s8 + $0x5] sm:$0x1 pattern:$0x75316420]  ;;  %vm1397_vm10 = vcmask 130048   ;;  %vm1399_vm11 = vcmask 195584  }
  0x3b   : > { %v672_v36 = vrot.slane %v1750_v29, %v2132_v33  ;;  %v686_v37 = vrot.slane %v1751_v31, %v2132_v33  ;;  %v700_v38 = vrot.slane %v1752_v32, %v2132_v33  ;;  %v714_v39 = vrot.slane %v1753_v34, %v2132_v33  ;;  %v1756_v42 = vld.sshfl [vmem:[%s432_s8 + $0x6] sm:$0x1 pattern:$0x75316420]  ;;  %s2309_s30 = scalar_lea.sflag [#allocation7], %s423_s25 }
  0x3c   : > { %v728_v41 = vrot.slane %v1754_v35, %v2132_v33  ;;  %v742_v43 = vrot.slane %v1755_v40, %v2132_v33  ;;  %v1757_v47 = vld.sshfl [vmem:[%s432_s8 + $0x7] sm:$0x1 pattern:$0x75316420]  ;;  %v756_v48 = vrot.slane %v1756_v42, %v2132_v33  ;;  %vm1467_vm12 = vcmask 253952   ;;  %s1511_s8 = scalar_lea.vmem (%p2079_p5), %s2370_s3, %s1991_s18 }
  0x3d   : > { %v771_v44 = vunpack.c.l.b16 %v672_v36  ;;  %v772_v45 = vunpack.c.l.b16 %v686_v37  ;;  %v773_v46 = vunpack.c.l.b16 %v700_v38  ;;  %v774_v49 = vunpack.c.l.b16 %v714_v39  ;;  %v1742_v55 = vld.sshfl [vmem:[%s2143_s9] sm:$0x1 pattern:$0x75316420] }
  0x3e   : > { %v775_v50 = vunpack.c.l.b16 %v728_v41  ;;  %v770_v51 = vrot.slane %v1757_v47, %v2132_v33  ;;  %v776_v52 = vunpack.c.l.b16 %v742_v43  ;;  %v777_v56 = vunpack.c.l.b16 %v756_v48  ;;  %v1743_v59 = vld.sshfl [vmem:[%s2143_s9 + $0x1] sm:$0x1 pattern:$0x75316420] }
  0x3f   : > { %v779_v53 = vrot.slane %v772_v45, 7  ;;  %v781_v54 = vrot.slane %v773_v46, 6  ;;  %v783_v57 = vrot.slane %v774_v49, 5  ;;  %v522_v60 = vrot.slane %v1742_v55, %v2132_v33 }
  0x40   : > { %v785_v58 = vrot.slane %v775_v50, 4  ;;  %v778_v61 = vunpack.c.l.b16 %v770_v51  ;;  %v787_v63 = vrot.slane %v776_v52, 3  ;;  %v1744_v0 = vld.sshfl [vmem:[%s2143_s9 + $0x2] sm:$0x1 pattern:$0x75316420]  ;;  %v536_v1 = vrot.slane %v1743_v59, %v2132_v33 }
  0x41   : > { %v780_v62 = vsel %vm630_vm1, %v779_v53, %v771_v44  ;;  %v789_v3 = vrot.slane %v777_v56, 2  ;;  %v1745_v4 = vld.sshfl [vmem:[%s2143_s9 + $0x3] sm:$0x1 pattern:$0x75316420]  ;;  %v550_v5 = vrot.slane %v1744_v0, %v2132_v33  ;;  %v621_v6 = vunpack.c.l.b16 %v522_v60 }
  0x42   : > { %v782_v2 = vsel %vm633_vm2, %v781_v54, %v780_v62  ;;  %v791_v8 = vrot.slane %v778_v61, 1  ;;  %v1746_v9 = vld.sshfl [vmem:[%s2143_s9 + $0x4] sm:$0x1 pattern:$0x75316420]  ;;  %v564_v10 = vrot.slane %v1745_v4, %v2132_v33  ;;  %v622_v11 = vunpack.c.l.b16 %v536_v1 }
  0x43   : > { %v784_v7 = vsel %vm636_vm3, %v783_v57, %v782_v2  ;;  %v1747_v13 = vld.sshfl [vmem:[%s2143_s9 + $0x5] sm:$0x1 pattern:$0x75316420]  ;;  %v578_v14 = vrot.slane %v1746_v9, %v2132_v33  ;;  %v623_v15 = vunpack.c.l.b16 %v550_v5  ;;  %vm1468_vm13 = vsmask.f32 256 }
  0x44   : > { %v786_v12 = vsel %vm639_vm4, %v785_v58, %v784_v7  ;;  %v1748_v17 = vld.sshfl [vmem:[%s2143_s9 + $0x6] sm:$0x1 pattern:$0x75316420]  ;;  %v592_v18 = vrot.slane %v1747_v13, %v2132_v33  ;;  %v624_v19 = vunpack.c.l.b16 %v564_v10  ;;  %v629_v20 = vrot.slane %v622_v11, 7  ;;  %vm2265_vm14 = vmand %vm1467_vm12, %vm1468_vm13 }
  0x45   : > { %v788_v16 = vsel %vm642_vm5, %v787_v63, %v786_v12  ;;  %v1749_v22 = vld.sshfl [vmem:[%s2143_s9 + $0x7] sm:$0x1 pattern:$0x75316420]  ;;  %v606_v23 = vrot.slane %v1748_v17, %v2132_v33  ;;  %v625_v24 = vunpack.c.l.b16 %v578_v14  ;;  %v632_v26 = vrot.slane %v623_v15, 6 }
  0x46   : > { %v790_v21 = vsel %vm645_vm6, %v789_v3, %v788_v16  ;;  %v620_v28 = vrot.slane %v1749_v22, %v2132_v33  ;;  %v626_v29 = vunpack.c.l.b16 %v592_v18  ;;  %v631_v30 = vsel %vm630_vm1, %v629_v20, %v621_v6  ;;  %v1760_v53 = vld.sshfl [vmem:[%s439_s13 + $0x1] sm:$0x1 pattern:$0x75316420] }
  0x47   : > { %v792_v27 = vsel %vm648_vm7, %v791_v8, %v790_v21  ;;  %v627_v32 = vunpack.c.l.b16 %v606_v23  ;;  %v634_v34 = vsel %vm633_vm2, %v632_v26, %v631_v30  ;;  %v635_v35 = vrot.slane %v624_v19, 5  ;;  %v1761_v54 = vld.sshfl [vmem:[%s439_s13 + $0x2] sm:$0x1 pattern:$0x75316420] }
  0x48   : > { %v2169_v31 = vpack.c.b16 %v792_v27, %v792_v27  ;;  %v628_v36 = vunpack.c.l.b16 %v620_v28  ;;  %v638_v37 = vrot.slane %v625_v24, 4  ;;  %v641_v38 = vrot.slane %v626_v29, 3  ;;  %v1759_v56 = vld.sshfl [vmem:[%s439_s13] sm:$0x1 pattern:$0x75316420] }
  0x49   : > { %v637_v40 = vsel %vm636_vm3, %v635_v35, %v634_v34  ;;  %v644_v41 = vrot.slane %v627_v32, 2  ;;  %v888_v55 = vrot.slane %v1760_v53, %v2132_v33  ;;  %v902_v57 = vrot.slane %v1761_v54, %v2132_v33  ;;  %v1762_v58 = vld.sshfl [vmem:[%s439_s13 + $0x3] sm:$0x1 pattern:$0x75316420] }
  0x4a   : > { %v799_v39 = vsel %vm794_vm8, %v2169_v31, 0  ;;  %v640_v42 = vsel %vm639_vm4, %v638_v37, %v637_v40  ;;  %v647_v43 = vrot.slane %v628_v36, 1  ;;  %v874_v59 = vrot.slane %v1759_v56, %v2132_v33  ;;  %v1763_v61 = vld.sshfl [vmem:[%s439_s13 + $0x4] sm:$0x1 pattern:$0x75316420] }
  0x4b   : > { %1796 = vmatpush3.bf16.xpose.msra.mxu0 %v799_v39  ;;  %v643_v44 = vsel %vm642_vm5, %v641_v38, %v640_v42  ;;  %v974_v60 = vunpack.c.l.b16 %v888_v55  ;;  %v916_v62 = vrot.slane %v1762_v58, %v2132_v33  ;;  %v975_v63 = vunpack.c.l.b16 %v902_v57  ;;  %v1764_v0 = vld.sshfl [vmem:[%s439_s13 + $0x5] sm:$0x1 pattern:$0x75316420] }
  0x4c   : > { %1813 = vmatprep.subr.bf16.mxu0 %v2001_v25  ;;  %v646_v45 = vsel %vm645_vm6, %v644_v41, %v643_v44  ;;  %v930_v1 = vrot.slane %v1763_v61, %v2132_v33  ;;  %v973_v2 = vunpack.c.l.b16 %v874_v59  ;;  %v1765_v4 = vld.sshfl [vmem:[%s439_s13 + $0x6] sm:$0x1 pattern:$0x75316420]  ;;  %v944_v5 = vrot.slane %v1764_v0, %v2132_v33 }
  0x4d   : > { %v649_v46 = vsel %vm648_vm7, %v647_v43, %v646_v45  ;;  %v981_v3 = vrot.slane %v974_v60, 7  ;;  %v976_v6 = vunpack.c.l.b16 %v916_v62  ;;  %v983_v7 = vrot.slane %v975_v63, 6  ;;  %v1766_v8 = vld.sshfl [vmem:[%s439_s13 + $0x7] sm:$0x1 pattern:$0x75316420] }
  0x4e   : > { %v650_v47 = vpack.c.b16 %v649_v46, %v649_v46  ;;  %v958_v9 = vrot.slane %v1765_v4, %v2132_v33  ;;  %v977_v10 = vunpack.c.l.b16 %v930_v1  ;;  %v972_v12 = vrot.slane %v1766_v8, %v2132_v33 }
  0x4f   : > { %v982_v11 = vsel %vm630_vm1, %v981_v3, %v973_v2  ;;  %v978_v13 = vunpack.c.l.b16 %v944_v5  ;;  %v985_v15 = vrot.slane %v976_v6, 5 }
  0x50   : > { %1045 = vrot.lane.b32.xlu1 %v650_v47, %s2004_s10  ;;  %v984_v14 = vsel %vm633_vm2, %v983_v7, %v982_v11  ;;  %v979_v16 = vunpack.c.l.b16 %v958_v9  ;;  %v987_v17 = vrot.slane %v977_v10, 4  ;;  %v980_v18 = vunpack.c.l.b16 %v972_v12 }
  0x51   : > { %v986_v19 = vsel %vm636_vm3, %v985_v15, %v984_v14  ;;  %v989_v20 = vrot.slane %v978_v13, 3 }
  0x52   : > { %1798 = vmatmul.mubr.msk.bf16.vlgmr.msra.gmra.mxu0 %vm794_vm8, %v650_v47  ;;  %v988_v21 = vsel %vm639_vm4, %v987_v17, %v986_v19  ;;  %v991_v22 = vrot.slane %v979_v16, 2  ;;  %v993_v24 = vrot.slane %v980_v18, 1 }
  0x53   : > { %1815 = vmatprep.mubr.msk.bf16.mxu0 %vm2003_vm0, %v2001_v25  ;;  %v990_v23 = vsel %vm642_vm5, %v989_v20, %v988_v21 }
  0x54   : > { %1160 = vrot.lane.b32.xlu1 %v2169_v31, %s2005_s11  ;;  %v992_v26 = vsel %vm645_vm6, %v991_v22, %v990_v23 }
  0x55   : > { %v994_v27 = vsel %vm648_vm7, %v993_v24, %v992_v26 }
  0x56   : > { %v995_v28 = vpack.c.b16 %v994_v27, %v994_v27 }
  0x58   : > { %1158 = vrot.lane.b32.xlu1 %v650_v47, %s2005_s11  ;;  %v1001_v29 = vsel %vm999_vm9, %v995_v28, 0 }
  0x59   : > { %1802 = vmatpush3.bf16.msra.mxu1 %v1001_v29 }
  0x5a   : > { %1807 = vmatprep.subr.bf16.mxu1 %v2001_v25 }
  0x5c   : > { %1273 = vrot.lane.b32.xlu1 %v2169_v31, %s2006_s12 }
  0x60   : > { %1271 = vrot.lane.b32.xlu1 %v650_v47, %s2006_s12 }
  0xc2   : > { %v1046_v36 = vpop.permute.xlu1 %1045 }
  0xc6   : > { %v1161_v39 = vpop.permute.xlu1 %1160 }
  0xc7   : > { %v1166_v40 = vsel %vm794_vm8, %v1161_v39, 0 }
  0xca   : > { %v1159_v41 = vpop.permute.xlu1 %1158 }
  0xce   : > { %v1274_v42 = vpop.permute.xlu1 %1273 }
  0xcf   : > { %v1279_v43 = vsel %vm794_vm8, %v1274_v42, 0 }
  0xd2   : > { %v1272_v44 = vpop.permute.xlu1 %1271 }
 0x112   : > { %v835_v48 = vpop.f32.mrf.mxu0 }
 0x113   : > { %v841_v49 = vsel %vm794_vm8, %v835_v48, -inf }
 0x114   : > { %842 = vmax.xlane.f32.xlu0 %v841_v49  ;;  %v1799_v50 = vpop.f32.mrf.mxu0 }
 0x116   : > { %v838_v51 = vpop.f32.mrf.mxu0 }
 0x118   : > { %v1800_v52 = vpop.f32.mrf.mxu0 }
 0x12a   : > { %1047 = vrot.lane.b32.xlu0 %v2169_v31, %s2004_s10 }
 0x19d   : > { %v843_v30 = vpop.xlane.xlu0 %842 }
 0x19e   : > { %v844_v32 = vsub.f32 %v835_v48, %v843_v30 }
 0x1a0   : > { %v845_v34 = vmul.f32 1.442695, %v844_v32 }
 0x1a1   : > { %v1048_v35 = vpop.permute.xlu0 %1047 }
 0x1a2   : > { %1907 = vpow2.f32 %v845_v34  ;;  %v1053_v37 = vsel %vm794_vm8, %v1048_v35, 0 }
 0x1af   : > { %v2211_v31 = vpop.eup %1907 }
 0x1b0   : > { %v852_v38 = vpack.c.bf16 %v2211_v31, %v2211_v31  ;;  %v847_v24 = vsel %vm794_vm8, %v2211_v31, 0.0 }
 0x1b2   : > { %1804 = vmatmul.mubr.msk.bf16.vlgmr.msra.gmra.mxu1 %vm794_vm8, %v852_v38 }
 0x1b3   : > { %1808 = vmatpush3.bf16.xpose.msra.mxu1 %v1053_v37  ;;  %1809 = vmatprep.mubr.msk.bf16.mxu1 %vm2003_vm0, %v2001_v25 }
 0x1b4   : > { %1819 = vmatprep.subr.bf16.mxu1 %v2001_v25 }
 0x1ba   : > { %1810 = vmatmul.mubr.msk.bf16.vlgmr.msra.gmra.mxu1 %vm794_vm8, %v1046_v36 }
 0x1bb   : > { %1820 = vmatpush3.bf16.xpose.msra.mxu1 %v1166_v40  ;;  %1821 = vmatprep.mubr.msk.bf16.mxu1 %vm2003_vm0, %v2001_v25 }
 0x1bc   : > { %1831 = vmatprep.subr.bf16.mxu1 %v2001_v25 }
 0x1c2   : > { %1822 = vmatmul.mubr.msk.bf16.vlgmr.msra.gmra.mxu1 %vm794_vm8, %v1159_v41 }
 0x1c3   : > { %1832 = vmatpush3.bf16.xpose.msra.mxu1 %v1279_v43  ;;  %1833 = vmatprep.mubr.msk.bf16.mxu1 %vm2003_vm0, %v2001_v25 }
 0x1ca   : > { %1834 = vmatmul.mubr.msk.bf16.vlgmr.msra.gmra.mxu1 %vm794_vm8, %v1272_v44 }
 0x272   : > { %v2230_v45 = vpop.f32.mrf.mxu1 }
 0x274   : > { %v1805_v46 = vpop.f32.mrf.mxu1 }
 0x276   : > { %v1040_v47 = vpop.f32.mrf.mxu1 }
 0x278   : > { %v1806_v48 = vpop.f32.mrf.mxu1 }
 0x27a   : > { %v1089_v49 = vpop.f32.mrf.mxu1 }
 0x27b   : > { %v1095_v50 = vsel %vm794_vm8, %v1089_v49, -inf }
 0x27c   : > { %1096 = vmax.xlane.f32.xlu1 %v1095_v50  ;;  %v1811_v51 = vpop.f32.mrf.mxu1 }
 0x27e   : > { %v1092_v52 = vpop.f32.mrf.mxu1 }
 0x280   : > { %v1812_v53 = vpop.f32.mrf.mxu1 }
 0x282   : > { %v1202_v54 = vpop.f32.mrf.mxu1 }
 0x283   : > { %v1208_v55 = vsel %vm794_vm8, %v1202_v54, -inf }
 0x284   : > { %1209 = vmax.xlane.f32.xlu0 %v1208_v55  ;;  %v1823_v56 = vpop.f32.mrf.mxu1 }
 0x286   : > { %v1205_v57 = vpop.f32.mrf.mxu1 }
 0x288   : > { %v1824_v58 = vpop.f32.mrf.mxu1 }
 0x28a   : > { %v1315_v59 = vpop.f32.mrf.mxu1 }
 0x28b   : > { %v1321_v63 = vsel %vm794_vm8, %v1315_v59, -inf }
 0x28c   : > { %v1835_v60 = vpop.f32.mrf.mxu1 }
 0x28d   : > { %1220 = vrot.lane.b32.xlu1 %v995_v28, %s2005_s11 }
 0x28e   : > { %v1318_v61 = vpop.f32.mrf.mxu1 }
 0x290   : > { %v1836_v62 = vpop.f32.mrf.mxu1 }
 0x29a   : > { %1107 = vrot.lane.b32.xlu0 %v995_v28, %s2004_s10 }
 0x2b1   : > { %1322 = vmax.xlane.f32.xlu1 %v1321_v63 }
 0x2c2   : > { %1333 = vrot.lane.b32.xlu1 %v995_v28, %s2006_s12 }
 0x305   : > { %v1097_v0 = vpop.xlane.xlu1 %1096 }
 0x306   : > { %v1098_v1 = vsub.f32 %v1089_v49, %v1097_v0 }
 0x308   : > { %v1099_v2 = vmul.f32 1.442695, %v1098_v1 }
 0x309   : > { %v1221_v9 = vpop.permute.xlu1 %1220 }
 0x30a   : > { %1909 = vpow2.f32 %v1099_v2  ;;  %v1226_v12 = vsel %vm999_vm9, %v1221_v9, 0 }
 0x30d   : > { %v1210_v3 = vpop.xlane.xlu0 %1209 }
 0x30e   : > { %v1211_v4 = vsub.f32 %v1202_v54, %v1210_v3 }
 0x310   : > { %v1212_v5 = vmul.f32 1.442695, %v1211_v4 }
 0x311   : > { %v1108_v6 = vpop.permute.xlu0 %1107 }
 0x312   : > { %1911 = vpow2.f32 %v1212_v5  ;;  %v1113_v7 = vsel %vm999_vm9, %v1108_v6, 0  ;;  %v1470_v6 = vld [vmem:[%s2270_s27] sm:$0x1] }
 0x313   : > { %1814 = vmatpush3.bf16.msra.mxu0 %v1113_v7 }
 0x314   : > { %1825 = vmatprep.subr.bf16.mxu0 %v2001_v25 }
 0x317   : > { %v1910_v8 = vpop.eup %1909 }
 0x318   : > { %v1101_v10 = vsel %vm794_vm8, %v1910_v8, 0.0  ;;  %v1106_v11 = vpack.c.bf16 %v1910_v8, %v1910_v8 }
 0x319   : > { %1102 = vadd.xlane.f32.xlu0 %v1101_v10 }
 0x31a   : > { %1816 = vmatmul.mubr.msk.bf16.vlgmr.msra.gmra.mxu0 %vm794_vm8, %v1106_v11 }
 0x31b   : > { %1826 = vmatpush3.bf16.msra.mxu0 %v1226_v12  ;;  %1827 = vmatprep.mubr.msk.bf16.mxu0 %vm2003_vm0, %v2001_v25  ;;  %v1473_v12 = vld [vmem:[%s2270_s27 + $0x1] sm:$0x1] }
 0x31c   : > { %1837 = vmatprep.subr.bf16.mxu0 %v2001_v25 }
 0x31f   : > { %v1912_v13 = vpop.eup %1911 }
 0x320   : > { %v1214_v14 = vsel %vm794_vm8, %v1912_v13, 0.0  ;;  %v1219_v15 = vpack.c.bf16 %v1912_v13, %v1912_v13 }
 0x321   : > { %1215 = vadd.xlane.f32.xlu1 %v1214_v14  ;;  %v1482_v14 = vld [vmem:[%s2270_s27 + $0x4] sm:$0x1] }
 0x322   : > { %1828 = vmatmul.mubr.msk.bf16.vlgmr.msra.gmra.mxu0 %vm794_vm8, %v1219_v15 }
 0x323   : > { %1839 = vmatprep.mubr.msk.bf16.mxu0 %vm2003_vm0, %v2001_v25 }
 0x33a   : > { %v1323_v16 = vpop.xlane.xlu1 %1322 }
 0x33b   : > { %v1324_v17 = vsub.f32 %v1315_v59, %v1323_v16 }
 0x33d   : > { %v1325_v18 = vmul.f32 1.442695, %v1324_v17 }
 0x33e   : > { %v1334_v19 = vpop.permute.xlu1 %1333 }
 0x33f   : > { %1913 = vpow2.f32 %v1325_v18  ;;  %v1339_v20 = vsel %vm999_vm9, %v1334_v19, 0  ;;  %v1479_v19 = vld [vmem:[%s2270_s27 + $0x3] sm:$0x1] }
 0x340   : > { %1838 = vmatpush3.bf16.msra.mxu0 %v1339_v20  ;;  %v1485_v20 = vld [vmem:[%s2270_s27 + $0x5] sm:$0x1] }
 0x34c   : > { %v1914_v21 = vpop.eup %1913 }
 0x34d   : > { %v1327_v22 = vsel %vm794_vm8, %v1914_v21, 0.0  ;;  %v1332_v23 = vpack.c.bf16 %v1914_v21, %v1914_v21 }
 0x34e   : > { %1328 = vadd.xlane.f32.xlu0 %v1327_v22 }
 0x34f   : > { %1840 = vmatmul.mubr.msk.bf16.vlgmr.msra.gmra.mxu0 %vm794_vm8, %v1332_v23 }
 0x352   : > { %848 = vadd.xlane.f32.xlu0 %v847_v24 }
 0x3a2   : > { %v1103_v25 = vpop.xlane.xlu0 %1102 }
 0x3a3   : > { %1915 = vrcp.f32 %v1103_v25 }
 0x3aa   : > { %v1216_v26 = vpop.xlane.xlu1 %1215 }
 0x3ab   : > { %1917 = vrcp.f32 %v1216_v26 }
 0x3b0   : > { %v1916_v28 = vpop.eup %1915 }
 0x3b1   : > { %v1156_v44 = vmul.f32 %v1916_v28, %v1910_v8 }
 0x3b8   : > { %v1918_v37 = vpop.eup %1917 }
 0x3b9   : > { %v1269_v48 = vmul.f32 %v1918_v37, %v1912_v13  ;;  %v1476_v13 = vld [vmem:[%s2270_s27 + $0x2] sm:$0x1] }
 0x3d7   : > { %v1329_v27 = vpop.xlane.xlu0 %1328 }
 0x3da   : > { %v1149_v29 = vpop.f32.mrf.mxu0 }
 0x3db   : > { %v1155_v30 = vmul.f32 %v1916_v28, %v1149_v29  ;;  %v849_v32 = vpop.xlane.xlu0 %848  ;;  %v1491_v28 = vld [vmem:[%s2270_s27 + $0x7] sm:$0x1] }
 0x3dc   : > { %1919 = vrcp.f32 %v849_v32  ;;  %v1817_v34 = vpop.f32.mrf.mxu0 }
 0x3dd   : > { %1385 = vrot.lane.b32.xlu1 %v1155_v30, %s2007_s14  ;;  %1921 = vrcp.f32 %v1329_v27 }
 0x3de   : > { %v1152_v35 = vpop.f32.mrf.mxu0 }
 0x3e0   : > { %v1818_v36 = vpop.f32.mrf.mxu0 }
 0x3e2   : > { %v1262_v38 = vpop.f32.mrf.mxu0 }
 0x3e3   : > { %v1268_v39 = vmul.f32 %v1918_v37, %v1262_v38 }
 0x3e4   : > { %v1829_v40 = vpop.f32.mrf.mxu0 }
 0x3e5   : > { %1389 = vrot.lane.b32.xlu0 %v1268_v39, %s2008_s21 }
 0x3e6   : > { %v1265_v41 = vpop.f32.mrf.mxu0 }
 0x3e8   : > { %v1830_v42 = vpop.f32.mrf.mxu0 }
 0x3e9   : > { %v1920_v43 = vpop.eup %1919 }
 0x3ea   : > { %v1044_v46 = vmul.f32 %v1920_v43, %v2211_v31  ;;  %v1922_v47 = vpop.eup %1921  ;;  %v1043_v31 = vmul.f32 %v1920_v43, %v2230_v45 }
 0x3eb   : > { %v1382_v50 = vmul.f32 %v1922_v47, %v1914_v21  ;;  %v1488_v21 = vld [vmem:[%s2270_s27 + $0x6] sm:$0x1] }
 0x3ec   : > { %v1157_v49 = vadd.f32 %v1156_v44, %v1044_v46 }
 0x3ee   : > { %v1270_v51 = vadd.f32 %v1269_v48, %v1157_v49 }
 0x3f0   : > { %v1383_v52 = vadd.f32 %v1382_v50, %v1270_v51 }
 0x3f2   : > { %v1494_v53 = vmul.f32 0.25, %v1383_v52 }
 0x3f4   : > { %1495 = vst.msk [vmem:[%s473_s22] sm:$0xff] %vm794_vm8, %v1494_v53 }
 0x40f   : > { %v1375_v54 = vpop.f32.mrf.mxu0 }
 0x410   : > { %v1381_v55 = vmul.f32 %v1922_v47, %v1375_v54 }
 0x411   : > { %v1841_v56 = vpop.f32.mrf.mxu0 }
 0x412   : > { %1393 = vrot.lane.b32.xlu1 %v1381_v55, %s2009_s24 }
 0x413   : > { %v1378_v57 = vpop.f32.mrf.mxu0 }
 0x415   : > { %v1842_v58 = vpop.f32.mrf.mxu0 }
 0x44f   : > { %v1386_v59 = vpop.permute.xlu1 %1385 }
 0x450   : > { %v1396_v61 = vsel %vm794_vm8, %v1043_v31, %v1386_v59 }
 0x457   : > { %v1390_v60 = vpop.permute.xlu0 %1389 }
 0x458   : > { %v1398_v62 = vsel %vm1397_vm10, %v1396_v61, %v1390_v60 }
 0x484   : > { %v1394_v63 = vpop.permute.xlu1 %1393 }
 0x485   : > { %v1400_v0 = vsel %vm1399_vm11, %v1398_v62, %v1394_v63 }
 0x486   : > { %v1402_v1 = vcombine.high %v1400_v0, %v1400_v0  ;;  %v1409_v2 = vrot.slane %v1400_v0, %v2132_v33 }
 0x488   : > { %v1416_v3 = vrot.slane %v1402_v1, %v2132_v33  ;;  %v1417_v4 = vcombine.high %v1409_v2, %v1409_v2  ;;  %v1425_v5 = vrot.slane %v1409_v2, %v2132_v33 }
 0x48a   : > { %v1418_v7 = vcombine.high %v1416_v3, %v1416_v3  ;;  %v1432_v8 = vrot.slane %v1416_v3, %v2132_v33  ;;  %v1439_v9 = vrot.slane %v1417_v4, %v2132_v33  ;;  %v1447_v10 = vcombine.high %v1425_v5, %v1425_v5 }
 0x48b   : > { %v1459_v11 = vpack.c.bf16 %v1425_v5, %v1425_v5 }
 0x48c   : > { %v1446_v15 = vrot.slane %v1418_v7, %v2132_v33  ;;  %v1448_v16 = vcombine.high %v1432_v8, %v1432_v8  ;;  %v1449_v17 = vcombine.high %v1439_v9, %v1439_v9  ;;  %v1460_v18 = vpack.c.bf16 %v1439_v9, %v1439_v9 }
 0x48d   : > { %v1461_v22 = vpack.c.bf16 %v1447_v10, %v1447_v10  ;;  %v1463_v23 = vpack.c.bf16 %v1432_v8, %v1432_v8  ;;  %v1471_v24 = vsel %vm2265_vm14, %v1459_v11, %v1470_v6 }
 0x48e   : > { %v1450_v25 = vcombine.high %v1446_v15, %v1446_v15  ;;  %v1462_v26 = vpack.c.bf16 %v1449_v17, %v1449_v17  ;;  %v1464_v27 = vpack.c.bf16 %v1446_v15, %v1446_v15  ;;  %v1465_v33 = vpack.c.bf16 %v1448_v16, %v1448_v16  ;;  %1472 = vst [vmem:[%s2270_s27] sm:$0x1] %v1471_v24 }
 0x48f   : > { %v1474_v29 = vsel %vm2265_vm14, %v1460_v18, %v1473_v12  ;;  %v1477_v30 = vsel %vm2265_vm14, %v1461_v22, %v1476_v13  ;;  %v1483_v32 = vsel %vm2265_vm14, %v1463_v23, %v1482_v14  ;;  %1507 = sbr.rel (!%p2079_p5) target bundleno = 1181 (0x49d), region = 159 }
 0x490   : > { %v1466_v34 = vpack.c.bf16 %v1450_v25, %v1450_v25  ;;  %1475 = vst [vmem:[%s2270_s27 + $0x1] sm:$0x1] %v1474_v29  ;;  %1478 = vst [vmem:[%s2270_s27 + $0x2] sm:$0x1] %v1477_v30  ;;  %v1480_v35 = vsel %vm2265_vm14, %v1462_v26, %v1479_v19  ;;  %v1486_v36 = vsel %vm2265_vm14, %v1464_v27, %v1485_v20 }
 0x491   : > { %1484 = vst [vmem:[%s2270_s27 + $0x4] sm:$0x1] %v1483_v32  ;;  %v1489_v37 = vsel %vm2265_vm14, %v1465_v33, %v1488_v21  ;;  %1481 = vst [vmem:[%s2270_s27 + $0x3] sm:$0x1] %v1480_v35 }
 0x492   : > { %1487 = vst [vmem:[%s2270_s27 + $0x5] sm:$0x1] %v1486_v36  ;;  %1490 = vst [vmem:[%s2270_s27 + $0x6] sm:$0x1] %v1489_v37  ;;  %v1492_v38 = vsel %vm2265_vm14, %v1466_v34, %v1491_v28 }
 0x493   : > { %1493 = vst [vmem:[%s2270_s27 + $0x7] sm:$0x1] %v1492_v38 }
 0x495   : > { %v1528_v39 = vld [vmem:[%s2270_s27] sm:$0x1] }
 0x496   : > { %1529 = vst [vmem:[%s1511_s8] sm:$0x1] %v1528_v39 }
 0x497   : > { %v1530_v40 = vld [vmem:[%s2270_s27 + $0x1] sm:$0x1]  ;;  %v1532_v41 = vld [vmem:[%s2270_s27 + $0x2] sm:$0x1] }
 0x498   : > { %1531 = vst [vmem:[%s1511_s8 + $0x2] sm:$0x1] %v1530_v40  ;;  %1533 = vst [vmem:[%s1511_s8 + $0x4] sm:$0x1] %v1532_v41  ;;  %v1534_v42 = vld [vmem:[%s2270_s27 + $0x3] sm:$0x1] }
 0x499   : > { %v1536_v43 = vld [vmem:[%s2270_s27 + $0x4] sm:$0x1]  ;;  %v1538_v44 = vld [vmem:[%s2270_s27 + $0x5] sm:$0x1]  ;;  %1535 = vst [vmem:[%s1511_s8 + $0x6] sm:$0x1] %v1534_v42 }
 0x49a   : > { %1537 = vst [vmem:[%s1511_s8 + $0x8] sm:$0x1] %v1536_v43  ;;  %1539 = vst [vmem:[%s1511_s8 + $0xa] sm:$0x1] %v1538_v44  ;;  %v1540_v46 = vld [vmem:[%s2270_s27 + $0x6] sm:$0x1] }
 0x49b   : > { %v1542_v47 = vld [vmem:[%s2270_s27 + $0x7] sm:$0x1]  ;;  %1541 = vst [vmem:[%s1511_s8 + $0xc] sm:$0x1] %v1540_v46 }
 0x49c   : > { %1543 = vst [vmem:[%s1511_s8 + $0xe] sm:$0x1] %v1542_v47 }
 0x49d PF: > { %s1776_s25 = sshll.u32 %s1991_s18, 7  ;;  %s1591_s9 = sshll.u32 %s473_s22, 4  ;;  %s1592_s9 = int_to_ptr.vmem [resolvable:$true] %s1591_s9 }
 0x49e   : > { %s1589_s12 = scalar_lea.hbm %s2371_s4, %s1776_s25  ;;  %s1923_s13 = scalar_lea.vmem %s1592_s9, 128 }
 0x49f   : > { %p1924_p0 = scmp.ne.s32.totalorder %s1592_s9, %s1923_s13  ;;  %s2010_s14 = smov [#allocation6]  }
 0x4a0   : > { %s1927_s21 = sshll.u32 %s2010_s14, 4  ;;  %s1928_s21 = int_to_ptr.vmem [resolvable:$false] %s1927_s21 }
 0x4a1   : > { %p1925_p1 = pnand %p1924_p0, %p2079_p5  ;;  %s1929_s24 = scalar_lea.vmem %s1928_s21, 256 }
 0x4a2   : > { %p1930_p3 = scmp.lt.s32.totalorder %s1592_s9, %s1928_s21  ;;  %p1931_p4 = scmp.lt.s32.totalorder %s1929_s24, %s1923_s13 }
 0x4a3   : > { %p1926_p2 = pneg %p1925_p1 }
 0x4a4   : > { %p1932_p6 = por %p1931_p4, %p1930_p3 }
 0x4a6   : > { %p1933_p7 = pnand %p1932_p6, %p1926_p2 }
 0x4a8   : > { %1936 = shalt.err (!%p1933_p7)
}
 0x4a9   : > { %s1937_s18 = scalar_lea.hbm %s1589_s12, 128  ;;  %s1941_s27 = scalar_lea.hbm %s2371_s4, 256 }
 0x4aa   : > { %p1938_p8 = scmp.ne.s32.totalorder %s1589_s12, %s1937_s18  ;;  %p1942_p13 = scmp.lt.s32.totalorder %s1589_s12, %s2371_s4 }
 0x4ab   : > { %p1943_p0 = scmp.lt.s32.totalorder %s1941_s27, %s1937_s18 }
 0x4ac   : > { %p1939_p11 = pnand %p1938_p8, %p2079_p5 }
 0x4ad   : > { %p1944_p1 = por %p1943_p0, %p1942_p13 }
 0x4ae   : > { %p1940_p12 = pneg %p1939_p11 }
 0x4b0   : > { %p1945_p10 = pnand %p1944_p1, %p1940_p12 }
 0x4b2   : > { %1948 = shalt.err (!%p1945_p10)
}
 0x4b3   : > { %1843 = dma.vmem_to_hbm [thread:$0]  (%p2079_p5), %s1592_s9, 128, %s1589_s12, %s2309_s30  }
 0x4b4 PF: > { %s1610_s8 = sand.u32 1, %s1979_s15   ;;  %p2378_p2 = scmp.ge.s32.totalorder %s1999_s20, 2 }
 0x4b5   : > { %s1611_s25 = scalar_lea.sflag [#allocation7], %s1610_s8 }
 0x4b6   : > { %p1846_p3 = pnand %p2378_p2, %p2090_p9 }
 0x4b8   : > { %p1847_p4 = pneg %p1846_p3 }
 0x4ba   : > { %1974 = dma.done.wait (%p1847_p4), %s1611_s25, 128  }
 0x4bb   : > { %1976 = vsyncadd (%p1847_p4), %s1611_s25, 4294967168  ;;  %s18_s20 = sadd.s32 1, %s1999_s20   ;;  %s2379_s15 = smov %s1983_s16 }
 0x4bc   : > { %p15_p6 = scmp.ge.s32.totalorder %s18_s20, 4   ;;  %s2380_s16 = smov %s1987_s17 }
 0x4bd   : > { %s2381_s17 = smov %s2088_s28  ;;  %s2382_s18 = smov %s1995_s19 }
 0x4be   : > { %s2383_s19 = smov %s2385_s23  ;;  %17 = sbr.rel (!%p15_p6) target bundleno = 4 (0x4), region = 264 }
 0x4c3   :  { %1616 = vsyncpa [#allocation7], 1 }
 0x4c4   :  { %1618 = vsyncpa [#allocation7 + $0x1], 1 }

</bundles_post_ra>
